<compile_context>
chip_gen: v7x
topology: tpu7x:2x2x1
jax: 0.10.0
libtpu: 0.0.40
codegen_flags: <defaults>
</compile_context>

<pallas_src>
import jax
import jax.numpy as jnp
from jax.experimental import pallas as pl
from jax.experimental.pallas import tpu as pltpu

# ---- deterministic "parameters" from the module __init__ defaults ----------
SMOOTH = 1e-8          # top-level clamp / WeightedBCELoss smooth
GDICE_SMOOTH = 1e-5    # GDiceLoss smooth (gdice=True inside BCE_DiceLoss)
GDICE_W_EPS = 1e-10    # GDiceLoss per-channel weight epsilon
POS_WEIGHT = (1.0, 1.0)
LOSS_WEIGHT = (1.0, 1.0)
BD_EPS = 1e-7          # boundary-F1 epsilon
THETA0 = 3             # boundary extraction max-pool kernel
THETA = 5              # extended boundary max-pool kernel
RMAX = (THETA - 1) // 2
NEG = -1e30            # -inf surrogate (all pooled values are in ~[0, 1])


def _make_valid_masks(H, W):
    """Per-image border-validity masks for +/-d shifts on a (2H, W) stack.

    Two (H, W) maps are stacked on the sublane axis so every max-pool stage
    processes both operands at once.  `valid_row` is built from the
    within-image row index (tiled to 2H), so a roll that wraps across the
    stack seam -- or across the array edge -- is replaced by NEG, reproducing
    F.max_pool2d's -inf padding exactly.
    """
    row1 = jax.lax.broadcasted_iota(jnp.int32, (H, W), 0)
    row = jnp.concatenate([row1, row1], axis=0)            # within-image row
    col = jax.lax.broadcasted_iota(jnp.int32, (2 * H, W), 1)
    valid_row, valid_col = {}, {}
    for d in range(-RMAX, RMAX + 1):
        if d == 0:
            continue
        valid_row[d] = (row < H - d) if d > 0 else (row >= -d)
        valid_col[d] = (col < W - d) if d > 0 else (col >= -d)
    return valid_row, valid_col


def _shift(x, d, axis, valid):
    """out[i] = x[i + d] along `axis` (per image), NEG outside the image.

    pltpu.roll is an XLU lane/sublane rotate (jnp.roll semantics); the mask
    kills wrap-around / cross-seam values.
    """
    n = x.shape[axis]
    rolled = pltpu.roll(x, (-d) % n, axis)
    return jnp.where(valid[d], rolled, NEG)


def _maxpool_stacked(x, k, valid_row, valid_col):
    """k x k stride-1 'same' max pool (== F.max_pool2d), separable, on the
    (2H, W) stacked operand pair."""
    r = (k - 1) // 2
    row = x
    for d in range(1, r + 1):                      # lane (width) pass
        row = jnp.maximum(row,
                          jnp.maximum(_shift(x, d, 1, valid_col),
                                      _shift(x, -d, 1, valid_col)))
    out = row
    for d in range(1, r + 1):                      # sublane (height) pass
        out = jnp.maximum(out,
                          jnp.maximum(_shift(row, d, 0, valid_row),
                                      _shift(row, -d, 0, valid_row)))
    return out


def _make_kernel(C, H, W):
    inv_chw = 1.0 / float(C * H * W)
    pw0, pw1 = POS_WEIGHT
    pw_sum = pw0 + pw1
    lw0, lw1 = LOSS_WEIGHT
    lw_sum = lw0 + lw1

    def kernel(p_ref, t_ref, wbce_dice_out, bd_out):
        # Border masks: built once per sample, reused by every channel / pool.
        valid_row, valid_col = _make_valid_masks(H, W)

        bce_sum = jnp.float32(0.0)     # sum of pw0*t*log(p+s)+pw1*(1-t)*log(1-p+s)
        inter_sum = jnp.float32(0.0)   # GDice: sum_c w_c * <p, t>_c
        union_sum = jnp.float32(0.0)   # GDice: sum_c w_c * (sum p_c + sum t_c)
        bd_acc = jnp.float32(0.0)

        # C is small & static -> unrolled.
        # TODO(synk): switch to lax.fori_loop (small unroll) if C grows large
        # enough for the unrolled body to blow up compile time.
        for c in range(C):
            p = jnp.maximum(p_ref[c].astype(jnp.float32), SMOOTH)  # clamp(min)
            t = t_ref[c].astype(jnp.float32)

            # --- WeightedBCELoss (sce=False): reduced per channel so no (H,W)
            #     partial stays live across the heavier boundary section.
            #     (Two logs kept on purpose: targets may be soft labels.)
            bce_sum = bce_sum + jnp.sum(
                pw0 * t * jnp.log(p + SMOOTH)
                + pw1 * (1.0 - t) * jnp.log(1.0 - p + SMOOTH))

            # --- GDiceLoss: per-channel sums (cannot be deferred across
            #     channels because of the per-channel 1/(sum t)^2 weight).
            s_t = jnp.sum(t)
            s_p = jnp.sum(p)
            s_pt = jnp.sum(p * t)
            w_c = 1.0 / ((s_t + GDICE_W_EPS) * (s_t + GDICE_W_EPS))
            inter_sum = inter_sum + w_c * s_pt
            union_sum = union_sum + w_c * (s_p + s_t)

            # --- BoundaryLoss (boundary F1 with theta0=3, theta=5).
            # TODO(synk): BoundaryLoss source is not in the provided spec; this
            # is the standard max-pool boundary-F1 variant applied to the
            # clamped probability map / mask directly.
            # Stack (1-p, 1-t) on the sublane axis -> one theta0 pool for both.
            stacked = jnp.concatenate([1.0 - p, 1.0 - t], axis=0)   # (2H, W)
            b = _maxpool_stacked(stacked, THETA0, valid_row, valid_col) - stacked
            pred_b = b[:H]                                           # from 1-p
            gt_b = b[H:]                                             # from 1-t
            # Reduce denominators immediately (live-set discipline).
            sum_pred_b = jnp.sum(pred_b)
            sum_gt_b = jnp.sum(gt_b)
            # One theta pool for both extended boundaries.
            ext = _maxpool_stacked(b, THETA, valid_row, valid_col)   # (2H, W)
            prec = jnp.sum(pred_b * ext[H:]) / (sum_pred_b + BD_EPS)  # *gt_b_ext
            rec = jnp.sum(ext[:H] * gt_b) / (sum_gt_b + BD_EPS)      # pred_b_ext*
            bf1 = 2.0 * prec * rec / (prec + rec + BD_EPS)
            bd_acc = bd_acc + (1.0 - bf1)

        bce = -bce_sum / pw_sum * inv_chw             # per-sample mean (C,H,W)
        gdice = 1.0 - 2.0 * (inter_sum + GDICE_SMOOTH) / (union_sum + GDICE_SMOOTH)
        wbce_dice = (lw0 * bce + lw1 * gdice) / lw_sum

        # Scalar results are materialized as lane-dense (8, 128) tiles so each
        # grid step writes its own disjoint, unmasked block (this is what makes
        # the "parallel" batch axis megacore-safe on v7x).
        wbce_dice_out[...] = jnp.broadcast_to(wbce_dice, wbce_dice_out.shape)
        bd_out[...] = jnp.broadcast_to(bd_acc / float(C), bd_out.shape)

    return kernel


def generalized_boundary_combo_forward(predict, target, alpha):
    """Forward of GeneralizedBoundaryComboLoss (reduction='none') -> shape (N,)."""
    N, C, H, W = predict.shape
    assert target.shape == predict.shape, "predict & target shapes must match"
    assert H > 2 * RMAX and W > 2 * RMAX, "spatial dims must exceed pool radius"
    assert H % 8 == 0 and W % 128 == 0, (
        "spatial dims must be (8, 128)-aligned for the roll-based pooling")

    kernel = _make_kernel(C, H, W)

    # VMEM budget: 2 pipeline buffers per input block + live (2H, W) f32 temps
    # in the boundary section (+ spill scratch slack).
    in_bytes = 2 * C * H * W * (predict.dtype.itemsize + target.dtype.itemsize)
    work_bytes = 32 * (2 * H) * W * 4
    needed = in_bytes + work_bytes + (4 << 20)
    try:
        phys_vmem = pltpu.get_tpu_info().vmem_capacity_bytes  # 64 MiB on v7x
    except Exception:  # pragma: no cover - conservative fallback
        phys_vmem = 64 << 20
    # Always set the limit (v5e scoped default is only 16 MiB); never exceed
    # physical VMEM minus headroom (matters on v7x's 64 MiB).
    vmem_limit = int(min(max(needed, 32 << 20), phys_vmem - (8 << 20)))
    # TODO(synk): for very large images (a full sample no longer fits VMEM),
    # add an H-strip grid axis with a 2*RMAX-row halo instead of only raising
    # the limit; that second axis would also keep both v7x TensorCores busy
    # when N == 1.

    wbce_tile, bd_tile = pl.pallas_call(
        kernel,
        out_shape=(jax.ShapeDtypeStruct((N, 8, 128), jnp.float32),
                   jax.ShapeDtypeStruct((N, 8, 128), jnp.float32)),
        grid_spec=pltpu.PrefetchScalarGridSpec(
            num_scalar_prefetch=0,
            grid=(N,),
            in_specs=[
                pl.BlockSpec((None, C, H, W), lambda n: (n, 0, 0, 0)),
                pl.BlockSpec((None, C, H, W), lambda n: (n, 0, 0, 0)),
            ],
            out_specs=(
                pl.BlockSpec((1, 8, 128), lambda n: (n, 0, 0)),
                pl.BlockSpec((1, 8, 128), lambda n: (n, 0, 0)),
            ),
        ),
        compiler_params=pltpu.CompilerParams(
            dimension_semantics=("parallel",),   # batch sharded across cores
            vmem_limit_bytes=vmem_limit),
    )(predict, target)

    wbce_dice = wbce_tile[:, 0, 0]               # per-sample BCE+GDice combo
    bd_scalar = jnp.mean(bd_tile[:, 0, 0])       # BoundaryLoss scalar (N,C mean)
    return alpha * wbce_dice + (1.0 - alpha) * bd_scalar


class GeneralizedBoundaryComboLoss:
    """Python-side wrapper mirroring the PyTorch module's alpha schedule."""

    def __init__(self, per_epoch, alpha_min=0.01, decrease_ratio=1):
        self.alpha = 1.0
        self.alpha_min = alpha_min
        self.fix_alpha = False
        self.decrease_ratio = decrease_ratio
        self.per_epoch = per_epoch
        self.iter = 1

    def __call__(self, predict, target):
        loss = generalized_boundary_combo_forward(predict, target, self.alpha)
        if (self.iter % self.per_epoch == 0 and self.alpha > self.alpha_min
                and not self.fix_alpha):
            self.alpha -= 0.01 * self.decrease_ratio
            self.iter = 0
        self.iter += 1
        return loss


# ------------------------- pure-JAX reference (for sanity) -------------------
def _reference(predict, target, alpha):
    p = jnp.maximum(predict.astype(jnp.float32), SMOOTH)
    t = target.astype(jnp.float32)
    pw0, pw1 = POS_WEIGHT
    lw0, lw1 = LOSS_WEIGHT
    # WeightedBCELoss, reduction='mean' over (C, H, W)
    bce = -(pw0 * t * jnp.log(p + SMOOTH)
            + pw1 * (1 - t) * jnp.log(1 - p + SMOOTH)) / (pw0 + pw1)
    bce = bce.mean(axis=(1, 2, 3))
    # GDiceLoss
    s_t = t.sum(axis=(2, 3))
    s_p = p.sum(axis=(2, 3))
    s_pt = (p * t).sum(axis=(2, 3))
    w = 1.0 / (s_t + GDICE_W_EPS) ** 2
    inter = (w * s_pt).sum(axis=1)
    union = (w * (s_p + s_t)).sum(axis=1)
    gdc = 1.0 - 2.0 * (inter + GDICE_SMOOTH) / (union + GDICE_SMOOTH)
    wbce_dice = (lw0 * bce + lw1 * gdc) / (lw0 + lw1)

    # BoundaryLoss (standard boundary-F1, theta0=3, theta=5)
    def mp(x, k):
        pad = (k - 1) // 2
        return jax.lax.reduce_window(
            x, -jnp.inf, jax.lax.max, (1, 1, k, k), (1, 1, 1, 1),
            [(0, 0), (0, 0), (pad, pad), (pad, pad)])

    gt_b = mp(1 - t, THETA0) - (1 - t)
    pred_b = mp(1 - p, THETA0) - (1 - p)
    gt_b_ext = mp(gt_b, THETA)
    pred_b_ext = mp(pred_b, THETA)
    P = (pred_b * gt_b_ext).sum(axis=(2, 3)) / (pred_b.sum(axis=(2, 3)) + BD_EPS)
    R = (pred_b_ext * gt_b).sum(axis=(2, 3)) / (gt_b.sum(axis=(2, 3)) + BD_EPS)
    bf1 = 2 * P * R / (P + R + BD_EPS)
    bd = jnp.mean(1 - bf1)
    return alpha * wbce_dice + (1 - alpha) * bd


if __name__ == "__main__":
    key = jax.random.PRNGKey(0)
    k1, k2 = jax.random.split(key)
    # Small batch / channels; lane-dense spatial size (W a multiple of 128).
    N, C, H, W = 2, 2, 64, 128
    predict = jax.random.uniform(k1, (N, C, H, W), dtype=jnp.float32,
                                 minval=0.01, maxval=0.99)
    # Binary mask kept in bf16 (lossless for {0, 1}; halves its DMA traffic).
    target = (jax.random.uniform(k2, (N, C, H, W)) > 0.7).astype(jnp.bfloat16)

    loss_fn = GeneralizedBoundaryComboLoss(per_epoch=10)
    out = jax.block_until_ready(loss_fn(predict, target))        # alpha = 1.0

    # Exercise the boundary branch too (alpha != 1) and compare vs reference.
    out2 = jax.block_until_ready(
        generalized_boundary_combo_forward(predict, target, 0.7))
    ref1 = _reference(predict, target, 1.0)
    ref2 = _reference(predict, target, 0.7)
    assert out.shape == (N,) and out2.shape == (N,)
    assert jnp.allclose(out, ref1, rtol=1e-3, atol=1e-4), (out, ref1)
    assert jnp.allclose(out2, ref2, rtol=1e-3, atol=1e-4), (out2, ref2)

    print("KERNEL_OK")
</pallas_src>

<mosaic_0001>
module attributes {stable_mosaic.version = 11 : i64} {
  func.func @kernel(%arg0: i32, %arg1: memref<1x2x64x128xf32, #tpu.memory_space<vmem>>, %arg2: memref<1x2x64x128xbf16, #tpu.memory_space<vmem>>, %arg3: memref<1x8x128xf32, #tpu.memory_space<vmem>>, %arg4: memref<1x8x128xf32, #tpu.memory_space<vmem>>) attributes {dimension_semantics = [#tpu.dimension_semantics<parallel>], iteration_bounds = array<i64: 2>, scalar_prefetch = 0 : i64, scratch_operands = 0 : i64, tpu.core_type = #tpu.core_type<tc>, window_params = [{transform_indices = @transform_0, window_bounds = array<i64: 1, 2, 64, 128>}, {transform_indices = @transform_1, window_bounds = array<i64: 1, 2, 64, 128>}, {transform_indices = @transform_2, window_bounds = array<i64: 1, 8, 128>}, {transform_indices = @transform_3, window_bounds = array<i64: 1, 8, 128>}]} {
    %0 = tpu.iota {dimensions = array<i32: 0>} : vector<64x128xi32>
    %1 = tpu.concatenate %0, %0 in 0 : vector<64x128xi32>, vector<64x128xi32> -> vector<128x128xi32>
    %2 = tpu.iota {dimensions = array<i32: 1>} : vector<128x128xi32>
    %c2_i32 = arith.constant 2 : i32
    %3 = vector.broadcast %c2_i32 : i32 to vector<128x128xi32>
    %4 = arith.cmpi sge, %1, %3 : vector<128x128xi32>
    %c2_i32_0 = arith.constant 2 : i32
    %5 = vector.broadcast %c2_i32_0 : i32 to vector<128x128xi32>
    %6 = arith.cmpi sge, %2, %5 : vector<128x128xi32>
    %c1_i32 = arith.constant 1 : i32
    %7 = vector.broadcast %c1_i32 : i32 to vector<128x128xi32>
    %8 = arith.cmpi sge, %1, %7 : vector<128x128xi32>
    %c1_i32_1 = arith.constant 1 : i32
    %9 = vector.broadcast %c1_i32_1 : i32 to vector<128x128xi32>
    %10 = arith.cmpi sge, %2, %9 : vector<128x128xi32>
    %c63_i32 = arith.constant 63 : i32
    %11 = vector.broadcast %c63_i32 : i32 to vector<128x128xi32>
    %12 = arith.cmpi slt, %1, %11 : vector<128x128xi32>
    %c127_i32 = arith.constant 127 : i32
    %13 = vector.broadcast %c127_i32 : i32 to vector<128x128xi32>
    %14 = arith.cmpi slt, %2, %13 : vector<128x128xi32>
    %c62_i32 = arith.constant 62 : i32
    %15 = vector.broadcast %c62_i32 : i32 to vector<128x128xi32>
    %16 = arith.cmpi slt, %1, %15 : vector<128x128xi32>
    %c126_i32 = arith.constant 126 : i32
    %17 = vector.broadcast %c126_i32 : i32 to vector<128x128xi32>
    %18 = arith.cmpi slt, %2, %17 : vector<128x128xi32>
    %c0 = arith.constant 0 : index
    %c0_2 = arith.constant 0 : index
    %c0_3 = arith.constant 0 : index
    %c0_4 = arith.constant 0 : index
    %19 = vector.load %arg1[%c0, %c0_2, %c0_3, %c0_4] : memref<1x2x64x128xf32, #tpu.memory_space<vmem>>, vector<1x1x64x128xf32>
    %20 = vector.shape_cast %19 : vector<1x1x64x128xf32> to vector<64x128xf32>
    %cst = arith.constant 9.99999993E-9 : f32
    %21 = vector.broadcast %cst : f32 to vector<64x128xf32>
    %22 = arith.maximumf %20, %21 : vector<64x128xf32>
    %c0_5 = arith.constant 0 : index
    %c0_6 = arith.constant 0 : index
    %c0_7 = arith.constant 0 : index
    %c0_8 = arith.constant 0 : index
    %23 = vector.load %arg2[%c0_5, %c0_6, %c0_7, %c0_8] : memref<1x2x64x128xbf16, #tpu.memory_space<vmem>>, vector<1x1x64x128xbf16>
    %24 = vector.shape_cast %23 : vector<1x1x64x128xbf16> to vector<64x128xbf16>
    %25 = arith.extf %24 : vector<64x128xbf16> to vector<64x128xf32>
    %cst_9 = arith.constant 1.000000e+00 : f32
    %26 = vector.broadcast %cst_9 : f32 to vector<64x128xf32>
    %27 = arith.mulf %26, %25 : vector<64x128xf32>
    %cst_10 = arith.constant 9.99999993E-9 : f32
    %28 = vector.broadcast %cst_10 : f32 to vector<64x128xf32>
    %29 = arith.addf %22, %28 : vector<64x128xf32>
    %30 = math.log %29 : vector<64x128xf32>
    %31 = arith.mulf %27, %30 : vector<64x128xf32>
    %cst_11 = arith.constant 1.000000e+00 : f32
    %32 = vector.broadcast %cst_11 : f32 to vector<64x128xf32>
    %33 = arith.subf %32, %25 : vector<64x128xf32>
    %cst_12 = arith.constant 1.000000e+00 : f32
    %34 = vector.broadcast %cst_12 : f32 to vector<64x128xf32>
    %35 = arith.mulf %34, %33 : vector<64x128xf32>
    %cst_13 = arith.constant 1.000000e+00 : f32
    %36 = vector.broadcast %cst_13 : f32 to vector<64x128xf32>
    %37 = arith.subf %36, %22 : vector<64x128xf32>
    %cst_14 = arith.constant 9.99999993E-9 : f32
    %38 = vector.broadcast %cst_14 : f32 to vector<64x128xf32>
    %39 = arith.addf %37, %38 : vector<64x128xf32>
    %40 = math.log %39 : vector<64x128xf32>
    %41 = arith.mulf %35, %40 : vector<64x128xf32>
    %42 = arith.addf %31, %41 : vector<64x128xf32>
    %43 = vector.shape_cast %42 : vector<64x128xf32> to vector<1x64x128xf32>
    %cst_15 = arith.constant dense<0.000000e+00> : vector<1xf32>
    %44 = vector.multi_reduction <add>, %43, %cst_15 [1, 2] : vector<1x64x128xf32> to vector<1xf32>
    %45 = vector.shape_cast %44 : vector<1xf32> to vector<1x1x1xf32>
    %46 = vector.extract %45[0, 0, 0] : f32 from vector<1x1x1xf32>
    %cst_16 = arith.constant 0.000000e+00 : f32
    %47 = arith.addf %cst_16, %46 : f32
    %48 = vector.shape_cast %25 : vector<64x128xf32> to vector<1x64x128xf32>
    %cst_17 = arith.constant dense<0.000000e+00> : vector<1xf32>
    %49 = vector.multi_reduction <add>, %48, %cst_17 [1, 2] : vector<1x64x128xf32> to vector<1xf32>
    %50 = vector.shape_cast %49 : vector<1xf32> to vector<1x1x1xf32>
    %51 = vector.extract %50[0, 0, 0] : f32 from vector<1x1x1xf32>
    %52 = vector.shape_cast %22 : vector<64x128xf32> to vector<1x64x128xf32>
    %cst_18 = arith.constant dense<0.000000e+00> : vector<1xf32>
    %53 = vector.multi_reduction <add>, %52, %cst_18 [1, 2] : vector<1x64x128xf32> to vector<1xf32>
    %54 = vector.shape_cast %53 : vector<1xf32> to vector<1x1x1xf32>
    %55 = vector.extract %54[0, 0, 0] : f32 from vector<1x1x1xf32>
    %56 = arith.mulf %22, %25 : vector<64x128xf32>
    %57 = vector.shape_cast %56 : vector<64x128xf32> to vector<1x64x128xf32>
    %cst_19 = arith.constant dense<0.000000e+00> : vector<1xf32>
    %58 = vector.multi_reduction <add>, %57, %cst_19 [1, 2] : vector<1x64x128xf32> to vector<1xf32>
    %59 = vector.shape_cast %58 : vector<1xf32> to vector<1x1x1xf32>
    %60 = vector.extract %59[0, 0, 0] : f32 from vector<1x1x1xf32>
    %cst_20 = arith.constant 1.000000e-10 : f32
    %61 = arith.addf %51, %cst_20 : f32
    %cst_21 = arith.constant 1.000000e-10 : f32
    %62 = arith.addf %51, %cst_21 : f32
    %63 = arith.mulf %61, %62 : f32
    %cst_22 = arith.constant 1.000000e+00 : f32
    %64 = arith.divf %cst_22, %63 : f32
    %65 = arith.mulf %64, %60 : f32
    %cst_23 = arith.constant 0.000000e+00 : f32
    %66 = arith.addf %cst_23, %65 : f32
    %67 = arith.addf %55, %51 : f32
    %68 = arith.mulf %64, %67 : f32
    %cst_24 = arith.constant 0.000000e+00 : f32
    %69 = arith.addf %cst_24, %68 : f32
    %cst_25 = arith.constant 1.000000e+00 : f32
    %70 = vector.broadcast %cst_25 : f32 to vector<64x128xf32>
    %71 = arith.subf %70, %22 : vector<64x128xf32>
    %cst_26 = arith.constant 1.000000e+00 : f32
    %72 = vector.broadcast %cst_26 : f32 to vector<64x128xf32>
    %73 = arith.subf %72, %25 : vector<64x128xf32>
    %74 = tpu.concatenate %71, %73 in 0 : vector<64x128xf32>, vector<64x128xf32> -> vector<128x128xf32>
    %c127_i32_27 = arith.constant 127 : i32
    %75 = tpu.dynamic_rotate %74 by %c127_i32_27 dim 1 : vector<128x128xf32>, i32 -> vector<128x128xf32>
    %cst_28 = arith.constant -1.000000e+30 : f32
    %76 = vector.broadcast %cst_28 : f32 to vector<128x128xf32>
    %77 = arith.select %14, %75, %76 : vector<128x128xi1>, vector<128x128xf32>
    %c1_i32_29 = arith.constant 1 : i32
    %78 = tpu.dynamic_rotate %74 by %c1_i32_29 dim 1 : vector<128x128xf32>, i32 -> vector<128x128xf32>
    %cst_30 = arith.constant -1.000000e+30 : f32
    %79 = vector.broadcast %cst_30 : f32 to vector<128x128xf32>
    %80 = arith.select %10, %78, %79 : vector<128x128xi1>, vector<128x128xf32>
    %81 = arith.maximumf %77, %80 : vector<128x128xf32>
    %82 = arith.maximumf %74, %81 : vector<128x128xf32>
    %c127_i32_31 = arith.constant 127 : i32
    %83 = tpu.dynamic_rotate %82 by %c127_i32_31 dim 0 : vector<128x128xf32>, i32 -> vector<128x128xf32>
    %cst_32 = arith.constant -1.000000e+30 : f32
    %84 = vector.broadcast %cst_32 : f32 to vector<128x128xf32>
    %85 = arith.select %12, %83, %84 : vector<128x128xi1>, vector<128x128xf32>
    %c1_i32_33 = arith.constant 1 : i32
    %86 = tpu.dynamic_rotate %82 by %c1_i32_33 dim 0 : vector<128x128xf32>, i32 -> vector<128x128xf32>
    %cst_34 = arith.constant -1.000000e+30 : f32
    %87 = vector.broadcast %cst_34 : f32 to vector<128x128xf32>
    %88 = arith.select %8, %86, %87 : vector<128x128xi1>, vector<128x128xf32>
    %89 = arith.maximumf %85, %88 : vector<128x128xf32>
    %90 = arith.maximumf %82, %89 : vector<128x128xf32>
    %91 = arith.subf %90, %74 : vector<128x128xf32>
    %92 = vector.extract_strided_slice %91 {offsets = [0, 0], sizes = [64, 128], strides = [1, 1]} : vector<128x128xf32> to vector<64x128xf32>
    %93 = vector.extract_strided_slice %91 {offsets = [64, 0], sizes = [64, 128], strides = [1, 1]} : vector<128x128xf32> to vector<64x128xf32>
    %94 = vector.shape_cast %92 : vector<64x128xf32> to vector<1x64x128xf32>
    %cst_35 = arith.constant dense<0.000000e+00> : vector<1xf32>
    %95 = vector.multi_reduction <add>, %94, %cst_35 [1, 2] : vector<1x64x128xf32> to vector<1xf32>
    %96 = vector.shape_cast %95 : vector<1xf32> to vector<1x1x1xf32>
    %97 = vector.extract %96[0, 0, 0] : f32 from vector<1x1x1xf32>
    %98 = vector.shape_cast %93 : vector<64x128xf32> to vector<1x64x128xf32>
    %cst_36 = arith.constant dense<0.000000e+00> : vector<1xf32>
    %99 = vector.multi_reduction <add>, %98, %cst_36 [1, 2] : vector<1x64x128xf32> to vector<1xf32>
    %100 = vector.shape_cast %99 : vector<1xf32> to vector<1x1x1xf32>
    %101 = vector.extract %100[0, 0, 0] : f32 from vector<1x1x1xf32>
    %c127_i32_37 = arith.constant 127 : i32
    %102 = tpu.dynamic_rotate %91 by %c127_i32_37 dim 1 : vector<128x128xf32>, i32 -> vector<128x128xf32>
    %cst_38 = arith.constant -1.000000e+30 : f32
    %103 = vector.broadcast %cst_38 : f32 to vector<128x128xf32>
    %104 = arith.select %14, %102, %103 : vector<128x128xi1>, vector<128x128xf32>
    %c1_i32_39 = arith.constant 1 : i32
    %105 = tpu.dynamic_rotate %91 by %c1_i32_39 dim 1 : vector<128x128xf32>, i32 -> vector<128x128xf32>
    %cst_40 = arith.constant -1.000000e+30 : f32
    %106 = vector.broadcast %cst_40 : f32 to vector<128x128xf32>
    %107 = arith.select %10, %105, %106 : vector<128x128xi1>, vector<128x128xf32>
    %108 = arith.maximumf %104, %107 : vector<128x128xf32>
    %109 = arith.maximumf %91, %108 : vector<128x128xf32>
    %c126_i32_41 = arith.constant 126 : i32
    %110 = tpu.dynamic_rotate %91 by %c126_i32_41 dim 1 : vector<128x128xf32>, i32 -> vector<128x128xf32>
    %cst_42 = arith.constant -1.000000e+30 : f32
    %111 = vector.broadcast %cst_42 : f32 to vector<128x128xf32>
    %112 = arith.select %18, %110, %111 : vector<128x128xi1>, vector<128x128xf32>
    %c2_i32_43 = arith.constant 2 : i32
    %113 = tpu.dynamic_rotate %91 by %c2_i32_43 dim 1 : vector<128x128xf32>, i32 -> vector<128x128xf32>
    %cst_44 = arith.constant -1.000000e+30 : f32
    %114 = vector.broadcast %cst_44 : f32 to vector<128x128xf32>
    %115 = arith.select %6, %113, %114 : vector<128x128xi1>, vector<128x128xf32>
    %116 = arith.maximumf %112, %115 : vector<128x128xf32>
    %117 = arith.maximumf %109, %116 : vector<128x128xf32>
    %c127_i32_45 = arith.constant 127 : i32
    %118 = tpu.dynamic_rotate %117 by %c127_i32_45 dim 0 : vector<128x128xf32>, i32 -> vector<128x128xf32>
    %cst_46 = arith.constant -1.000000e+30 : f32
    %119 = vector.broadcast %cst_46 : f32 to vector<128x128xf32>
    %120 = arith.select %12, %118, %119 : vector<128x128xi1>, vector<128x128xf32>
    %c1_i32_47 = arith.constant 1 : i32
    %121 = tpu.dynamic_rotate %117 by %c1_i32_47 dim 0 : vector<128x128xf32>, i32 -> vector<128x128xf32>
    %cst_48 = arith.constant -1.000000e+30 : f32
    %122 = vector.broadcast %cst_48 : f32 to vector<128x128xf32>
    %123 = arith.select %8, %121, %122 : vector<128x128xi1>, vector<128x128xf32>
    %124 = arith.maximumf %120, %123 : vector<128x128xf32>
    %125 = arith.maximumf %117, %124 : vector<128x128xf32>
    %c126_i32_49 = arith.constant 126 : i32
    %126 = tpu.dynamic_rotate %117 by %c126_i32_49 dim 0 : vector<128x128xf32>, i32 -> vector<128x128xf32>
    %cst_50 = arith.constant -1.000000e+30 : f32
    %127 = vector.broadcast %cst_50 : f32 to vector<128x128xf32>
    %128 = arith.select %16, %126, %127 : vector<128x128xi1>, vector<128x128xf32>
    %c2_i32_51 = arith.constant 2 : i32
    %129 = tpu.dynamic_rotate %117 by %c2_i32_51 dim 0 : vector<128x128xf32>, i32 -> vector<128x128xf32>
    %cst_52 = arith.constant -1.000000e+30 : f32
    %130 = vector.broadcast %cst_52 : f32 to vector<128x128xf32>
    %131 = arith.select %4, %129, %130 : vector<128x128xi1>, vector<128x128xf32>
    %132 = arith.maximumf %128, %131 : vector<128x128xf32>
    %133 = arith.maximumf %125, %132 : vector<128x128xf32>
    %134 = vector.extract_strided_slice %133 {offsets = [64, 0], sizes = [64, 128], strides = [1, 1]} : vector<128x128xf32> to vector<64x128xf32>
    %135 = arith.mulf %92, %134 : vector<64x128xf32>
    %136 = vector.shape_cast %135 : vector<64x128xf32> to vector<1x64x128xf32>
    %cst_53 = arith.constant dense<0.000000e+00> : vector<1xf32>
    %137 = vector.multi_reduction <add>, %136, %cst_53 [1, 2] : vector<1x64x128xf32> to vector<1xf32>
    %138 = vector.shape_cast %137 : vector<1xf32> to vector<1x1x1xf32>
    %139 = vector.extract %138[0, 0, 0] : f32 from vector<1x1x1xf32>
    %cst_54 = arith.constant 1.000000e-07 : f32
    %140 = arith.addf %97, %cst_54 : f32
    %141 = arith.divf %139, %140 : f32
    %142 = vector.extract_strided_slice %133 {offsets = [0, 0], sizes = [64, 128], strides = [1, 1]} : vector<128x128xf32> to vector<64x128xf32>
    %143 = arith.mulf %142, %93 : vector<64x128xf32>
    %144 = vector.shape_cast %143 : vector<64x128xf32> to vector<1x64x128xf32>
    %cst_55 = arith.constant dense<0.000000e+00> : vector<1xf32>
    %145 = vector.multi_reduction <add>, %144, %cst_55 [1, 2] : vector<1x64x128xf32> to vector<1xf32>
    %146 = vector.shape_cast %145 : vector<1xf32> to vector<1x1x1xf32>
    %147 = vector.extract %146[0, 0, 0] : f32 from vector<1x1x1xf32>
    %cst_56 = arith.constant 1.000000e-07 : f32
    %148 = arith.addf %101, %cst_56 : f32
    %149 = arith.divf %147, %148 : f32
    %cst_57 = arith.constant 2.000000e+00 : f32
    %150 = arith.mulf %cst_57, %141 : f32
    %151 = arith.mulf %150, %149 : f32
    %152 = arith.addf %141, %149 : f32
    %cst_58 = arith.constant 1.000000e-07 : f32
    %153 = arith.addf %152, %cst_58 : f32
    %154 = arith.divf %151, %153 : f32
    %cst_59 = arith.constant 1.000000e+00 : f32
    %155 = arith.subf %cst_59, %154 : f32
    %cst_60 = arith.constant 0.000000e+00 : f32
    %156 = arith.addf %cst_60, %155 : f32
    %c0_61 = arith.constant 0 : index
    %c1 = arith.constant 1 : index
    %c0_62 = arith.constant 0 : index
    %c0_63 = arith.constant 0 : index
    %157 = vector.load %arg1[%c0_61, %c1, %c0_62, %c0_63] : memref<1x2x64x128xf32, #tpu.memory_space<vmem>>, vector<1x1x64x128xf32>
    %158 = vector.shape_cast %157 : vector<1x1x64x128xf32> to vector<64x128xf32>
    %cst_64 = arith.constant 9.99999993E-9 : f32
    %159 = vector.broadcast %cst_64 : f32 to vector<64x128xf32>
    %160 = arith.maximumf %158, %159 : vector<64x128xf32>
    %c0_65 = arith.constant 0 : index
    %c1_66 = arith.constant 1 : index
    %c0_67 = arith.constant 0 : index
    %c0_68 = arith.constant 0 : index
    %161 = vector.load %arg2[%c0_65, %c1_66, %c0_67, %c0_68] : memref<1x2x64x128xbf16, #tpu.memory_space<vmem>>, vector<1x1x64x128xbf16>
    %162 = vector.shape_cast %161 : vector<1x1x64x128xbf16> to vector<64x128xbf16>
    %163 = arith.extf %162 : vector<64x128xbf16> to vector<64x128xf32>
    %cst_69 = arith.constant 1.000000e+00 : f32
    %164 = vector.broadcast %cst_69 : f32 to vector<64x128xf32>
    %165 = arith.mulf %164, %163 : vector<64x128xf32>
    %cst_70 = arith.constant 9.99999993E-9 : f32
    %166 = vector.broadcast %cst_70 : f32 to vector<64x128xf32>
    %167 = arith.addf %160, %166 : vector<64x128xf32>
    %168 = math.log %167 : vector<64x128xf32>
    %169 = arith.mulf %165, %168 : vector<64x128xf32>
    %cst_71 = arith.constant 1.000000e+00 : f32
    %170 = vector.broadcast %cst_71 : f32 to vector<64x128xf32>
    %171 = arith.subf %170, %163 : vector<64x128xf32>
    %cst_72 = arith.constant 1.000000e+00 : f32
    %172 = vector.broadcast %cst_72 : f32 to vector<64x128xf32>
    %173 = arith.mulf %172, %171 : vector<64x128xf32>
    %cst_73 = arith.constant 1.000000e+00 : f32
    %174 = vector.broadcast %cst_73 : f32 to vector<64x128xf32>
    %175 = arith.subf %174, %160 : vector<64x128xf32>
    %cst_74 = arith.constant 9.99999993E-9 : f32
    %176 = vector.broadcast %cst_74 : f32 to vector<64x128xf32>
    %177 = arith.addf %175, %176 : vector<64x128xf32>
    %178 = math.log %177 : vector<64x128xf32>
    %179 = arith.mulf %173, %178 : vector<64x128xf32>
    %180 = arith.addf %169, %179 : vector<64x128xf32>
    %181 = vector.shape_cast %180 : vector<64x128xf32> to vector<1x64x128xf32>
    %cst_75 = arith.constant dense<0.000000e+00> : vector<1xf32>
    %182 = vector.multi_reduction <add>, %181, %cst_75 [1, 2] : vector<1x64x128xf32> to vector<1xf32>
    %183 = vector.shape_cast %182 : vector<1xf32> to vector<1x1x1xf32>
    %184 = vector.extract %183[0, 0, 0] : f32 from vector<1x1x1xf32>
    %185 = arith.addf %47, %184 : f32
    %186 = vector.shape_cast %163 : vector<64x128xf32> to vector<1x64x128xf32>
    %cst_76 = arith.constant dense<0.000000e+00> : vector<1xf32>
    %187 = vector.multi_reduction <add>, %186, %cst_76 [1, 2] : vector<1x64x128xf32> to vector<1xf32>
    %188 = vector.shape_cast %187 : vector<1xf32> to vector<1x1x1xf32>
    %189 = vector.extract %188[0, 0, 0] : f32 from vector<1x1x1xf32>
    %190 = vector.shape_cast %160 : vector<64x128xf32> to vector<1x64x128xf32>
    %cst_77 = arith.constant dense<0.000000e+00> : vector<1xf32>
    %191 = vector.multi_reduction <add>, %190, %cst_77 [1, 2] : vector<1x64x128xf32> to vector<1xf32>
    %192 = vector.shape_cast %191 : vector<1xf32> to vector<1x1x1xf32>
    %193 = vector.extract %192[0, 0, 0] : f32 from vector<1x1x1xf32>
    %194 = arith.mulf %160, %163 : vector<64x128xf32>
    %195 = vector.shape_cast %194 : vector<64x128xf32> to vector<1x64x128xf32>
    %cst_78 = arith.constant dense<0.000000e+00> : vector<1xf32>
    %196 = vector.multi_reduction <add>, %195, %cst_78 [1, 2] : vector<1x64x128xf32> to vector<1xf32>
    %197 = vector.shape_cast %196 : vector<1xf32> to vector<1x1x1xf32>
    %198 = vector.extract %197[0, 0, 0] : f32 from vector<1x1x1xf32>
    %cst_79 = arith.constant 1.000000e-10 : f32
    %199 = arith.addf %189, %cst_79 : f32
    %cst_80 = arith.constant 1.000000e-10 : f32
    %200 = arith.addf %189, %cst_80 : f32
    %201 = arith.mulf %199, %200 : f32
    %cst_81 = arith.constant 1.000000e+00 : f32
    %202 = arith.divf %cst_81, %201 : f32
    %203 = arith.mulf %202, %198 : f32
    %204 = arith.addf %66, %203 : f32
    %205 = arith.addf %193, %189 : f32
    %206 = arith.mulf %202, %205 : f32
    %207 = arith.addf %69, %206 : f32
    %cst_82 = arith.constant 1.000000e+00 : f32
    %208 = vector.broadcast %cst_82 : f32 to vector<64x128xf32>
    %209 = arith.subf %208, %160 : vector<64x128xf32>
    %cst_83 = arith.constant 1.000000e+00 : f32
    %210 = vector.broadcast %cst_83 : f32 to vector<64x128xf32>
    %211 = arith.subf %210, %163 : vector<64x128xf32>
    %212 = tpu.concatenate %209, %211 in 0 : vector<64x128xf32>, vector<64x128xf32> -> vector<128x128xf32>
    %c127_i32_84 = arith.constant 127 : i32
    %213 = tpu.dynamic_rotate %212 by %c127_i32_84 dim 1 : vector<128x128xf32>, i32 -> vector<128x128xf32>
    %cst_85 = arith.constant -1.000000e+30 : f32
    %214 = vector.broadcast %cst_85 : f32 to vector<128x128xf32>
    %215 = arith.select %14, %213, %214 : vector<128x128xi1>, vector<128x128xf32>
    %c1_i32_86 = arith.constant 1 : i32
    %216 = tpu.dynamic_rotate %212 by %c1_i32_86 dim 1 : vector<128x128xf32>, i32 -> vector<128x128xf32>
    %cst_87 = arith.constant -1.000000e+30 : f32
    %217 = vector.broadcast %cst_87 : f32 to vector<128x128xf32>
    %218 = arith.select %10, %216, %217 : vector<128x128xi1>, vector<128x128xf32>
    %219 = arith.maximumf %215, %218 : vector<128x128xf32>
    %220 = arith.maximumf %212, %219 : vector<128x128xf32>
    %c127_i32_88 = arith.constant 127 : i32
    %221 = tpu.dynamic_rotate %220 by %c127_i32_88 dim 0 : vector<128x128xf32>, i32 -> vector<128x128xf32>
    %cst_89 = arith.constant -1.000000e+30 : f32
    %222 = vector.broadcast %cst_89 : f32 to vector<128x128xf32>
    %223 = arith.select %12, %221, %222 : vector<128x128xi1>, vector<128x128xf32>
    %c1_i32_90 = arith.constant 1 : i32
    %224 = tpu.dynamic_rotate %220 by %c1_i32_90 dim 0 : vector<128x128xf32>, i32 -> vector<128x128xf32>
    %cst_91 = arith.constant -1.000000e+30 : f32
    %225 = vector.broadcast %cst_91 : f32 to vector<128x128xf32>
    %226 = arith.select %8, %224, %225 : vector<128x128xi1>, vector<128x128xf32>
    %227 = arith.maximumf %223, %226 : vector<128x128xf32>
    %228 = arith.maximumf %220, %227 : vector<128x128xf32>
    %229 = arith.subf %228, %212 : vector<128x128xf32>
    %230 = vector.extract_strided_slice %229 {offsets = [0, 0], sizes = [64, 128], strides = [1, 1]} : vector<128x128xf32> to vector<64x128xf32>
    %231 = vector.extract_strided_slice %229 {offsets = [64, 0], sizes = [64, 128], strides = [1, 1]} : vector<128x128xf32> to vector<64x128xf32>
    %232 = vector.shape_cast %230 : vector<64x128xf32> to vector<1x64x128xf32>
    %cst_92 = arith.constant dense<0.000000e+00> : vector<1xf32>
    %233 = vector.multi_reduction <add>, %232, %cst_92 [1, 2] : vector<1x64x128xf32> to vector<1xf32>
    %234 = vector.shape_cast %233 : vector<1xf32> to vector<1x1x1xf32>
    %235 = vector.extract %234[0, 0, 0] : f32 from vector<1x1x1xf32>
    %236 = vector.shape_cast %231 : vector<64x128xf32> to vector<1x64x128xf32>
    %cst_93 = arith.constant dense<0.000000e+00> : vector<1xf32>
    %237 = vector.multi_reduction <add>, %236, %cst_93 [1, 2] : vector<1x64x128xf32> to vector<1xf32>
    %238 = vector.shape_cast %237 : vector<1xf32> to vector<1x1x1xf32>
    %239 = vector.extract %238[0, 0, 0] : f32 from vector<1x1x1xf32>
    %c127_i32_94 = arith.constant 127 : i32
    %240 = tpu.dynamic_rotate %229 by %c127_i32_94 dim 1 : vector<128x128xf32>, i32 -> vector<128x128xf32>
    %cst_95 = arith.constant -1.000000e+30 : f32
    %241 = vector.broadcast %cst_95 : f32 to vector<128x128xf32>
    %242 = arith.select %14, %240, %241 : vector<128x128xi1>, vector<128x128xf32>
    %c1_i32_96 = arith.constant 1 : i32
    %243 = tpu.dynamic_rotate %229 by %c1_i32_96 dim 1 : vector<128x128xf32>, i32 -> vector<128x128xf32>
    %cst_97 = arith.constant -1.000000e+30 : f32
    %244 = vector.broadcast %cst_97 : f32 to vector<128x128xf32>
    %245 = arith.select %10, %243, %244 : vector<128x128xi1>, vector<128x128xf32>
    %246 = arith.maximumf %242, %245 : vector<128x128xf32>
    %247 = arith.maximumf %229, %246 : vector<128x128xf32>
    %c126_i32_98 = arith.constant 126 : i32
    %248 = tpu.dynamic_rotate %229 by %c126_i32_98 dim 1 : vector<128x128xf32>, i32 -> vector<128x128xf32>
    %cst_99 = arith.constant -1.000000e+30 : f32
    %249 = vector.broadcast %cst_99 : f32 to vector<128x128xf32>
    %250 = arith.select %18, %248, %249 : vector<128x128xi1>, vector<128x128xf32>
    %c2_i32_100 = arith.constant 2 : i32
    %251 = tpu.dynamic_rotate %229 by %c2_i32_100 dim 1 : vector<128x128xf32>, i32 -> vector<128x128xf32>
    %cst_101 = arith.constant -1.000000e+30 : f32
    %252 = vector.broadcast %cst_101 : f32 to vector<128x128xf32>
    %253 = arith.select %6, %251, %252 : vector<128x128xi1>, vector<128x128xf32>
    %254 = arith.maximumf %250, %253 : vector<128x128xf32>
    %255 = arith.maximumf %247, %254 : vector<128x128xf32>
    %c127_i32_102 = arith.constant 127 : i32
    %256 = tpu.dynamic_rotate %255 by %c127_i32_102 dim 0 : vector<128x128xf32>, i32 -> vector<128x128xf32>
    %cst_103 = arith.constant -1.000000e+30 : f32
    %257 = vector.broadcast %cst_103 : f32 to vector<128x128xf32>
    %258 = arith.select %12, %256, %257 : vector<128x128xi1>, vector<128x128xf32>
    %c1_i32_104 = arith.constant 1 : i32
    %259 = tpu.dynamic_rotate %255 by %c1_i32_104 dim 0 : vector<128x128xf32>, i32 -> vector<128x128xf32>
    %cst_105 = arith.constant -1.000000e+30 : f32
    %260 = vector.broadcast %cst_105 : f32 to vector<128x128xf32>
    %261 = arith.select %8, %259, %260 : vector<128x128xi1>, vector<128x128xf32>
    %262 = arith.maximumf %258, %261 : vector<128x128xf32>
    %263 = arith.maximumf %255, %262 : vector<128x128xf32>
    %c126_i32_106 = arith.constant 126 : i32
    %264 = tpu.dynamic_rotate %255 by %c126_i32_106 dim 0 : vector<128x128xf32>, i32 -> vector<128x128xf32>
    %cst_107 = arith.constant -1.000000e+30 : f32
    %265 = vector.broadcast %cst_107 : f32 to vector<128x128xf32>
    %266 = arith.select %16, %264, %265 : vector<128x128xi1>, vector<128x128xf32>
    %c2_i32_108 = arith.constant 2 : i32
    %267 = tpu.dynamic_rotate %255 by %c2_i32_108 dim 0 : vector<128x128xf32>, i32 -> vector<128x128xf32>
    %cst_109 = arith.constant -1.000000e+30 : f32
    %268 = vector.broadcast %cst_109 : f32 to vector<128x128xf32>
    %269 = arith.select %4, %267, %268 : vector<128x128xi1>, vector<128x128xf32>
    %270 = arith.maximumf %266, %269 : vector<128x128xf32>
    %271 = arith.maximumf %263, %270 : vector<128x128xf32>
    %272 = vector.extract_strided_slice %271 {offsets = [64, 0], sizes = [64, 128], strides = [1, 1]} : vector<128x128xf32> to vector<64x128xf32>
    %273 = arith.mulf %230, %272 : vector<64x128xf32>
    %274 = vector.shape_cast %273 : vector<64x128xf32> to vector<1x64x128xf32>
    %cst_110 = arith.constant dense<0.000000e+00> : vector<1xf32>
    %275 = vector.multi_reduction <add>, %274, %cst_110 [1, 2] : vector<1x64x128xf32> to vector<1xf32>
    %276 = vector.shape_cast %275 : vector<1xf32> to vector<1x1x1xf32>
    %277 = vector.extract %276[0, 0, 0] : f32 from vector<1x1x1xf32>
    %cst_111 = arith.constant 1.000000e-07 : f32
    %278 = arith.addf %235, %cst_111 : f32
    %279 = arith.divf %277, %278 : f32
    %280 = vector.extract_strided_slice %271 {offsets = [0, 0], sizes = [64, 128], strides = [1, 1]} : vector<128x128xf32> to vector<64x128xf32>
    %281 = arith.mulf %280, %231 : vector<64x128xf32>
    %282 = vector.shape_cast %281 : vector<64x128xf32> to vector<1x64x128xf32>
    %cst_112 = arith.constant dense<0.000000e+00> : vector<1xf32>
    %283 = vector.multi_reduction <add>, %282, %cst_112 [1, 2] : vector<1x64x128xf32> to vector<1xf32>
    %284 = vector.shape_cast %283 : vector<1xf32> to vector<1x1x1xf32>
    %285 = vector.extract %284[0, 0, 0] : f32 from vector<1x1x1xf32>
    %cst_113 = arith.constant 1.000000e-07 : f32
    %286 = arith.addf %239, %cst_113 : f32
    %287 = arith.divf %285, %286 : f32
    %cst_114 = arith.constant 2.000000e+00 : f32
    %288 = arith.mulf %cst_114, %279 : f32
    %289 = arith.mulf %288, %287 : f32
    %290 = arith.addf %279, %287 : f32
    %cst_115 = arith.constant 1.000000e-07 : f32
    %291 = arith.addf %290, %cst_115 : f32
    %292 = arith.divf %289, %291 : f32
    %cst_116 = arith.constant 1.000000e+00 : f32
    %293 = arith.subf %cst_116, %292 : f32
    %294 = arith.addf %156, %293 : f32
    %cst_117 = arith.constant 0.000000e+00 : f32
    %295 = arith.subf %cst_117, %185 : f32
    %cst_118 = arith.constant 2.000000e+00 : f32
    %296 = arith.divf %295, %cst_118 : f32
    %cst_119 = arith.constant 6.10351563E-5 : f32
    %297 = arith.mulf %296, %cst_119 : f32
    %cst_120 = arith.constant 9.99999974E-6 : f32
    %298 = arith.addf %204, %cst_120 : f32
    %cst_121 = arith.constant 2.000000e+00 : f32
    %299 = arith.mulf %cst_121, %298 : f32
    %cst_122 = arith.constant 9.99999974E-6 : f32
    %300 = arith.addf %207, %cst_122 : f32
    %301 = arith.divf %299, %300 : f32
    %cst_123 = arith.constant 1.000000e+00 : f32
    %302 = arith.subf %cst_123, %301 : f32
    %cst_124 = arith.constant 1.000000e+00 : f32
    %303 = arith.mulf %cst_124, %297 : f32
    %cst_125 = arith.constant 1.000000e+00 : f32
    %304 = arith.mulf %cst_125, %302 : f32
    %305 = arith.addf %303, %304 : f32
    %cst_126 = arith.constant 2.000000e+00 : f32
    %306 = arith.divf %305, %cst_126 : f32
    %307 = vector.broadcast %306 : f32 to vector<1x8x128xf32>
    %c0_127 = arith.constant 0 : index
    %c0_128 = arith.constant 0 : index
    %c0_129 = arith.constant 0 : index
    %308 = vector.load %arg3[%c0_127, %c0_128, %c0_129] : memref<1x8x128xf32, #tpu.memory_space<vmem>>, vector<1x8x128xf32>
    tpu.vector_store %arg3[%c0_127, %c0_128, %c0_129], %307 {strides = array<i32>} : memref<1x8x128xf32, #tpu.memory_space<vmem>>, vector<1x8x128xf32>,
    %cst_130 = arith.constant 2.000000e+00 : f32
    %309 = arith.divf %294, %cst_130 : f32
    %310 = vector.broadcast %309 : f32 to vector<1x8x128xf32>
    %c0_131 = arith.constant 0 : index
    %c0_132 = arith.constant 0 : index
    %c0_133 = arith.constant 0 : index
    %311 = vector.load %arg4[%c0_131, %c0_132, %c0_133] : memref<1x8x128xf32, #tpu.memory_space<vmem>>, vector<1x8x128xf32>
    tpu.vector_store %arg4[%c0_131, %c0_132, %c0_133], %310 {strides = array<i32>} : memref<1x8x128xf32, #tpu.memory_space<vmem>>, vector<1x8x128xf32>,
    return
  }
  func.func @transform_0(%arg0: i32) -> (i32, i32, i32, i32) {
    %c0_i32 = arith.constant 0 : i32
    %c0_i32_0 = arith.constant 0 : i32
    %c0_i32_1 = arith.constant 0 : i32
    %c0_i32_2 = arith.constant 0 : i32
    return %arg0, %c0_i32, %c0_i32_0, %c0_i32_1 : i32, i32, i32, i32
  }
  func.func @transform_1(%arg0: i32) -> (i32, i32, i32, i32) {
    %c0_i32 = arith.constant 0 : i32
    %c0_i32_0 = arith.constant 0 : i32
    %c0_i32_1 = arith.constant 0 : i32
    %c0_i32_2 = arith.constant 0 : i32
    return %arg0, %c0_i32, %c0_i32_0, %c0_i32_1 : i32, i32, i32, i32
  }
  func.func @transform_2(%arg0: i32) -> (i32, i32, i32) {
    %c0_i32 = arith.constant 0 : i32
    %c0_i32_0 = arith.constant 0 : i32
    %c0_i32_1 = arith.constant 0 : i32
    return %arg0, %c0_i32, %c0_i32_0 : i32, i32, i32
  }
  func.func @transform_3(%arg0: i32) -> (i32, i32, i32) {
    %c0_i32 = arith.constant 0 : i32
    %c0_i32_0 = arith.constant 0 : i32
    %c0_i32_1 = arith.constant 0 : i32
    return %arg0, %c0_i32, %c0_i32_0 : i32, i32, i32
  }
}

</mosaic_0001>

<bundles_post_ra>
// kernel: tpu_custom_call.1
= control target key start
LH: loop header
LB: loop body
LE: loop exit
PB: predicated region body
PF: predicated region fallthrough
CT: control target
= control target key end

     0   :  { %s6129_s0 = inlined_call_operand.hbm [shape: f32[2,2,64,128], index: 0, kind: input, shape index: {}]   ;;  %s6130_s1 = inlined_call_operand.hbm [shape: bf16[2,2,64,128], index: 1, kind: input, shape index: {}]   ;;  %s6131_s2 = inlined_call_operand.hbm [shape: f32[2,8,128], index: 2, kind: output, shape index: {0}]   ;;  %s6132_s3 = inlined_call_operand.hbm [shape: f32[2,8,128], index: 3, kind: output, shape index: {1}]  }
   0x1   :  { %6222 = sst [smem:[#allocation35_spill]] %s6129_s0 }
   0x2   :  { %6223 = sst [smem:[#allocation36_spill]] %s6130_s1 }
   0x3   :  { %9 = vsyncpa [#allocation3], 0 }
   0x4   :  { %11 = vsyncpa [#allocation3 + $0x1], 0 }
   0x5   :  { %12 = vsyncpa [#allocation6], 0 }
   0x6   :  { %14 = vsyncpa [#allocation6 + $0x1], 0 }
   0x7   :  { %15 = vsyncpa [#allocation4], 0 }
   0x8   :  { %17 = vsyncpa [#allocation4 + $0x1], 0 }
   0x9   :  { %18 = vsyncpa [#allocation9], 0 }
   0xa   :  { %20 = vsyncpa [#allocation9 + $0x1], 0  ;;  %s3117_s12 = smov 0   ;;  %s3119_s13 = smov 0  }
   0xb   :  { %s3121_s14 = smov 0   ;;  %s3123_s15 = smov 0  }
   0xc LB: > { %6224 = sst [smem:[#allocation14_spill]] %s3071_s12  ;;  %s3138_s16 = sadd.s32 4294967295, %s3083_s15   ;;  %s3083_s15 = sphi %s3123_s15, %s6351_s15   ;;  %s3079_s14 = sphi %s3121_s14, %s6354_s14   ;;  %s3075_s13 = sphi %s3119_s13, %s6353_s13   ;;  %s3071_s12 = sphi %s3117_s12, %s6352_s12  }
   0xd   : > { %6225 = sst [smem:[#allocation15_spill]] %s3075_s13  ;;  %s2648_s17 = sadd.s32 4294967294, %s3083_s15  }
   0xe   : > { %6226 = sst [smem:[#allocation16_spill]] %s3079_s14  ;;  %s3142_s18 = sadd.s32 1, %s3083_s15  }
   0xf   : > { %6227 = sst [smem:[#allocation17_spill]] %s3083_s15  ;;  %s33_s19 = sadd.s32 1, %s3079_s14 }
  0x10   : > { %6228 = sst [smem:[#allocation18_spill]] %s3142_s18  ;;  %s30_s20 = ssub.s32 %s3083_s15, %s3142_s18 }
  0x11   : > { %p40_p0 = scmp.ne.s32.totalorder %s3079_s14, %s3075_s13  ;;  %p31_p1 = scmp.eq.s32.totalorder %s30_s20, 0 }
  0x12   : > { %p41_p2 = scmp.eq.s32.totalorder %s3083_s15, 0  ;;  %p46_p3 = scmp.ne.s32.totalorder %s3075_s13, %s3071_s12 }
  0x13   : > { %p47_p4 = scmp.eq.s32.totalorder %s3138_s16, 0  ;;  %p96_p7 = scmp.eq.s32.totalorder %s3138_s16, 1 }
  0x14   : > { %s3154_s21 = scalar_select %p31_p1, %s3079_s14, %s33_s19  }
  0x15   : > { %p3156_p5 = por %p41_p2, %p40_p0  ;;  %p3160_p6 = por %p47_p4, %p46_p3 }
  0x16   : > { %6229 = sst [smem:[#allocation19_spill]] %s3154_s21  ;;  %p102_p8 = scmp.eq.s32.totalorder %s2648_s17, 1 }
  0x17   : > { %s6231_s23 = scalar_select %p3160_p6, 1, 0 }
  0x18   : > { %p2797_p10 = scmp.lt.s32.totalorder %s3083_s15, 2  ;;  %p3167_p11 = por %p96_p7, %p40_p0 }
  0x19   : > { %p3171_p12 = por %p102_p8, %p46_p3  ;;  %s3176_s26 = sand.u32 1, %s3079_s14  }
  0x1a   : > { %s6232_s24 = scalar_select %p3167_p11, 1, 0 }
  0x1b   : > { %s6233_s25 = scalar_select %p3171_p12, 1, 0 }
  0x1c   : > { %s2684_s27 = sshll.u32 %s3083_s15, 11  ;;  %s2651_s28 = sshll.u32 %s3176_s26, 7 }
  0x1d   : > { %6234 = sst [smem:[#allocation20_spill]] %s6233_s25  ;;  %s152_s5 = scalar_lea.vmem [#allocation2], %s2651_s28 }
  0x1e   : > { %s6235_s0 = sld [smem:[#allocation35_spill]]  ;;  %s159_s6 = sshll.u32 %s152_s5, 4  ;;  %s3191_s6 = int_to_ptr.vmem [resolvable:$true] %s159_s6 }
  0x1f   : > { %p3187_p13 = pnand %p2797_p10, %p3156_p5  ;;  %s149_s8 = scalar_lea.sflag [#allocation3], %s3176_s26 }
  0x21   : > { %p2923_p1 = pneg %p3187_p13 }
  0x24   : > { %s3183_s4 = scalar_lea.hbm %s6235_s0, %s2684_s27  ;;  %s2926_s17 = scalar_lea.hbm %s6235_s0, 4096 }
  0x25   : > { %s2921_s9 = scalar_lea.hbm %s3183_s4, 2048  ;;  %p2927_p4 = scmp.lt.u32.totalorder %s3183_s4, %s6235_s0 }
  0x26   : > { %p2922_p0 = scmp.ne.s32.totalorder %s3183_s4, %s2921_s9  ;;  %p2928_p5 = scmp.lt.u32.totalorder %s2926_s17, %s2921_s9 }
  0x27   : > { %p2930_p8 = scmp.lt.u32.totalorder %s2921_s9, %s3183_s4 }
  0x28   : > { %p2924_p2 = pnand %p2923_p1, %p2922_p0  ;;  %p2929_p7 = por %p2928_p5, %p2927_p4 }
  0x2a   : > { %p2925_p3 = pneg %p2924_p2  ;;  %p2931_p10 = por %p2930_p8, %p2929_p7 }
  0x2c   : > { %p2932_p9 = pnand %p2931_p10, %p2925_p3 }
  0x2e   : > { %2935 = shalt.err (!%p2932_p9)
}
  0x2f   : > { %s2936_s22 = scalar_lea.vmem %s3191_s6, 2048  ;;  %s3085_s27 = smov [#allocation2]  }
  0x30   : > { %p2937_p0 = scmp.ne.s32.totalorder %s3191_s6, %s2936_s22  ;;  %s2941_s28 = sshll.u32 %s3085_s27, 4  ;;  %s2942_s28 = int_to_ptr.vmem [resolvable:$false] %s2941_s28 }
  0x31   : > { %s2943_s29 = scalar_lea.vmem %s2942_s28, 4096  ;;  %p2944_p11 = scmp.lt.s32.totalorder %s3191_s6, %s2942_s28 }
  0x32   : > { %p2939_p2 = pnand %p2937_p0, %p2923_p1  ;;  %p2945_p4 = scmp.lt.s32.totalorder %s2943_s29, %s2936_s22 }
  0x34   : > { %p2940_p12 = pneg %p2939_p2  ;;  %p2946_p5 = por %p2945_p4, %p2944_p11 }
  0x36   : > { %p2947_p7 = pnand %p2946_p5, %p2940_p12 }
  0x38   : > { %2950 = shalt.err (!%p2947_p7)
}
  0x39   : > { %s3086_s30 = smov 128   ;;  %s3087_s5 = smov 8  }
  0x3a   : > { %2786 = dma.hbm_to_vmem [thread:$0]  (!%p3187_p13), %s3183_s4, 2048, %s3191_s6, %s149_s8, %s3086_s30, %s3086_s30, %s3087_s5  }
  0x3b   : > { %p2657_p9 = scmp.ge.s32.totalorder %s3083_s15, 1  ;;  %p188_p3 = scmp.lt.s32.totalorder %s3083_s15, 3 }
  0x3c   : > { %s2654_s9 = sshll.u32 %s3176_s26, 6  ;;  %s2685_s11 = sshll.u32 %s3083_s15, 10 }
  0x3d   : > { %p3224_p11 = pnand %p2657_p9, %p188_p3  ;;  %s173_s17 = scalar_lea.vmem [#allocation5], %s2654_s9 }
  0x3e   : > { %s180_s19 = sshll.u32 %s173_s17, 4  ;;  %s6238_s1 = sld [smem:[#allocation36_spill]]  ;;  %s3234_s19 = int_to_ptr.vmem [resolvable:$true] %s180_s19 }
  0x3f   : > { %s170_s4 = scalar_lea.sflag [#allocation6], %s3176_s26 }
  0x44   : > { %s3232_s27 = scalar_lea.hbm %s6238_s1, %s2685_s11  ;;  %s2956_s29 = scalar_lea.hbm %s6238_s1, 2048 }
  0x45   : > { %s2951_s6 = scalar_lea.hbm %s3232_s27, 1024  ;;  %p2957_p0 = scmp.lt.u32.totalorder %s3232_s27, %s6238_s1 }
  0x46   : > { %p2952_p12 = scmp.ne.s32.totalorder %s3232_s27, %s2951_s6  ;;  %p2958_p2 = scmp.lt.u32.totalorder %s2956_s29, %s2951_s6 }
  0x47   : > { %p2960_p5 = scmp.lt.u32.totalorder %s2951_s6, %s3232_s27 }
  0x48   : > { %p2954_p8 = pnand %p2952_p12, %p2923_p1  ;;  %p2959_p4 = por %p2958_p2, %p2957_p0 }
  0x4a   : > { %p2955_p10 = pneg %p2954_p8  ;;  %p2961_p7 = por %p2960_p5, %p2959_p4 }
  0x4c   : > { %p2962_p9 = pnand %p2961_p7, %p2955_p10 }
  0x4e   : > { %2965 = shalt.err (!%p2962_p9)
}
  0x4f   : > { %s2966_s9 = scalar_lea.vmem %s3234_s19, 1024  ;;  %s3088_s11 = smov [#allocation5]  }
  0x50   : > { %p2967_p3 = scmp.ne.s32.totalorder %s3234_s19, %s2966_s9  ;;  %s2971_s17 = sshll.u32 %s3088_s11, 4  ;;  %s2972_s17 = int_to_ptr.vmem [resolvable:$false] %s2971_s17 }
  0x51   : > { %s2973_s20 = scalar_lea.vmem %s2972_s17, 2048  ;;  %p2974_p6 = scmp.lt.s32.totalorder %s3234_s19, %s2972_s17 }
  0x52   : > { %p2969_p12 = pnand %p2967_p3, %p2923_p1  ;;  %p2975_p0 = scmp.lt.s32.totalorder %s2973_s20, %s2966_s9 }
  0x54   : > { %p2970_p8 = pneg %p2969_p12  ;;  %p2976_p2 = por %p2975_p0, %p2974_p6 }
  0x56   : > { %p2977_p4 = pnand %p2976_p2, %p2970_p8 }
  0x58   : > { %2980 = shalt.err (!%p2977_p4)
}
  0x59   : > { %s3089_s22 = smov 64   ;;  %s3090_s6 = smov 4  }
  0x5a   : > { %2789 = dma.hbm_to_vmem [thread:$0]  (!%p3187_p13), %s3232_s27, 1024, %s3234_s19, %s170_s4, %s3089_s22, %s3089_s22, %s3090_s6  }
  0x5b   : > { %192 = sbr.rel (%p3224_p11) target bundleno = 1324 (0x52c), region = 28 }
  0x62   : > { %s3265_s8 = sand.u32 1, %s3075_s13   ;;  %p6239_p6 = scmp.ne.s32.totalorder %s6231_s23, 0 }
  0x63   : > { %s2658_s28 = sshll.u32 %s3265_s8, 7  ;;  %s195_s29 = scalar_lea.sflag [#allocation3], %s3265_s8 }
  0x64   : > { %s3269_s30 = scalar_lea.vmem [#allocation2], %s2658_s28 }
  0x65   : > { %3054 = dma.done.wait (%p6239_p6), %s195_s29, 2048  }
  0x66   : > { %3056 = vsyncadd (%p6239_p6), %s195_s29, 4294965248  ;;  %s2659_s26 = sshll.u32 %s3265_s8, 6  ;;  %s204_s7 = scalar_lea.sflag [#allocation6], %s3265_s8 }
  0x67   : > { %s3277_s10 = scalar_lea.vmem [#allocation5], %s2659_s26 }
  0x68   : > { %3058 = dma.done.wait (%p6239_p6), %s204_s7, 1024  }
  0x69   : > { %3060 = vsyncadd (%p6239_p6), %s204_s7, 4294966272  ;;  %v2687_v0 = vld [vmem:[%s3277_s10] sm:$0xff]   ;;  %v2720_v2 = vld [vmem:[%s3277_s10 + $0x18] sm:$0xff]   ;;  %s3091_s23 = smov 127   ;;  %s3092_s19 = smov 1  }
  0x6a   : > { %v287_v1 = vld [vmem:[%s3269_s30] sm:$0xff]  ;;  %v3286_v3 = vunpack.c.l.bf16 %v2687_v0  ;;  %v3290_v5 = vunpack.c.h.bf16 %v2720_v2  ;;  %v294_v6 = vld [vmem:[%s3269_s30 + $0x38] sm:$0xff]  ;;  %v293_v12 = vld [vmem:[%s3269_s30 + $0x30] sm:$0xff]  ;;  %v3335_v18 = vunpack.c.l.bf16 %v2720_v2  ;;  %v3337_v19 = vunpack.c.h.bf16 %v2687_v0  ;;  %s3093_s27 = smov 126   ;;  %s3094_s4 = smov 2  }
  0x6b   : > { %v3288_v4 = vmax.f32 %v287_v1, 1e-08  ;;  %v3293_v7 = vmax.f32 %v294_v6, 1e-08  ;;  %v288_v13 = vld [vmem:[%s3269_s30 + $0x8] sm:$0xff]  ;;  %v290_v22 = vld [vmem:[%s3269_s30 + $0x18] sm:$0xff] }
  0x6c   : > { %6240 = vst [vmem:[#allocation21_spill] sm:$0xff] %v3290_v5  ;;  %v3296_v8 = vsub.f32 1.0, %v3286_v3  ;;  %v3306_v10 = vsub.f32 1.0, %v3290_v5  ;;  %v3321_v14 = vmax.f32 %v293_v12, 1e-08  ;;  %6243 = vst [vmem:[#allocation24_spill] sm:$0xff] %v3335_v18 }
  0x6d   : > { %6241 = vst [vmem:[#allocation22_spill] sm:$0xff] %v3293_v7  ;;  %v3299_v9 = vsub.f32 1.0, %v3288_v4  ;;  %v3309_v11 = vsub.f32 1.0, %v3293_v7  ;;  %v3323_v15 = vmax.f32 %v288_v13, 1e-08  ;;  %6244 = vst [vmem:[#allocation25_spill] sm:$0xff] %v3337_v19 }
  0x6e   : > { %506 = vrot.lane.b32.xlu1 %v3296_v8, %s3091_s23  ;;  %6242 = vst [vmem:[#allocation23_spill] sm:$0xff] %v3321_v14  ;;  %v3330_v16 = vsub.f32 1.0, %v3321_v14  ;;  %v3344_v20 = vsub.f32 1.0, %v3335_v18  ;;  %v3347_v21 = vsub.f32 1.0, %v3337_v19  ;;  %v289_v23 = vld [vmem:[%s3269_s30 + $0x10] sm:$0xff]  ;;  %v2718_v26 = vld [vmem:[%s3277_s10 + $0x8] sm:$0xff]  }
  0x6f   : > { %490 = vrot.lane.b32.xlu0 %v3299_v9, %s3091_s23  ;;  %v3333_v17 = vsub.f32 1.0, %v3323_v15  ;;  %v3359_v24 = vmax.f32 %v290_v22, 1e-08  ;;  %v3361_v25 = vmax.f32 %v289_v23, 1e-08  ;;  %v3374_v29 = vunpack.c.h.bf16 %v2718_v26  ;;  %v2719_v37 = vld [vmem:[%s3277_s10 + $0x10] sm:$0xff]  }
  0x70   : > { %v3376_v30 = vunpack.c.l.bf16 %v2718_v26  ;;  %v319_v31 = vadd.f32 1e-08, %v3288_v4  ;;  %v320_v34 = vadd.f32 1e-08, %v3323_v15  ;;  %v367_v35 = vadd.f32 1e-08, %v3299_v9 }
  0x71   : > { %6245 = vst [vmem:[#allocation26_spill] sm:$0xff] %v3359_v24  ;;  %6246 = vst [vmem:[#allocation27_spill] sm:$0xff] %v3361_v25  ;;  %v3369_v27 = vsub.f32 1.0, %v3359_v24  ;;  %v3372_v28 = vsub.f32 1.0, %v3361_v25  ;;  %v3384_v32 = vsub.f32 1.0, %v3374_v29  ;;  %v291_v38 = vld [vmem:[%s3269_s30 + $0x20] sm:$0xff]  ;;  %v3404_v41 = vunpack.c.l.bf16 %v2719_v37 }
  0x72   : > { %520 = vrot.lane.b32.xlu1 %v3306_v10, %s3091_s23  ;;  %6247 = vst [vmem:[#allocation28_spill] sm:$0xff] %v3374_v29  ;;  %6248 = vst [vmem:[#allocation29_spill] sm:$0xff] %v3376_v30  ;;  %v3387_v33 = vsub.f32 1.0, %v3376_v30  ;;  %v368_v36 = vadd.f32 1e-08, %v3333_v17  ;;  %2839 = vlog2.f32 %v319_v31  ;;  %v292_v43 = vld [vmem:[%s3269_s30 + $0x28] sm:$0xff]  ;;  %v3429_v55 = vunpack.c.h.bf16 %v2719_v37 }
  0x73   : > { %504 = vrot.lane.b32.xlu0 %v3309_v11, %s3091_s23  ;;  %2841 = vlog2.f32 %v320_v34  ;;  %v321_v39 = vadd.f32 1e-08, %v3361_v25  ;;  %v369_v40 = vadd.f32 1e-08, %v3372_v28  ;;  %6249 = vst [vmem:[#allocation30_spill] sm:$0xff] %v3404_v41  ;;  %v3416_v46 = vsub.f32 1.0, %v3404_v41 }
  0x74   : > { %2843 = vlog2.f32 %v367_v35  ;;  %v3406_v42 = vmax.f32 %v291_v38, 1e-08  ;;  %v322_v44 = vadd.f32 1e-08, %v3359_v24  ;;  %v370_v45 = vadd.f32 1e-08, %v3369_v27 }
  0x75   : > { %2845 = vlog2.f32 %v368_v36  ;;  %v3421_v48 = vmax.f32 %v292_v43, 1e-08  ;;  %6252 = vst [vmem:[#allocation33_spill] sm:$0xff] %v3429_v55  ;;  %v3441_v1 = vsub.f32 1.0, %v3429_v55  ;;  %v325_v2 = vadd.f32 1e-08, %v3321_v14 }
  0x76   : > { %552 = vrot.lane.b32.xlu1 %v3309_v11, %s3092_s19  ;;  %6250 = vst [vmem:[#allocation31_spill] sm:$0xff] %v3406_v42  ;;  %2847 = vlog2.f32 %v321_v39  ;;  %v3419_v47 = vsub.f32 1.0, %v3406_v42  ;;  %v323_v50 = vadd.f32 1e-08, %v3406_v42  ;;  %v373_v13 = vadd.f32 1e-08, %v3330_v16 }
  0x77   : > { %538 = vrot.lane.b32.xlu0 %v3299_v9, %s3092_s19  ;;  %2849 = vlog2.f32 %v369_v40  ;;  %6251 = vst [vmem:[#allocation32_spill] sm:$0xff] %v3421_v48  ;;  %v3432_v56 = vsub.f32 1.0, %v3421_v48  ;;  %v324_v57 = vadd.f32 1e-08, %v3421_v48  ;;  %v326_v36 = vadd.f32 1e-08, %v3293_v7 }
  0x78   : > { %2851 = vlog2.f32 %v322_v44  ;;  %v371_v52 = vadd.f32 1e-08, %v3419_v47  ;;  %v374_v39 = vadd.f32 1e-08, %v3309_v11  ;;  %s2680_s15 = sshll.u32 %s3138_s16, 7  ;;  %p6345_p1 = scmp.ne.s32.totalorder %s6232_s24, 0 }
  0x79   : > { %2853 = vlog2.f32 %v370_v45  ;;  %v372_v59 = vadd.f32 1e-08, %v3432_v56 }
  0x7a   : > { %568 = vrot.lane.b32.xlu1 %v3306_v10, %s3092_s19  ;;  %2855 = vlog2.f32 %v323_v50 }
  0x7b   : > { %554 = vrot.lane.b32.xlu0 %v3296_v8, %s3092_s19  ;;  %2857 = vlog2.f32 %v371_v52 }
  0x7c   : > { %v2840_v49 = vpop.eup %2839  ;;  %2859 = vlog2.f32 %v324_v57 }
  0x7d   : > { %v2842_v51 = vpop.eup %2841  ;;  %v328_v58 = vmul.f32 0.6931472, %v2840_v49  ;;  %2861 = vlog2.f32 %v372_v59 }
  0x7e   : > { %502 = vrot.lane.b32.xlu1 %v3330_v16, %s3091_s23  ;;  %v2844_v53 = vpop.eup %2843  ;;  %v330_v61 = vmul.f32 0.6931472, %v2842_v51  ;;  %2863 = vlog2.f32 %v325_v2 }
  0x7f   : > { %492 = vrot.lane.b32.xlu0 %v3333_v17, %s3091_s23  ;;  %v2846_v54 = vpop.eup %2845  ;;  %v376_v62 = vmul.f32 0.6931472, %v2844_v53  ;;  %v343_v12 = vmul.f32 %v3286_v3, %v328_v58  ;;  %2865 = vlog2.f32 %v373_v13 }
  0x80   : > { %v2848_v60 = vpop.eup %2847  ;;  %v378_v63 = vmul.f32 0.6931472, %v2846_v54  ;;  %v344_v23 = vmul.f32 %v3337_v19, %v330_v61  ;;  %2867 = vlog2.f32 %v326_v36 }
  0x81   : > { %v2850_v0 = vpop.eup %2849  ;;  %v332_v6 = vmul.f32 0.6931472, %v2848_v60  ;;  %v391_v31 = vmul.f32 %v376_v62, %v3296_v8  ;;  %2869 = vlog2.f32 %v374_v39 }
  0x82   : > { %518 = vrot.lane.b32.xlu1 %v3344_v20, %s3091_s23  ;;  %v2852_v22 = vpop.eup %2851  ;;  %v380_v26 = vmul.f32 0.6931472, %v2850_v0  ;;  %v392_v34 = vmul.f32 %v378_v63, %v3347_v21 }
  0x83   : > { %508 = vrot.lane.b32.xlu0 %v3347_v21, %s3091_s23  ;;  %v2854_v35 = vpop.eup %2853  ;;  %v334_v37 = vmul.f32 0.6931472, %v2852_v22  ;;  %v345_v38 = vmul.f32 %v3376_v30, %v332_v6  ;;  %v399_v45 = vadd.f32 %v391_v31, %v343_v12  ;;  %v424_v22 = vadd.f32 %v3337_v19, %v3286_v3 }
  0x84   : > { %v2856_v40 = vpop.eup %2855  ;;  %v382_v43 = vmul.f32 0.6931472, %v2854_v35  ;;  %v393_v44 = vmul.f32 %v380_v26, %v3387_v33  ;;  %v400_v49 = vadd.f32 %v392_v34, %v344_v23 }
  0x85   : > { %v2858_v50 = vpop.eup %2857  ;;  %v336_v51 = vmul.f32 0.6931472, %v2856_v40  ;;  %v346_v52 = vmul.f32 %v3374_v29, %v334_v37  ;;  %v425_v39 = vadd.f32 %v3376_v30, %v424_v22 }
  0x86   : > { %550 = vrot.lane.b32.xlu1 %v3330_v16, %s3092_s19  ;;  %v2860_v53 = vpop.eup %2859  ;;  %v384_v54 = vmul.f32 0.6931472, %v2858_v50  ;;  %v394_v57 = vmul.f32 %v382_v43, %v3384_v32  ;;  %v401_v58 = vadd.f32 %v393_v44, %v345_v38  ;;  %v407_v59 = vadd.f32 %v400_v49, %v399_v45 }
  0x87   : > { %540 = vrot.lane.b32.xlu0 %v3333_v17, %s3092_s19  ;;  %v2862_v60 = vpop.eup %2861  ;;  %v338_v61 = vmul.f32 0.6931472, %v2860_v53  ;;  %v347_v62 = vmul.f32 %v3404_v41, %v336_v51  ;;  %v426_v51 = vadd.f32 %v3374_v29, %v425_v39 }
  0x88   : > { %v2864_v63 = vpop.eup %2863  ;;  %v386_v0 = vmul.f32 0.6931472, %v2862_v60  ;;  %v395_v2 = vmul.f32 %v384_v54, %v3416_v46  ;;  %v402_v6 = vadd.f32 %v394_v57, %v346_v52  ;;  %v408_v12 = vadd.f32 %v407_v59, %v401_v58 }
  0x89   : > { %v2866_v13 = vpop.eup %2865  ;;  %v340_v23 = vmul.f32 0.6931472, %v2864_v63  ;;  %v348_v26 = vmul.f32 %v3429_v55, %v338_v61  ;;  %v427_v58 = vadd.f32 %v3404_v41, %v426_v51 }
  0x8a   : > { %566 = vrot.lane.b32.xlu1 %v3344_v20, %s3092_s19  ;;  %v2868_v31 = vpop.eup %2867  ;;  %v388_v34 = vmul.f32 0.6931472, %v2866_v13  ;;  %v396_v35 = vmul.f32 %v386_v0, %v3441_v1  ;;  %v403_v36 = vadd.f32 %v395_v2, %v347_v62  ;;  %v409_v37 = vadd.f32 %v408_v12, %v402_v6 }
  0x8b   : > { %556 = vrot.lane.b32.xlu0 %v3347_v21, %s3092_s19  ;;  %v2870_v38 = vpop.eup %2869  ;;  %v342_v40 = vmul.f32 0.6931472, %v2868_v31  ;;  %v349_v43 = vmul.f32 %v3335_v18, %v340_v23  ;;  %v428_v61 = vadd.f32 %v3429_v55, %v427_v58 }
  0x8c   : > { %v390_v44 = vmul.f32 0.6931472, %v2870_v38  ;;  %v397_v45 = vmul.f32 %v388_v34, %v3344_v20  ;;  %v404_v49 = vadd.f32 %v396_v35, %v348_v26  ;;  %v410_v50 = vadd.f32 %v409_v37, %v403_v36 }
  0x8d   : > { %v350_v52 = vmul.f32 %v3290_v5, %v342_v40  ;;  %v429_v63 = vadd.f32 %v3335_v18, %v428_v61  ;;  %v240_v26 = vlaneseq }
  0x8e   : > { %496 = vrot.lane.b32.xlu1 %v3369_v27, %s3091_s23  ;;  %v398_v53 = vmul.f32 %v390_v44, %v3306_v10  ;;  %v405_v54 = vadd.f32 %v397_v45, %v349_v43  ;;  %v411_v57 = vadd.f32 %v410_v50, %v404_v49 }
  0x8f   : > { %494 = vrot.lane.b32.xlu0 %v3372_v28, %s3091_s23  ;;  %v430_v0 = vadd.f32 %v3290_v5, %v429_v63  ;;  %v3481_v35 = vand.u32 127, %v240_v26  ;;  %v3500_v58 = vshrl.u32 %v240_v26, 7 }
  0x90   : > { %v406_v59 = vadd.f32 %v398_v53, %v350_v52  ;;  %v412_v60 = vadd.f32 %v411_v57, %v405_v54 }
  0x91   : > { %vm268_vm0 = vcmp.ge.s32.totalorder %v3481_v35, 1  ;;  %vm277_vm1 = vcmp.lt.s32.totalorder %v3481_v35, 127  ;;  %vm634_vm2 = vcmp.lt.s32.totalorder %v3500_v58, 7  ;;  %vm683_vm3 = vcmp.lt.s32.totalorder %v3500_v58, 1 }
  0x92   : > { %512 = vrot.lane.b32.xlu1 %v3384_v32, %s3091_s23  ;;  %v413_v62 = vadd.f32 %v412_v60, %v406_v59  ;;  %vm260_vm4 = vcmp.ge.s32.totalorder %v3500_v58, 1  ;;  %vm259_vm6 = vcmp.ge.s32.totalorder %v3481_v35, 2  ;;  %vm286_vm7 = vcmp.lt.s32.totalorder %v3481_v35, 126 }
  0x93   : > { %510 = vrot.lane.b32.xlu0 %v3387_v33, %s3091_s23  ;;  %vm1245_vm8 = vcmp.lt.s32.totalorder %v3500_v58, 2  ;;  %vm1196_vm9 = vcmp.lt.s32.totalorder %v3500_v58, 6  ;;  %vm251_vm10 = vcmp.ge.s32.totalorder %v3500_v58, 2 }
  0x96   : > { %544 = vrot.lane.b32.xlu1 %v3369_v27, %s3092_s19 }
  0x97   : > { %542 = vrot.lane.b32.xlu0 %v3372_v28, %s3092_s19 }
  0x9a   : > { %560 = vrot.lane.b32.xlu1 %v3384_v32, %s3092_s19 }
  0x9b   : > { %558 = vrot.lane.b32.xlu0 %v3387_v33, %s3092_s19 }
  0x9e   : > { %514 = vrot.lane.b32.xlu1 %v3416_v46, %s3091_s23 }
  0x9f   : > { %498 = vrot.lane.b32.xlu0 %v3419_v47, %s3091_s23 }
  0xa2   : > { %562 = vrot.lane.b32.xlu1 %v3416_v46, %s3092_s19 }
  0xa3   : > { %546 = vrot.lane.b32.xlu0 %v3419_v47, %s3092_s19 }
  0xa6   : > { %516 = vrot.lane.b32.xlu1 %v3441_v1, %s3091_s23 }
  0xa7   : > { %500 = vrot.lane.b32.xlu0 %v3432_v56, %s3091_s23 }
  0xaa   : > { %564 = vrot.lane.b32.xlu1 %v3441_v1, %s3092_s19 }
  0xab   : > { %548 = vrot.lane.b32.xlu0 %v3432_v56, %s3092_s19 }
  0xca   : > { %414 = vadd.xlane.f32.xlu0 %v413_v62 }
  0xce   : > { %431 = vadd.xlane.f32.xlu1 %v430_v0 }
  0xe0   : > { %v3479_v2 = vpop.permute.xlu1 %506 }
  0xe1   : > { %v491_v6 = vpop.permute.xlu0 %490 }
  0xe4   : > { %v521_v12 = vpop.permute.xlu1 %520 }
  0xe5   : > { %v505_v13 = vpop.permute.xlu0 %504  ;;  %v537_v53 = vsel %vm277_vm1, %v521_v12, -1e+30 }
  0xe6   : > { %v529_v43 = vsel %vm277_vm1, %v505_v13, -1e+30 }
  0xe8   : > { %v553_v22 = vpop.permute.xlu1 %552 }
  0xe9   : > { %v539_v23 = vpop.permute.xlu0 %538  ;;  %v577_v38 = vsel %vm268_vm0, %v553_v22, -1e+30 }
  0xea   : > { %v593_v44 = vmax.f32 %v529_v43, %v577_v38 }
  0xec   : > { %v569_v31 = vpop.permute.xlu1 %568  ;;  %v3498_v54 = vmax.f32 %v3309_v11, %v593_v44 }
  0xed   : > { %v555_v34 = vpop.permute.xlu0 %554  ;;  %v585_v45 = vsel %vm268_vm0, %v569_v31, -1e+30  ;;  %v570_v31 = vsel %vm268_vm0, %v539_v23, -1e+30 }
  0xee   : > { %v601_v59 = vmax.f32 %v537_v53, %v585_v45  ;;  %v6142_v0 = vrot.slane %v3498_v54, 1  ;;  %v522_v45 = vsel %vm277_vm1, %v491_v6, -1e+30 }
  0xef   : > { %v586_v23 = vmax.f32 %v522_v45, %v570_v31 }
  0xf0   : > { %v503_v36 = vpop.permute.xlu1 %502  ;;  %v3513_v22 = vmax.f32 %v3306_v10, %v601_v59 }
  0xf1   : > { %v493_v37 = vpop.permute.xlu0 %492  ;;  %v528_v51 = vsel %vm277_vm1, %v503_v36, -1e+30 }
  0xf2   : > { %v682_v18 = vrot.slane %v3513_v22, 7 }
  0xf4   : > { %v519_v39 = vpop.permute.xlu1 %518 }
  0xf5   : > { %v509_v40 = vpop.permute.xlu0 %508  ;;  %v536_v12 = vsel %vm277_vm1, %v519_v39, -1e+30 }
  0xf8   : > { %v551_v49 = vpop.permute.xlu1 %550 }
  0xf9   : > { %v541_v50 = vpop.permute.xlu0 %540  ;;  %v576_v52 = vsel %vm268_vm0, %v551_v49, -1e+30  ;;  %v6137_v49 = vrot.slane %v3513_v22, 1 }
  0xfa   : > { %v592_v57 = vmax.f32 %v528_v51, %v576_v52  ;;  %v571_v43 = vsel %vm268_vm0, %v541_v50, -1e+30  ;;  %v523_v51 = vsel %vm277_vm1, %v493_v37, -1e+30  ;;  %v578_v37 = vsel %vm268_vm0, %v555_v34, -1e+30 }
  0xfb   : > { %v587_v53 = vmax.f32 %v523_v51, %v571_v43 }
  0xfc   : > { %v3503_v60 = vmax.f32 %v3330_v16, %v592_v57  ;;  %v567_v61 = vpop.permute.xlu1 %566 }
  0xfd   : > { %v557_v62 = vpop.permute.xlu0 %556  ;;  %v584_v63 = vsel %vm268_vm0, %v567_v61, -1e+30  ;;  %v3547_v61 = vmax.f32 %v3299_v9, %v586_v23 }
  0xfe   : > { %v6135_v13 = vrot.slane %v3503_v60, 1  ;;  %v600_v26 = vmax.f32 %v536_v12, %v584_v63  ;;  %v579_v6 = vsel %vm268_vm0, %v557_v62, -1e+30  ;;  %v531_v63 = vsel %vm277_vm1, %v509_v40, -1e+30 }
  0xff   : > { %v3554_v12 = vmax.f32 %v3333_v17, %v587_v53  ;;  %v595_v45 = vmax.f32 %v531_v63, %v579_v6  ;;  %v530_v40 = vsel %vm277_vm1, %v3479_v2, -1e+30  ;;  %v673_v14 = vrot.slane %v3503_v60, 7 }
 0x100   : > { %v3523_v36 = vsel %vm634_vm2, %v6135_v13, %v6142_v0  ;;  %v497_v38 = vpop.permute.xlu1 %496  ;;  %v3528_v44 = vmax.f32 %v3344_v20, %v600_v26  ;;  %v594_v13 = vmax.f32 %v530_v40, %v578_v37 }
 0x101   : > { %v495_v39 = vpop.permute.xlu0 %494  ;;  %v525_v26 = vsel %vm277_vm1, %v497_v38, -1e+30  ;;  %v6139_v38 = vrot.slane %v3547_v61, 7  ;;  %v6140_v6 = vrot.slane %v3554_v12, 1  ;;  %v668_v63 = vrot.slane %v3554_v12, 7 }
 0x102   : > { %v6136_v52 = vrot.slane %v3528_v44, 1  ;;  %v524_v62 = vsel %vm277_vm1, %v495_v39, -1e+30  ;;  %v681_v42 = vrot.slane %v3528_v44, 7 }
 0x104   : > { %v513_v57 = vpop.permute.xlu1 %512  ;;  %v3542_v50 = vsel %vm634_vm2, %v6136_v52, %v6137_v49  ;;  %v3577_v49 = vmax.f32 %v3347_v21, %v595_v45  ;;  %v3592_v45 = vmax.f32 %v3296_v8, %v594_v13 }
 0x105   : > { %v511_v59 = vpop.permute.xlu0 %510  ;;  %v533_v2 = vsel %vm277_vm1, %v513_v57, -1e+30 }
 0x106   : > { %v627_v0 = vrot.slane %v3577_v49, 1 }
 0x108   : > { %v545_v31 = vpop.permute.xlu1 %544 }
 0x109   : > { %v543_v43 = vpop.permute.xlu0 %542  ;;  %v573_v23 = vsel %vm268_vm0, %v545_v31, -1e+30 }
 0x10a   : > { %v572_v34 = vsel %vm268_vm0, %v543_v43, -1e+30  ;;  %v589_v51 = vmax.f32 %v525_v26, %v573_v23 }
 0x10b   : > { %v588_v53 = vmax.f32 %v524_v62, %v572_v34  ;;  %v532_v62 = vsel %vm277_vm1, %v511_v59, -1e+30 }
 0x10c   : > { %v3571_v39 = vmax.f32 %v3369_v27, %v589_v51  ;;  %v561_v43 = vpop.permute.xlu1 %560 }
 0x10d   : > { %v3574_v31 = vmax.f32 %v3372_v28, %v588_v53  ;;  %v559_v52 = vpop.permute.xlu0 %558  ;;  %v581_v37 = vsel %vm268_vm0, %v561_v43, -1e+30 }
 0x10e   : > { %v580_v26 = vsel %vm268_vm0, %v559_v52, -1e+30  ;;  %v6138_v23 = vrot.slane %v3571_v39, 1  ;;  %v597_v57 = vmax.f32 %v533_v2, %v581_v37  ;;  %v698_v52 = vsel %vm683_vm3, %v6139_v38, %v668_v63 }
 0x10f   : > { %v620_v34 = vrot.slane %v3574_v31, 1  ;;  %v6141_v40 = vrot.slane %v3574_v31, 7  ;;  %v596_v51 = vmax.f32 %v532_v62, %v580_v26  ;;  %v676_v38 = vrot.slane %v3577_v49, 7 }
 0x110   : > { %v3610_v43 = vpop.permute.xlu1 %514  ;;  %v3615_v62 = vmax.f32 %v3384_v32, %v597_v57 }
 0x111   : > { %v647_v59 = vsel %vm634_vm2, %v620_v34, %v6138_v23  ;;  %v648_v53 = vsel %vm634_vm2, %v6140_v6, %v620_v34  ;;  %v697_v13 = vsel %vm683_vm3, %v668_v63, %v6141_v40  ;;  %v3612_v2 = vpop.permute.xlu0 %498  ;;  %v3618_v23 = vmax.f32 %v3387_v33, %v596_v51 }
 0x112   : > { %v717_v37 = vmax.f32 %v648_v53, %v698_v52  ;;  %v718_v26 = vmax.f32 %v647_v59, %v697_v13  ;;  %v6149_v63 = vrot.slane %v3615_v62, 1  ;;  %v675_v40 = vrot.slane %v3592_v45, 7 }
 0x113   : > { %v628_v52 = vrot.slane %v3618_v23, 1  ;;  %v3633_v53 = vadd.s32 56, %v3500_v58  ;;  %v6253_v7 = vrot.slane %v3618_v23, 7 }
 0x114   : > { %v733_v34 = vmax.f32 %v3554_v12, %v717_v37  ;;  %v734_v6 = vmax.f32 %v3574_v31, %v718_v26  ;;  %v3628_v59 = vpop.permute.xlu1 %562  ;;  %v690_v26 = vsel %vm683_vm3, %v675_v40, %v676_v38 }
 0x115   : > { %v3630_v51 = vpop.permute.xlu0 %546  ;;  %v639_v57 = vsel %vm634_vm2, %v628_v52, %v6149_v63  ;;  %v640_v5 = vsel %vm634_vm2, %v627_v0, %v628_v52  ;;  %vm276_vm5 = vcmp.lt.s32.totalorder %v3633_v53, 63  ;;  %vm285_vm11 = vcmp.lt.s32.totalorder %v3633_v53, 62 }
 0x116   : > { %v3636_v13 = vsub.f32 %v733_v34, %v3333_v17  ;;  %v3639_v37 = vsub.f32 %v734_v6, %v3372_v28  ;;  %v689_v17 = vsel %vm683_vm3, %v676_v38, %v6253_v7  ;;  %v626_v34 = vrot.slane %v3592_v45, 1 }
 0x117   : > { %v725_v28 = vmax.f32 %v640_v5, %v690_v26  ;;  %v726_v6 = vmax.f32 %v639_v57, %v689_v17  ;;  %v674_v38 = vrot.slane %v3498_v54, 7  ;;  %v618_v5 = vrot.slane %v3547_v61, 1 }
 0x118   : > { %800 = vrot.lane.b32.xlu1 %v3639_v37, %s3091_s23  ;;  %798 = vrot.lane.b32.xlu0 %v3636_v13, %s3091_s23  ;;  %v517_v52 = vpop.permute.xlu1 %516  ;;  %v6254_v57 = vrot.slane %v3498_v54, 1 }
 0x119   : > { %v501_v63 = vpop.permute.xlu0 %500  ;;  %v741_v55 = vmax.f32 %v3577_v49, %v725_v28  ;;  %v742_v7 = vmax.f32 %v3618_v23, %v726_v6  ;;  %v535_v28 = vsel %vm277_vm1, %v517_v52, -1e+30  ;;  %v6255_v6 = vrot.slane %v3547_v61, 7 }
 0x11a   : > { %v642_v26 = vsel %vm634_vm2, %v6254_v57, %v626_v34  ;;  %v692_v41 = vsel %vm683_vm3, %v673_v14, %v674_v38 }
 0x11b   : > { %v3671_v17 = vsub.f32 %v741_v55, %v3347_v21  ;;  %v3674_v49 = vsub.f32 %v742_v7, %v3387_v33  ;;  %v699_v48 = vsel %vm683_vm3, %v682_v18, %v6255_v6  ;;  %v527_v21 = vsel %vm277_vm1, %v501_v63, -1e+30 }
 0x11c   : > { %v565_v55 = vpop.permute.xlu1 %564  ;;  %v6256_v33 = vrot.slane %v3554_v12, 1  ;;  %v658_v63 = vsel %vm276_vm5, %v642_v26, -1e+30  ;;  %v6257_v12 = vrot.slane %v3513_v22, 1  ;;  %v700_v24 = vsel %vm260_vm4, %v699_v48, -1e+30 }
 0x11d   : > { %v549_v57 = vpop.permute.xlu0 %548  ;;  %816 = vrot.lane.b32.xlu1 %v3674_v49, %s3091_s23  ;;  %814 = vrot.lane.b32.xlu0 %v3671_v17, %s3091_s23  ;;  %v583_v7 = vsel %vm268_vm0, %v565_v55, -1e+30  ;;  %v723_v30 = vmax.f32 %v658_v63, %v692_v41  ;;  %v691_v55 = vsel %vm683_vm3, %v674_v38, %v675_v40  ;;  %v6259_v63 = vrot.slane %v3615_v62, 1 }
 0x11e   : > { %v649_v52 = vsel %vm634_vm2, %v618_v5, %v6256_v33  ;;  %v575_v6 = vsel %vm268_vm0, %v549_v57, -1e+30  ;;  %v599_v29 = vmax.f32 %v535_v28, %v583_v7  ;;  %v650_v33 = vsel %vm634_vm2, %v6257_v12, %v618_v5 }
 0x11f   : > { %v591_v25 = vmax.f32 %v527_v21, %v575_v6  ;;  %v716_v19 = vmax.f32 %v649_v52, %v700_v24  ;;  %v684_v57 = vsel %vm683_vm3, %v681_v42, %v682_v18  ;;  %v641_v28 = vsel %vm634_vm2, %v626_v34, %v627_v0 }
 0x120   : > { %v3712_v26 = vmax.f32 %v3441_v1, %v599_v29  ;;  %v666_v24 = vsel %vm276_vm5, %v650_v33, -1e+30  ;;  %v708_v29 = vsel %vm260_vm4, %v691_v55, -1e+30  ;;  %v739_v41 = vmax.f32 %v3498_v54, %v723_v30 }
 0x121   : > { %v3717_v5 = vmax.f32 %v3432_v56, %v591_v25  ;;  %848 = vrot.lane.b32.xlu1 %v3639_v37, %s3092_s19  ;;  %846 = vrot.lane.b32.xlu0 %v3636_v13, %s3092_s19  ;;  %v731_v48 = vmax.f32 %v666_v24, %v684_v57  ;;  %v732_v0 = vmax.f32 %v3547_v61, %v716_v19  ;;  %v678_v7 = vrot.slane %v3615_v62, 7 }
 0x122   : > { %v680_v18 = vrot.slane %v3712_v26, 7  ;;  %v724_v40 = vmax.f32 %v641_v28, %v708_v29  ;;  %v3745_v19 = vsub.f32 %v739_v41, %v3309_v11  ;;  %v670_v6 = vrot.slane %v3571_v39, 7 }
 0x123   : > { %v672_v25 = vrot.slane %v3717_v5, 7  ;;  %v747_v54 = vmax.f32 %v3513_v22, %v731_v48  ;;  %v6260_v33 = vrot.slane %v3571_v39, 1  ;;  %v6261_v57 = vrot.slane %v3618_v23, 7 }
 0x124   : > { %v685_v34 = vsel %vm683_vm3, %v680_v18, %v681_v42  ;;  %v740_v61 = vmax.f32 %v3592_v45, %v724_v40  ;;  %v526_v45 = vsel %vm277_vm1, %v3612_v2, -1e+30  ;;  %v6262_v24 = vrot.slane %v3574_v31, 7 }
 0x125   : > { %v730_v38 = vmax.f32 %v3542_v50, %v685_v34  ;;  %864 = vrot.lane.b32.xlu1 %v3674_v49, %s3092_s19  ;;  %v693_v30 = vsel %vm683_vm3, %v672_v25, %v673_v14  ;;  %862 = vrot.lane.b32.xlu0 %v3671_v17, %s3092_s19  ;;  %v3752_v50 = vsub.f32 %v732_v0, %v3299_v9  ;;  %v534_v9 = vsel %vm277_vm1, %v3610_v43, -1e+30 }
 0x126   : > { %v722_v21 = vmax.f32 %v3523_v36, %v693_v30  ;;  %v3764_v11 = vsub.f32 %v747_v54, %v3306_v10  ;;  %v3767_v22 = vsub.f32 %v740_v61, %v3296_v8  ;;  %v582_v36 = vsel %vm268_vm0, %v3628_v59, -1e+30 }
 0x127   : > { %v3749_v42 = vmax.f32 %v3528_v44, %v730_v38  ;;  %v574_v8 = vsel %vm268_vm0, %v3630_v51, -1e+30  ;;  %v598_v10 = vmax.f32 %v534_v9, %v582_v36  ;;  %v688_v28 = vsel %vm683_vm3, %v6261_v57, %v678_v7 }
 0x128   : > { %v3759_v14 = vmax.f32 %v3503_v60, %v722_v21  ;;  %6258 = vst [vmem:[#allocation34_spill] sm:$0xff] %v3764_v11  ;;  %v590_v43 = vmax.f32 %v526_v45, %v574_v8  ;;  %v696_v29 = vsel %vm683_vm3, %v6262_v24, %v670_v6  ;;  %v6263_v57 = vrot.slane %v3528_v44, 1 }
 0x129   : > { %810 = vrot.lane.b32.xlu1 %v3745_v19, %s3091_s23  ;;  %796 = vrot.lane.b32.xlu0 %v3752_v50, %s3091_s23  ;;  %v3790_v59 = vmax.f32 %v3416_v46, %v598_v10  ;;  %v6264_v24 = vrot.slane %v3503_v60, 1 }
 0x12a   : > { %v3793_v2 = vmax.f32 %v3419_v47, %v590_v43 }
 0x12b   : > { %v630_v51 = vrot.slane %v3790_v59, 1 }
 0x12c   : > { %v622_v52 = vrot.slane %v3793_v2, 1 }
 0x12d   : > { %826 = vrot.lane.b32.xlu1 %v3764_v11, %s3091_s23  ;;  %812 = vrot.lane.b32.xlu0 %v3767_v22, %s3091_s23  ;;  %v638_v12 = vsel %vm634_vm2, %v6259_v63, %v630_v51 }
 0x12e   : > { %v646_v55 = vsel %vm634_vm2, %v6260_v33, %v622_v52  ;;  %v727_v41 = vmax.f32 %v638_v12, %v688_v28 }
 0x12f   : > { %v719_v48 = vmax.f32 %v646_v55, %v696_v29 }
 0x130   : > { %v743_v23 = vmax.f32 %v3615_v62, %v727_v41  ;;  %v671_v62 = vrot.slane %v3793_v2, 7 }
 0x131   : > { %858 = vrot.lane.b32.xlu1 %v3745_v19, %s3092_s19  ;;  %844 = vrot.lane.b32.xlu0 %v3752_v50, %s3092_s19  ;;  %v735_v0 = vmax.f32 %v3571_v39, %v719_v48  ;;  %v631_v39 = vrot.slane %v3712_v26, 1 }
 0x132   : > { %v3838_v31 = vsub.f32 %v743_v23, %v3384_v32  ;;  %v623_v32 = vrot.slane %v3717_v5, 1  ;;  %v695_v61 = vsel %vm683_vm3, %v670_v6, %v671_v62  ;;  %v694_v41 = vsel %vm683_vm3, %v671_v62, %v672_v25 }
 0x133   : > { %v3841_v40 = vsub.f32 %v735_v0, %v3369_v27  ;;  %v679_v27 = vrot.slane %v3790_v59, 7  ;;  %v637_v34 = vsel %vm634_vm2, %v630_v51, %v631_v39  ;;  %v456_v62 = vmul.f32 %v3286_v3, %v3288_v4  ;;  %v6269_v3 = vld [vmem:[#allocation28_spill] sm:$0xff] }
 0x134   : > { %v645_v38 = vsel %vm634_vm2, %v622_v52, %v623_v32  ;;  %v644_v29 = vsel %vm634_vm2, %v623_v32, %v6264_v24 }
 0x135   : > { %874 = vrot.lane.b32.xlu1 %v3764_v11, %s3092_s19  ;;  %860 = vrot.lane.b32.xlu0 %v3767_v22, %s3092_s19  ;;  %v687_v30 = vsel %vm683_vm3, %v678_v7, %v679_v27  ;;  %v720_v36 = vmax.f32 %v645_v38, %v695_v61  ;;  %v6266_v61 = vld [vmem:[#allocation27_spill] sm:$0xff] }
 0x136   : > { %v728_v21 = vmax.f32 %v637_v34, %v687_v30  ;;  %v6265_v34 = vld [vmem:[#allocation25_spill] sm:$0xff] }
 0x137   : > { %v736_v51 = vmax.f32 %v3793_v2, %v720_v36  ;;  %v457_v38 = vmul.f32 %v6265_v34, %v3323_v15 }
 0x138   : > { %v744_v8 = vmax.f32 %v3790_v59, %v728_v21 }
 0x139   : > { %938 = vrot.lane.b32.xlu1 %v3745_v19, %s3093_s27  ;;  %924 = vrot.lane.b32.xlu0 %v3752_v50, %s3093_s27  ;;  %v3885_v33 = vsub.f32 %v736_v51, %v3419_v47  ;;  %v686_v47 = vsel %vm683_vm3, %v679_v27, %v680_v18  ;;  %v721_v18 = vmax.f32 %v644_v29, %v694_v41  ;;  %v6272_v29 = vld [vmem:[#allocation32_spill] sm:$0xff] }
 0x13a   : > { %v3882_v63 = vsub.f32 %v744_v8, %v3416_v46  ;;  %v636_v46 = vsel %vm634_vm2, %v631_v39, %v6263_v57  ;;  %v440_v27 = vadd.f32 %v3323_v15, %v3288_v4 }
 0x13b   : > { %v729_v48 = vmax.f32 %v636_v46, %v686_v47  ;;  %v737_v25 = vmax.f32 %v3717_v5, %v721_v18 }
 0x13c   : > { %v441_v21 = vadd.f32 %v440_v27, %v6266_v61 }
 0x13d   : > { %954 = vrot.lane.b32.xlu1 %v3764_v11, %s3093_s27  ;;  %940 = vrot.lane.b32.xlu0 %v3767_v22, %s3093_s27  ;;  %v745_v60 = vmax.f32 %v3712_v26, %v729_v48  ;;  %v3925_v0 = vsub.f32 %v737_v25, %v3432_v56  ;;  %v3945_v56 = vsub.f32 %v3749_v42, %v3344_v20  ;;  %v6273_v48 = vld [vmem:[#allocation33_spill] sm:$0xff] }
 0x13e   : > { %v461_v18 = vmul.f32 %v6273_v48, %v6272_v29 }
 0x13f   : > { %v3922_v23 = vsub.f32 %v745_v60, %v3441_v1  ;;  %v3949_v1 = vsub.f32 %v3759_v14, %v3330_v16 }
 0x141   : > { %986 = vrot.lane.b32.xlu1 %v3745_v19, %s3094_s4  ;;  %972 = vrot.lane.b32.xlu0 %v3752_v50, %s3094_s4 }
 0x145   : > { %1002 = vrot.lane.b32.xlu1 %v3764_v11, %s3094_s4  ;;  %988 = vrot.lane.b32.xlu0 %v3767_v22, %s3094_s4 }
 0x149   : > { %818 = vrot.lane.b32.xlu1 %v3838_v31, %s3091_s23  ;;  %802 = vrot.lane.b32.xlu0 %v3841_v40, %s3091_s23 }
 0x14d   : > { %866 = vrot.lane.b32.xlu1 %v3838_v31, %s3092_s19  ;;  %850 = vrot.lane.b32.xlu0 %v3841_v40, %s3092_s19 }
 0x151   : > { %928 = vrot.lane.b32.xlu1 %v3639_v37, %s3093_s27  ;;  %926 = vrot.lane.b32.xlu0 %v3636_v13, %s3093_s27 }
 0x155   : > { %944 = vrot.lane.b32.xlu1 %v3674_v49, %s3093_s27  ;;  %942 = vrot.lane.b32.xlu0 %v3671_v17, %s3093_s27 }
 0x157   : > { %v415_v54 = vpop.xlane.xlu0 %414 }
 0x158   : > { %v416_v9 = vrot.slane %v415_v54, 4 }
 0x159   : > { %976 = vrot.lane.b32.xlu1 %v3639_v37, %s3094_s4  ;;  %974 = vrot.lane.b32.xlu0 %v3636_v13, %s3094_s4 }
 0x15a   : > { %v417_v45 = vadd.f32 %v416_v9, %v415_v54  ;;  %v6267_v9 = vld [vmem:[#allocation29_spill] sm:$0xff] }
 0x15b   : > { %v432_v10 = vpop.xlane.xlu1 %431  ;;  %v458_v36 = vmul.f32 %v6267_v9, %v6266_v61 }
 0x15c   : > { %v418_v43 = vrot.slane %v417_v45, 2  ;;  %v433_v52 = vrot.slane %v432_v10, 4 }
 0x15d   : > { %992 = vrot.lane.b32.xlu1 %v3674_v49, %s3094_s4  ;;  %990 = vrot.lane.b32.xlu0 %v3671_v17, %s3094_s4 }
 0x15e   : > { %v419_v7 = vadd.f32 %v418_v43, %v417_v45  ;;  %v434_v6 = vadd.f32 %v433_v52, %v432_v10  ;;  %v464_v45 = vadd.f32 %v457_v38, %v456_v62  ;;  %v6268_v43 = vld [vmem:[#allocation26_spill] sm:$0xff]  ;;  %v6274_v38 = vld [vmem:[#allocation23_spill] sm:$0xff] }
 0x15f   : > { %v442_v51 = vadd.f32 %v441_v21, %v6268_v43  ;;  %v459_v4 = vmul.f32 %v6269_v3, %v6268_v43  ;;  %v6275_v21 = vld [vmem:[#allocation24_spill] sm:$0xff] }
 0x160   : > { %v420_v12 = vrot.slane %v419_v7, 1  ;;  %v435_v59 = vrot.slane %v434_v6, 2  ;;  %v465_v15 = vadd.f32 %v464_v45, %v458_v36  ;;  %v462_v9 = vmul.f32 %v6275_v21, %v6274_v38 }
 0x161   : > { %820 = vrot.lane.b32.xlu1 %v3882_v63, %s3091_s23  ;;  %804 = vrot.lane.b32.xlu0 %v3885_v33, %s3091_s23 }
 0x162   : > { %v421_v2 = vadd.f32 %v420_v12, %v419_v7  ;;  %v436_v55 = vadd.f32 %v435_v59, %v434_v6  ;;  %v764_v7 = vadd.f32 %v3636_v13, %v3752_v50  ;;  %v6270_v12 = vld [vmem:[#allocation31_spill] sm:$0xff]  ;;  %v466_v57 = vadd.f32 %v465_v15, %v459_v4  ;;  %v6276_v15 = vld [vmem:[#allocation22_spill] sm:$0xff] }
 0x163   : > { %v443_v59 = vadd.f32 %v442_v51, %v6270_v12 }
 0x164   : > { %2725 = vpush %v421_v2  ;;  %v437_v28 = vrot.slane %v436_v55, 1  ;;  %v6271_v2 = vld [vmem:[#allocation30_spill] sm:$0xff]  ;;  %v765_v47 = vadd.f32 %v764_v7, %v3639_v37 }
 0x165   : > { %868 = vrot.lane.b32.xlu1 %v3882_v63, %s3092_s19  ;;  %852 = vrot.lane.b32.xlu0 %v3885_v33, %s3092_s19  ;;  %v444_v41 = vadd.f32 %v443_v59, %v6272_v29 }
 0x166   : > { %v438_v44 = vadd.f32 %v437_v28, %v436_v55  ;;  %v460_v55 = vmul.f32 %v6271_v2, %v6270_v12  ;;  %v780_v28 = vadd.f32 %v3671_v17, %v3767_v22  ;;  %v6277_v12 = vld [vmem:[#allocation21_spill] sm:$0xff] }
 0x167   : > { %v445_v61 = vadd.f32 %v444_v41, %v6274_v38  ;;  %v463_v59 = vmul.f32 %v6277_v12, %v6276_v15 }
 0x168   : > { %2727 = vpush %v438_v44  ;;  %v766_v44 = vadd.f32 %v765_v47, %v3841_v40  ;;  %v467_v60 = vadd.f32 %v466_v57, %v460_v55  ;;  %v781_v62 = vadd.f32 %v780_v28, %v3674_v49 }
 0x169   : > { %946 = vrot.lane.b32.xlu1 %v3838_v31, %s3093_s27  ;;  %930 = vrot.lane.b32.xlu0 %v3841_v40, %s3093_s27  ;;  %v446_v7 = vadd.f32 %v445_v61, %v6276_v15 }
 0x16a   : > { %v767_v27 = vadd.f32 %v766_v44, %v3885_v33  ;;  %v468_v36 = vadd.f32 %v467_v60, %v461_v18  ;;  %v782_v45 = vadd.f32 %v781_v62, %v3838_v31 }
 0x16c   : > { %v768_v51 = vadd.f32 %v767_v27, %v3925_v0  ;;  %v783_v3 = vadd.f32 %v782_v45, %v3882_v63  ;;  %v469_v2 = vadd.f32 %v468_v36, %v462_v9 }
 0x16d   : > { %994 = vrot.lane.b32.xlu1 %v3838_v31, %s3094_s4  ;;  %978 = vrot.lane.b32.xlu0 %v3841_v40, %s3094_s4 }
 0x16e   : > { %v769_v57 = vadd.f32 %v768_v51, %v3949_v1  ;;  %v784_v47 = vadd.f32 %v783_v3, %v3922_v23  ;;  %v470_v29 = vadd.f32 %v469_v2, %v463_v59 }
 0x170   : > { %v770_v44 = vadd.f32 %v769_v57, %v3745_v19  ;;  %v785_v48 = vadd.f32 %v784_v47, %v3945_v56 }
 0x171   : > { %822 = vrot.lane.b32.xlu1 %v3922_v23, %s3091_s23  ;;  %806 = vrot.lane.b32.xlu0 %v3925_v0, %s3091_s23 }
 0x172   : > { %v786_v27 = vadd.f32 %v785_v48, %v3764_v11 }
 0x175   : > { %870 = vrot.lane.b32.xlu1 %v3922_v23, %s3092_s19  ;;  %854 = vrot.lane.b32.xlu0 %v3925_v0, %s3092_s19 }
 0x179   : > { %948 = vrot.lane.b32.xlu1 %v3882_v63, %s3093_s27  ;;  %932 = vrot.lane.b32.xlu0 %v3885_v33, %s3093_s27 }
 0x17d   : > { %996 = vrot.lane.b32.xlu1 %v3882_v63, %s3094_s4  ;;  %980 = vrot.lane.b32.xlu0 %v3885_v33, %s3094_s4 }
 0x181   : > { %824 = vrot.lane.b32.xlu1 %v3945_v56, %s3091_s23  ;;  %808 = vrot.lane.b32.xlu0 %v3949_v1, %s3091_s23 }
 0x185   : > { %872 = vrot.lane.b32.xlu1 %v3945_v56, %s3092_s19  ;;  %856 = vrot.lane.b32.xlu0 %v3949_v1, %s3092_s19 }
 0x189   : > { %950 = vrot.lane.b32.xlu1 %v3922_v23, %s3093_s27  ;;  %934 = vrot.lane.b32.xlu0 %v3925_v0, %s3093_s27 }
 0x18a   : > { %v3961_v20 = vpop.permute.xlu1 %800  ;;  %v3965_v16 = vpop.permute.xlu0 %798 }
 0x18b   : > { %v830_v21 = vsel %vm277_vm1, %v3961_v20, -1e+30  ;;  %v829_v9 = vsel %vm277_vm1, %v3965_v16, -1e+30 }
 0x18d   : > { %998 = vrot.lane.b32.xlu1 %v3922_v23, %s3094_s4  ;;  %982 = vrot.lane.b32.xlu0 %v3925_v0, %s3094_s4 }
 0x18f   : > { %v3971_v26 = vpop.permute.xlu1 %816  ;;  %v3973_v5 = vpop.permute.xlu0 %814 }
 0x190   : > { %v838_v45 = vsel %vm277_vm1, %v3971_v26, -1e+30  ;;  %v837_v51 = vsel %vm277_vm1, %v3973_v5, -1e+30 }
 0x191   : > { %952 = vrot.lane.b32.xlu1 %v3945_v56, %s3093_s27  ;;  %936 = vrot.lane.b32.xlu0 %v3949_v1, %s3093_s27 }
 0x193   : > { %v3979_v42 = vpop.permute.xlu1 %848  ;;  %v3981_v14 = vpop.permute.xlu0 %846 }
 0x194   : > { %v878_v3 = vsel %vm268_vm0, %v3979_v42, -1e+30  ;;  %v877_v20 = vsel %vm268_vm0, %v3981_v14, -1e+30 }
 0x195   : > { %1000 = vrot.lane.b32.xlu1 %v3945_v56, %s3094_s4  ;;  %984 = vrot.lane.b32.xlu0 %v3949_v1, %s3094_s4  ;;  %v894_v12 = vmax.f32 %v830_v21, %v878_v3  ;;  %s4683_s5 = spop %2725 }
 0x197   : > { %v3987_v39 = vpop.permute.xlu1 %864  ;;  %v3989_v32 = vpop.permute.xlu0 %862 }
 0x198   : > { %v886_v16 = vsel %vm268_vm0, %v3987_v39, -1e+30  ;;  %v885_v5 = vsel %vm268_vm0, %v3989_v32, -1e+30 }
 0x199   : > { %v902_v3 = vmax.f32 %v838_v45, %v886_v16  ;;  %v910_v16 = vmax.f32 %v3639_v37, %v894_v12  ;;  %s4685_s9 = spop %2727 }
 0x19a   : > { %s480_s11 = sadd.f32 1e-10, %s4685_s9 }
 0x19b   : > { %v3997_v30 = vpop.permute.xlu1 %810  ;;  %v3999_v54 = vpop.permute.xlu0 %796 }
 0x19c   : > { %v835_v42 = vsel %vm277_vm1, %v3997_v30, -1e+30  ;;  %v828_v14 = vsel %vm277_vm1, %v3999_v54, -1e+30  ;;  %s481_s17 = smul.f32 %s480_s11, %s480_s11 }
 0x19f   : > { %v4004_v8 = vpop.permute.xlu1 %826  ;;  %v4006_v10 = vpop.permute.xlu0 %812 }
 0x1a0   : > { %v843_v32 = vsel %vm277_vm1, %v4004_v8, -1e+30 }
 0x1a3   : > { %v859_v52 = vpop.permute.xlu1 %858  ;;  %v845_v6 = vpop.permute.xlu0 %844 }
 0x1a4   : > { %v883_v26 = vsel %vm268_vm0, %v859_v52, -1e+30 }
 0x1a5   : > { %v899_v30 = vmax.f32 %v835_v42, %v883_v26 }
 0x1a7   : > { %v875_v46 = vpop.permute.xlu1 %874  ;;  %v861_v24 = vpop.permute.xlu0 %860 }
 0x1a8   : > { %v891_v39 = vsel %vm268_vm0, %v875_v46, -1e+30  ;;  %v836_v46 = vsel %vm277_vm1, %v4006_v10, -1e+30 }
 0x1a9   : > { %v907_v8 = vmax.f32 %v843_v32, %v891_v39  ;;  %v918_v39 = vmax.f32 %v3674_v49, %v902_v3 }
 0x1ab   : > { %v939_v25 = vpop.permute.xlu1 %938  ;;  %v925_v34 = vpop.permute.xlu0 %924 }
 0x1af   : > { %v955_v43 = vpop.permute.xlu1 %954  ;;  %v941_v4 = vpop.permute.xlu0 %940 }
 0x1b0   : > { %v971_v10 = vsel %vm286_vm7, %v955_v43, -1e+30 }
 0x1b3   : > { %v987_v55 = vpop.permute.xlu1 %986  ;;  %v973_v28 = vpop.permute.xlu0 %972 }
 0x1b4   : > { %447 = vadd.xlane.f32.xlu0 %v446_v7  ;;  %v876_v7 = vsel %vm268_vm0, %v845_v6, -1e+30  ;;  %v1011_v52 = vsel %vm259_vm6, %v987_v55, -1e+30  ;;  %v884_v6 = vsel %vm268_vm0, %v861_v24, -1e+30 }
 0x1b5   : > { %v1004_v2 = vsel %vm259_vm6, %v973_v28, -1e+30  ;;  %v892_v57 = vmax.f32 %v828_v14, %v876_v7  ;;  %v963_v55 = vsel %vm286_vm7, %v939_v25, -1e+30  ;;  %v900_v48 = vmax.f32 %v836_v46, %v884_v6 }
 0x1b6   : > { %v1027_v24 = vmax.f32 %v963_v55, %v1011_v52  ;;  %v915_v25 = vmax.f32 %v3745_v19, %v899_v30 }
 0x1b7   : > { %v1003_v41 = vpop.permute.xlu1 %1002  ;;  %v989_v18 = vpop.permute.xlu0 %988  ;;  %v908_v7 = vmax.f32 %v3752_v50, %v892_v57  ;;  %v916_v43 = vmax.f32 %v3767_v22, %v900_v48 }
 0x1b8   : > { %771 = vadd.xlane.f32.xlu0 %v770_v44  ;;  %v1019_v47 = vsel %vm259_vm6, %v1003_v41, -1e+30  ;;  %v1012_v28 = vsel %vm259_vm6, %v989_v18, -1e+30  ;;  %v893_v44 = vmax.f32 %v829_v9, %v877_v20  ;;  %v964_v41 = vsel %vm286_vm7, %v941_v4, -1e+30 }
 0x1b9   : > { %471 = vadd.xlane.f32.xlu1 %v470_v29  ;;  %v956_v29 = vsel %vm286_vm7, %v925_v34, -1e+30  ;;  %v1035_v26 = vmax.f32 %v971_v10, %v1019_v47  ;;  %v901_v34 = vmax.f32 %v837_v51, %v885_v5  ;;  %v1028_v14 = vmax.f32 %v964_v41, %v1012_v28 }
 0x1ba   : > { %v923_v18 = vmax.f32 %v3764_v11, %v907_v8  ;;  %v4114_v9 = vmax.f32 %v915_v25, %v1027_v24  ;;  %v909_v5 = vmax.f32 %v3636_v13, %v893_v44 }
 0x1bb   : > { %v4038_v60 = vpop.permute.xlu1 %818  ;;  %v4041_v62 = vpop.permute.xlu0 %802  ;;  %v917_v30 = vmax.f32 %v3671_v17, %v901_v34  ;;  %v4130_v6 = vmax.f32 %v916_v43, %v1028_v14 }
 0x1bc   : > { %787 = vadd.xlane.f32.xlu0 %v786_v27  ;;  %v1020_v27 = vmax.f32 %v956_v29, %v1004_v2  ;;  %v4127_v52 = vmax.f32 %v923_v18, %v1035_v26  ;;  %v6173_v12 = vrot.slane %v4114_v9, 1  ;;  %v6164_v57 = vrot.slane %v4114_v9, 7 }
 0x1bd   : > { %v6163_v8 = vrot.slane %v4114_v9, 6  ;;  %v1108_v3 = vrot.slane %v4130_v6, 7  ;;  %v6170_v25 = vrot.slane %v4130_v6, 6  ;;  %v839_v14 = vsel %vm277_vm1, %v4038_v60, -1e+30 }
 0x1be   : > { %v4118_v45 = vmax.f32 %v908_v7, %v1020_v27 }
 0x1bf   : > { %v4043_v38 = vpop.permute.xlu1 %866  ;;  %v4045_v61 = vpop.permute.xlu0 %850  ;;  %v1123_v60 = vsel %vm683_vm3, %v6164_v57, %v1108_v3 }
 0x1c0   : > { %v1052_v29 = vrot.slane %v4118_v45, 1  ;;  %v1100_v24 = vrot.slane %v4118_v45, 7  ;;  %v6172_v27 = vrot.slane %v4118_v45, 2  ;;  %v887_v41 = vsel %vm268_vm0, %v4043_v38, -1e+30 }
 0x1c3   : > { %v929_v36 = vpop.permute.xlu1 %928  ;;  %v927_v15 = vpop.permute.xlu0 %926 }
 0x1c4   : > { %v958_v2 = vsel %vm286_vm7, %v929_v36, -1e+30  ;;  %v957_v46 = vsel %vm286_vm7, %v927_v15, -1e+30  ;;  %v6174_v36 = vrot.slane %v4118_v45, 6  ;;  %v6165_v15 = vrot.slane %v4127_v52, 7 }
 0x1c7   : > { %v4087_v59 = vpop.permute.xlu1 %944  ;;  %v943_v54 = vpop.permute.xlu0 %942 }
 0x1c8   : > { %v966_v26 = vsel %vm286_vm7, %v4087_v59, -1e+30  ;;  %v1131_v59 = vsel %vm683_vm3, %v6165_v15, %v1100_v24 }
 0x1cb   : > { %v977_v21 = vpop.permute.xlu1 %976  ;;  %v975_v42 = vpop.permute.xlu0 %974 }
 0x1cc   : > { %v1006_v20 = vsel %vm259_vm6, %v977_v21, -1e+30  ;;  %v1005_v4 = vsel %vm259_vm6, %v975_v42, -1e+30  ;;  %v6168_v21 = vrot.slane %v4127_v52, 1 }
 0x1cd   : > { %v1022_v55 = vmax.f32 %v958_v2, %v1006_v20  ;;  %v1021_v47 = vmax.f32 %v957_v46, %v1005_v4  ;;  %v965_v42 = vsel %vm286_vm7, %v943_v54, -1e+30  ;;  %v6175_v20 = vrot.slane %v4114_v9, 2 }
 0x1ce   : > { %v831_v54 = vsel %vm277_vm1, %v4041_v62, -1e+30  ;;  %v1083_v62 = vsel %vm634_vm2, %v6168_v21, %v1052_v29  ;;  %v1060_v2 = vrot.slane %v4130_v6, 1  ;;  %v1253_v46 = vsel %vm1245_vm8, %v6163_v8, %v6170_v25 }
 0x1cf   : > { %v993_v51 = vpop.permute.xlu1 %992  ;;  %v991_v32 = vpop.permute.xlu0 %990  ;;  %v4166_v34 = vmax.f32 %v910_v16, %v1022_v55  ;;  %v4168_v7 = vmax.f32 %v909_v5, %v1021_v47  ;;  %v6166_v16 = vrot.slane %v4127_v52, 6  ;;  %v903_v5 = vmax.f32 %v839_v14, %v887_v41 }
 0x1d0   : > { %v1014_v44 = vsel %vm259_vm6, %v993_v51, -1e+30  ;;  %v1013_v48 = vsel %vm259_vm6, %v991_v32, -1e+30  ;;  %v6167_v51 = vrot.slane %v4127_v52, 2 }
 0x1d1   : > { %v1030_v18 = vmax.f32 %v966_v26, %v1014_v44  ;;  %v1029_v43 = vmax.f32 %v965_v42, %v1013_v48  ;;  %v879_v32 = vsel %vm268_vm0, %v4045_v61, -1e+30  ;;  %v6169_v55 = vrot.slane %v4166_v34, 1 }
 0x1d2   : > { %v1053_v47 = vrot.slane %v4168_v7, 1  ;;  %v6180_v61 = vrot.slane %v4130_v6, 2  ;;  %v6171_v44 = vrot.slane %v4168_v7, 7  ;;  %v1132_v42 = vsel %vm260_vm4, %v1131_v59, -1e+30 }
 0x1d3   : > { %v4144_v28 = vpop.permute.xlu1 %820  ;;  %v4151_v10 = vpop.permute.xlu0 %804  ;;  %v4207_v48 = vmax.f32 %v918_v39, %v1030_v18  ;;  %v4209_v41 = vmax.f32 %v917_v30, %v1029_v43  ;;  %v4215_v14 = vsel %vm260_vm4, %v1123_v60, -1e+30  ;;  %v895_v8 = vmax.f32 %v831_v54, %v879_v32 }
 0x1d4   : > { %v4219_v15 = vsel %vm276_vm5, %v1083_v62, -1e+30  ;;  %v4223_v39 = vsel %vm251_vm10, %v1253_v46, -1e+30  ;;  %v919_v30 = vmax.f32 %v3838_v31, %v903_v5  ;;  %v1212_v18 = vsel %vm1196_vm9, %v6167_v51, %v6172_v27 }
 0x1d5   : > { %v1261_v43 = vsel %vm1245_vm8, %v6166_v16, %v6174_v36  ;;  %v6176_v59 = vrot.slane %v4166_v34, 2  ;;  %v1081_v54 = vsel %vm634_vm2, %v1053_v47, %v6169_v55  ;;  %v1082_v60 = vsel %vm634_vm2, %v1052_v29, %v1053_v47 }
 0x1d6   : > { %v1181_v5 = vrot.slane %v4168_v7, 2  ;;  %v1130_v32 = vsel %vm683_vm3, %v1100_v24, %v6171_v44  ;;  %v6179_v62 = vrot.slane %v4207_v48, 1  ;;  %v1061_v46 = vrot.slane %v4209_v41, 1 }
 0x1d7   : > { %v869_v38 = vpop.permute.xlu1 %868  ;;  %v853_v4 = vpop.permute.xlu0 %852  ;;  %v6177_v16 = vrot.slane %v4209_v41, 7  ;;  %v911_v21 = vmax.f32 %v3841_v40, %v895_v8  ;;  %v6178_v55 = vrot.slane %v4168_v7, 6  ;;  %v4259_v25 = vsel %vm285_vm11, %v1212_v18, -1e+30 }
 0x1d8   : > { %v1262_v44 = vsel %vm251_vm10, %v1261_v43, -1e+30  ;;  %v1075_v8 = vsel %vm634_vm2, %v6173_v12, %v1060_v2  ;;  %v1148_v18 = vmax.f32 %v1082_v60, %v1132_v42  ;;  %v1149_v27 = vmax.f32 %v1081_v54, %v1130_v32 }
 0x1d9   : > { %v1073_v12 = vsel %vm634_vm2, %v1061_v46, %v6179_v62  ;;  %v1074_v36 = vsel %vm634_vm2, %v1060_v2, %v1061_v46  ;;  %v1122_v42 = vsel %vm683_vm3, %v1108_v3, %v6177_v16  ;;  %v6278_v32 = vrot.slane %v4118_v45, 6 }
 0x1da   : > { %v888_v46 = vsel %vm268_vm0, %v869_v38, -1e+30  ;;  %v6279_v3 = vrot.slane %v4118_v45, 2  ;;  %v880_v16 = vsel %vm268_vm0, %v853_v4, -1e+30  ;;  %v1157_v38 = vmax.f32 %v1073_v12, %v1122_v42 }
 0x1db   : > { %v947_v26 = vpop.permute.xlu1 %946  ;;  %v931_v57 = vpop.permute.xlu0 %930  ;;  %v1102_v2 = vrot.slane %v4166_v34, 7  ;;  %v1164_v11 = vmax.f32 %v4118_v45, %v1148_v18 }
 0x1dc   : > { %v967_v24 = vsel %vm286_vm7, %v947_v26, -1e+30  ;;  %v1210_v26 = vsel %vm1196_vm9, %v1181_v5, %v6176_v59  ;;  %v1238_v59 = vrot.slane %v4209_v41, 6  ;;  %v1173_v18 = vmax.f32 %v4209_v41, %v1157_v38 }
 0x1df   : > { %v995_v51 = vpop.permute.xlu1 %994  ;;  %v979_v47 = vpop.permute.xlu0 %978 }
 0x1e0   : > { %v1015_v29 = vsel %vm259_vm6, %v995_v51, -1e+30  ;;  %v1204_v51 = vsel %vm1196_vm9, %v6175_v20, %v6180_v61  ;;  %v1007_v54 = vsel %vm259_vm6, %v979_v47, -1e+30  ;;  %v1211_v47 = vsel %vm1196_vm9, %v6279_v3, %v1181_v5 }
 0x1e1   : > { %v1031_v43 = vmax.f32 %v967_v24, %v1015_v29  ;;  %v1260_v29 = vsel %vm1245_vm8, %v6278_v32, %v6178_v55  ;;  %v1189_v20 = vrot.slane %v4209_v41, 2  ;;  %v959_v32 = vsel %vm286_vm7, %v931_v57, -1e+30 }
 0x1e2   : > { %v1156_v55 = vmax.f32 %v1074_v36, %v4215_v14  ;;  %v1023_v61 = vmax.f32 %v959_v32, %v1007_v54  ;;  %v840_v5 = vsel %vm277_vm1, %v4144_v28, -1e+30  ;;  %v832_v3 = vsel %vm277_vm1, %v4151_v10, -1e+30 }
 0x1e3   : > { %v823_v60 = vpop.permute.xlu1 %822  ;;  %v4302_v24 = vpop.permute.xlu0 %806  ;;  %v4315_v62 = vmax.f32 %v919_v30, %v1031_v43  ;;  %v1165_v57 = vmax.f32 %v4168_v7, %v1149_v27  ;;  %v1279_v36 = vmax.f32 %v1210_v26, %v1260_v29  ;;  %v904_v12 = vmax.f32 %v840_v5, %v888_v46 }
 0x1e4   : > { %v896_v14 = vmax.f32 %v832_v3, %v880_v16  ;;  %v6280_v43 = vrot.slane %v4207_v48, 2  ;;  %v6281_v28 = vrot.slane %v4130_v6, 2  ;;  %v6282_v10 = vrot.slane %v4130_v6, 6 }
 0x1e5   : > { %v1278_v27 = vmax.f32 %v1211_v47, %v1262_v44  ;;  %v1063_v16 = vrot.slane %v4315_v62, 1  ;;  %v4340_v26 = vmax.f32 %v911_v21, %v1023_v61  ;;  %v1172_v29 = vmax.f32 %v4130_v6, %v1156_v55 }
 0x1e6   : > { %v1202_v42 = vsel %vm1196_vm9, %v1189_v20, %v6280_v43  ;;  %v1203_v54 = vsel %vm1196_vm9, %v6281_v28, %v1189_v20  ;;  %v1252_v45 = vsel %vm1245_vm8, %v6282_v10, %v1238_v59  ;;  %v1110_v46 = vrot.slane %v4207_v48, 7 }
 0x1e7   : > { %v871_v4 = vpop.permute.xlu1 %870  ;;  %v855_v30 = vpop.permute.xlu0 %854  ;;  %v1239_v32 = vrot.slane %v4207_v48, 6  ;;  %v4347_v20 = vsel %vm276_vm5, %v1075_v8, -1e+30  ;;  %v1294_v3 = vmax.f32 %v1164_v11, %v1278_v27  ;;  %v1295_v43 = vmax.f32 %v1165_v57, %v1279_v36 }
 0x1e8   : > { %v1287_v44 = vmax.f32 %v1202_v42, %v1252_v45  ;;  %v1286_v38 = vmax.f32 %v1203_v54, %v4223_v39  ;;  %v4352_v21 = vsel %vm285_vm11, %v1204_v51, -1e+30  ;;  %v1231_v6 = vrot.slane %v4166_v34, 6 }
 0x1e9   : > { %v6283_v55 = vrot.slane %v4168_v7, 7  ;;  %v920_v11 = vmax.f32 %v3882_v63, %v904_v12  ;;  %v912_v8 = vmax.f32 %v3885_v33, %v896_v14  ;;  %v6284_v39 = vrot.slane %v4207_v48, 1 }
 0x1ea   : > { %v1303_v57 = vmax.f32 %v1173_v18, %v1287_v44  ;;  %v1055_v36 = vrot.slane %v4340_v26, 1  ;;  %v1302_v42 = vmax.f32 %v1172_v29, %v1286_v38  ;;  %v6285_v28 = vrot.slane %v4209_v41, 7 }
 0x1eb   : > { %v949_v5 = vpop.permute.xlu1 %948  ;;  %v933_v47 = vpop.permute.xlu0 %932  ;;  %v1129_v61 = vsel %vm683_vm3, %v6283_v55, %v1102_v2  ;;  %v1072_v51 = vsel %vm634_vm2, %v6284_v39, %v1063_v16  ;;  %v841_v10 = vsel %vm277_vm1, %v823_v60, -1e+30  ;;  %v1251_v14 = vsel %vm1245_vm8, %v1238_v59, %v1239_v32 }
 0x1ec   : > { %v1121_v54 = vsel %vm683_vm3, %v6285_v28, %v1110_v46  ;;  %v1339_v45 = vmul.f32 %v1294_v3, %v3767_v22  ;;  %v1191_v27 = vrot.slane %v4315_v62, 2  ;;  %v968_v18 = vsel %vm286_vm7, %v949_v5, -1e+30 }
 0x1ed   : > { %v1340_v44 = vmul.f32 %v1295_v43, %v3671_v17  ;;  %v960_v60 = vsel %vm286_vm7, %v933_v47, -1e+30  ;;  %v1158_v55 = vmax.f32 %v1072_v51, %v1121_v54  ;;  %v6286_v22 = vrot.slane %v4166_v34, 1 }
 0x1ee   : > { %v1310_v39 = vmul.f32 %v1302_v42, %v3752_v50  ;;  %v1311_v28 = vmul.f32 %v1303_v57, %v3636_v13  ;;  %v1111_v17 = vrot.slane %v4315_v62, 7  ;;  %v1240_v43 = vrot.slane %v4315_v62, 6 }
 0x1ef   : > { %v997_v12 = vpop.permute.xlu1 %996  ;;  %v981_v29 = vpop.permute.xlu0 %980  ;;  %v1080_v3 = vsel %vm634_vm2, %v6286_v22, %v1055_v36  ;;  %v1183_v47 = vrot.slane %v4340_v26, 2  ;;  %v889_v51 = vsel %vm268_vm0, %v871_v4, -1e+30  ;;  %v881_v54 = vsel %vm268_vm0, %v855_v30, -1e+30 }
 0x1f0   : > { %v1016_v41 = vsel %vm259_vm6, %v997_v12, -1e+30  ;;  %v1008_v59 = vsel %vm259_vm6, %v981_v29, -1e+30  ;;  %v6287_v13 = vrot.slane %v4207_v48, 2  ;;  %v1174_v29 = vmax.f32 %v4207_v48, %v1158_v55 }
 0x1f1   : > { %v1032_v38 = vmax.f32 %v968_v18, %v1016_v41  ;;  %v1024_v5 = vmax.f32 %v960_v60, %v1008_v59  ;;  %v1150_v60 = vmax.f32 %v1080_v3, %v1129_v61  ;;  %v1103_v4 = vrot.slane %v4340_v26, 7 }
 0x1f2   : > { %v1201_v57 = vsel %vm1196_vm9, %v6287_v13, %v1191_v27  ;;  %v833_v30 = vsel %vm277_vm1, %v4302_v24, -1e+30  ;;  %v905_v59 = vmax.f32 %v841_v10, %v889_v51  ;;  %v1120_v61 = vsel %vm683_vm3, %v1110_v46, %v1111_v17 }
 0x1f3   : > { %v4398_v12 = vmax.f32 %v920_v11, %v1032_v38  ;;  %v825_v18 = vpop.permute.xlu1 %824  ;;  %v4404_v41 = vmax.f32 %v912_v8, %v1024_v5  ;;  %v809_v50 = vpop.permute.xlu0 %808  ;;  %v1288_v55 = vmax.f32 %v1201_v57, %v1251_v14  ;;  %v897_v3 = vmax.f32 %v833_v30, %v881_v54 }
 0x1f4   : > { %v6288_v24 = vrot.slane %v4166_v34, 2  ;;  %v6289_v51 = vrot.slane %v4168_v7, 6  ;;  %v1166_v54 = vmax.f32 %v4166_v34, %v1150_v60  ;;  %v4442_v57 = vadd.f32 %v1340_v44, %v1339_v45 }
 0x1f5   : > { %v1064_v42 = vrot.slane %v4398_v12, 1  ;;  %v1192_v11 = vrot.slane %v4398_v12, 2  ;;  %v1056_v8 = vrot.slane %v4404_v41, 1  ;;  %v1304_v14 = vmax.f32 %v1174_v29, %v1288_v55 }
 0x1f6   : > { %v1209_v10 = vsel %vm1196_vm9, %v6288_v24, %v1183_v47  ;;  %v1250_v7 = vsel %vm1245_vm8, %v1239_v32, %v1240_v43  ;;  %v921_v29 = vmax.f32 %v3922_v23, %v905_v59  ;;  %v1128_v45 = vsel %vm683_vm3, %v1102_v2, %v1103_v4 }
 0x1f7   : > { %v873_v22 = vpop.permute.xlu1 %872  ;;  %v1071_v5 = vsel %vm634_vm2, %v1063_v16, %v1064_v42  ;;  %v857_v13 = vpop.permute.xlu0 %856  ;;  %v1259_v16 = vsel %vm1245_vm8, %v6289_v51, %v1231_v6  ;;  %v1200_v46 = vsel %vm1196_vm9, %v1191_v27, %v1192_v11  ;;  %v1079_v27 = vsel %vm634_vm2, %v1055_v36, %v1056_v8 }
 0x1f8   : > { %v1159_v38 = vmax.f32 %v1071_v5, %v1120_v61  ;;  %v1318_v5 = vadd.f32 %v1311_v28, %v1310_v39  ;;  %v6290_v48 = vrot.slane %v4340_v26, 6  ;;  %v1280_v44 = vmax.f32 %v1209_v10, %v1259_v16 }
 0x1f9   : > { %v913_v36 = vmax.f32 %v3925_v0, %v897_v3  ;;  %v1184_v39 = vrot.slane %v4404_v41, 2  ;;  %v890_v28 = vsel %vm268_vm0, %v873_v22, -1e+30  ;;  %v1289_v59 = vmax.f32 %v1200_v46, %v1250_v7 }
 0x1fa   : > { %v1175_v30 = vmax.f32 %v4315_v62, %v1159_v38  ;;  %v1258_v32 = vsel %vm1245_vm8, %v1231_v6, %v6290_v48  ;;  %v882_v2 = vsel %vm268_vm0, %v857_v13, -1e+30  ;;  %v1312_v61 = vmul.f32 %v1304_v14, %v3639_v37 }
 0x1fb   : > { %v951_v60 = vpop.permute.xlu1 %950  ;;  %v935_v38 = vpop.permute.xlu0 %934  ;;  %v1151_v55 = vmax.f32 %v1079_v27, %v1128_v45  ;;  %v1296_v34 = vmax.f32 %v1166_v54, %v1280_v44  ;;  %v1112_v24 = vrot.slane %v4398_v12, 7  ;;  %v1241_v6 = vrot.slane %v4398_v12, 6 }
 0x1fc   : > { %v842_v3 = vsel %vm277_vm1, %v825_v18, -1e+30  ;;  %v1305_v10 = vmax.f32 %v1175_v30, %v1289_v59  ;;  %v1104_v51 = vrot.slane %v4404_v41, 7  ;;  %v1233_v22 = vrot.slane %v4404_v41, 6 }
 0x1fd   : > { %v834_v16 = vsel %vm277_vm1, %v809_v50, -1e+30  ;;  %v906_v13 = vmax.f32 %v842_v3, %v890_v28  ;;  %v969_v14 = vsel %vm286_vm7, %v951_v60, -1e+30  ;;  %v1208_v18 = vsel %vm1196_vm9, %v1183_v47, %v1184_v39 }
 0x1fe   : > { %v898_v37 = vmax.f32 %v834_v16, %v882_v2  ;;  %v961_v30 = vsel %vm286_vm7, %v935_v38, -1e+30  ;;  %v1167_v45 = vmax.f32 %v4340_v26, %v1151_v55  ;;  %v1313_v60 = vmul.f32 %v1305_v10, %v3841_v40 }
 0x1ff   : > { %v999_v46 = vpop.permute.xlu1 %998  ;;  %v983_v7 = vpop.permute.xlu0 %982  ;;  %v1319_v44 = vadd.f32 %v1318_v5, %v1312_v61  ;;  %v4498_v28 = vmul.f32 %v1296_v34, %v3674_v49  ;;  %v1119_v47 = vsel %vm683_vm3, %v1111_v17, %v1112_v24  ;;  %v1249_v38 = vsel %vm1245_vm8, %v1240_v43, %v1241_v6 }
 0x200   : > { %v1017_v54 = vsel %vm259_vm6, %v999_v46, -1e+30  ;;  %v1009_v50 = vsel %vm259_vm6, %v983_v7, -1e+30  ;;  %v1281_v55 = vmax.f32 %v1208_v18, %v1258_v32  ;;  %v922_v40 = vmax.f32 %v3945_v56, %v906_v13 }
 0x201   : > { %v1033_v27 = vmax.f32 %v969_v14, %v1017_v54  ;;  %v1025_v48 = vmax.f32 %v961_v30, %v1009_v50  ;;  %v6291_v17 = vrot.slane %v4340_v26, 6  ;;  %v914_v43 = vmax.f32 %v3949_v1, %v898_v37 }
 0x202   : > { %v4528_v61 = vmax.f32 %v1167_v45, %v1281_v55  ;;  %v4534_v26 = vadd.f32 %v1319_v44, %v1313_v60 }
 0x203   : > { %v4500_v59 = vmax.f32 %v921_v29, %v1033_v27  ;;  %v953_v2 = vpop.permute.xlu1 %952  ;;  %v4511_v5 = vmax.f32 %v913_v36, %v1025_v48  ;;  %v937_v49 = vpop.permute.xlu0 %936  ;;  %v1127_v29 = vsel %vm683_vm3, %v1103_v4, %v1104_v51  ;;  %v4523_v62 = vsel %vm1245_vm8, %v6291_v17, %v1233_v22 }
 0x204   : > { %v970_v3 = vsel %vm286_vm7, %v953_v2, -1e+30  ;;  %v962_v54 = vsel %vm286_vm7, %v937_v49, -1e+30 }
 0x205   : > { %v1065_v32 = vrot.slane %v4500_v59, 1  ;;  %v1193_v36 = vrot.slane %v4500_v59, 2  ;;  %v1057_v34 = vrot.slane %v4511_v5, 1  ;;  %v1185_v4 = vrot.slane %v4511_v5, 2 }
 0x206   : > { %v1113_v10 = vrot.slane %v4500_v59, 7  ;;  %v1242_v16 = vrot.slane %v4500_v59, 6  ;;  %v1105_v14 = vrot.slane %v4511_v5, 7  ;;  %v1234_v2 = vrot.slane %v4511_v5, 6 }
 0x207   : > { %v1001_v13 = vpop.permute.xlu1 %1000  ;;  %v1070_v46 = vsel %vm634_vm2, %v1064_v42, %v1065_v32  ;;  %v1199_v37 = vsel %vm1196_vm9, %v1192_v11, %v1193_v36  ;;  %v985_v18 = vpop.permute.xlu0 %984  ;;  %v1078_v11 = vsel %vm634_vm2, %v1056_v8, %v1057_v34  ;;  %v1207_v44 = vsel %vm1196_vm9, %v1184_v39, %v1185_v4 }
 0x208   : > { %v1018_v7 = vsel %vm259_vm6, %v1001_v13, -1e+30  ;;  %v1160_v30 = vmax.f32 %v1070_v46, %v1119_v47  ;;  %v1010_v50 = vsel %vm259_vm6, %v985_v18, -1e+30  ;;  %v1290_v42 = vmax.f32 %v1199_v37, %v1249_v38 }
 0x209   : > { %v1034_v27 = vmax.f32 %v970_v3, %v1018_v7  ;;  %v1026_v45 = vmax.f32 %v962_v54, %v1010_v50  ;;  %v1152_v60 = vmax.f32 %v1078_v11, %v1127_v29  ;;  %v1118_v38 = vsel %vm683_vm3, %v1112_v24, %v1113_v10 }
 0x20a   : > { %v1176_v48 = vmax.f32 %v4398_v12, %v1160_v30  ;;  %v1248_v8 = vsel %vm1245_vm8, %v1241_v6, %v1242_v16  ;;  %v1126_v12 = vsel %vm683_vm3, %v1104_v51, %v1105_v14  ;;  %v1282_v29 = vmax.f32 %v1207_v44, %v4523_v62 }
 0x20b   : > { %v1050_v47 = vmax.f32 %v922_v40, %v1034_v27  ;;  %v1042_v55 = vmax.f32 %v914_v43, %v1026_v45  ;;  %v1168_v54 = vmax.f32 %v4404_v41, %v1152_v60  ;;  %v6292_v24 = vrot.slane %v4127_v52, 1 }
 0x20c   : > { %v1306_v49 = vmax.f32 %v1176_v48, %v1290_v42  ;;  %v6293_v51 = vrot.slane %v4127_v52, 7  ;;  %v6294_v50 = vrot.slane %v4127_v52, 2  ;;  %v6295_v11 = vrot.slane %v4127_v52, 6 }
 0x20d   : > { %v1066_v17 = vrot.slane %v1050_v47, 1  ;;  %v1114_v3 = vrot.slane %v1050_v47, 7  ;;  %v1194_v13 = vrot.slane %v1050_v47, 2  ;;  %v1243_v39 = vrot.slane %v1050_v47, 6 }
 0x20e   : > { %v1058_v46 = vrot.slane %v1042_v55, 1  ;;  %v1106_v37 = vrot.slane %v1042_v55, 7  ;;  %v1186_v40 = vrot.slane %v1042_v55, 2  ;;  %v1314_v48 = vmul.f32 %v1306_v49, %v3885_v33 }
 0x20f   : > { %v1068_v6 = vsel %vm634_vm2, %v1066_v17, %v6292_v24  ;;  %v1069_v43 = vsel %vm634_vm2, %v1065_v32, %v1066_v17  ;;  %v1116_v62 = vsel %vm683_vm3, %v1114_v3, %v6293_v51  ;;  %v1117_v7 = vsel %vm683_vm3, %v1113_v10, %v1114_v3 }
 0x210   : > { %v1161_v18 = vmax.f32 %v1069_v43, %v1118_v38  ;;  %v1162_v30 = vmax.f32 %v1068_v6, %v1117_v7  ;;  %v1163_v27 = vmax.f32 %v4219_v15, %v1116_v62  ;;  %v1197_v42 = vsel %vm1196_vm9, %v1194_v13, %v6294_v50 }
 0x211   : > { %v1198_v32 = vsel %vm1196_vm9, %v1193_v36, %v1194_v13  ;;  %v1246_v45 = vsel %vm1245_vm8, %v1243_v39, %v6295_v11  ;;  %v1247_v10 = vsel %vm1245_vm8, %v1242_v16, %v1243_v39  ;;  %v6296_v36 = vrot.slane %v4114_v9, 1 }
 0x212   : > { %v1177_v15 = vmax.f32 %v4500_v59, %v1161_v18  ;;  %v1178_v60 = vmax.f32 %v1050_v47, %v1162_v30  ;;  %v1179_v44 = vmax.f32 %v4127_v52, %v1163_v27  ;;  %v1291_v38 = vmax.f32 %v1198_v32, %v1248_v8 }
 0x213   : > { %v1292_v17 = vmax.f32 %v1197_v42, %v1247_v10  ;;  %v1293_v3 = vmax.f32 %v4259_v25, %v1246_v45  ;;  %v1076_v13 = vsel %vm634_vm2, %v1058_v46, %v6296_v36  ;;  %v1077_v24 = vsel %vm634_vm2, %v1057_v34, %v1058_v46  ;;  %v6300_v42 = vld [vmem:[#allocation34_spill] sm:$0xff]  ;;  %v2721_v10 = vld [vmem:[%s3277_s10 + $0x20] sm:$0xff]   ;;  %v2668_v36 = vld [vmem:[%s3269_s30 + $0x70] sm:$0xff] }
 0x214   : > { %v1307_v16 = vmax.f32 %v1177_v15, %v1291_v38  ;;  %v6297_v33 = vrot.slane %v4114_v9, 7  ;;  %v1125_v52 = vsel %vm683_vm3, %v1105_v14, %v1106_v37  ;;  %v1153_v47 = vmax.f32 %v1077_v24, %v1126_v12  ;;  %v2663_v24 = vld [vmem:[%s3269_s30 + $0x48] sm:$0xff] }
 0x215   : > { %v1308_v8 = vmax.f32 %v1178_v60, %v1292_v17  ;;  %v1309_v25 = vmax.f32 %v1179_v44, %v1293_v3  ;;  %v1154_v49 = vmax.f32 %v1076_v13, %v1125_v52  ;;  %v1321_v43 = vadd.f32 %v4534_v26, %v1314_v48  ;;  %v2724_v48 = vld [vmem:[%s3277_s10 + $0x38] sm:$0xff]  }
 0x216   : > { %v1124_v59 = vsel %vm683_vm3, %v1106_v37, %v6297_v33  ;;  %v1315_v6 = vmul.f32 %v1307_v16, %v3925_v0  ;;  %v1169_v34 = vmax.f32 %v4511_v5, %v1153_v47  ;;  %v1206_v46 = vsel %vm1196_vm9, %v1185_v4, %v1186_v40  ;;  %v2669_v60 = vld [vmem:[%s3269_s30 + $0x78] sm:$0xff] }
 0x217   : > { %v1155_v39 = vmax.f32 %v4347_v20, %v1124_v59  ;;  %v1316_v51 = vmul.f32 %v1308_v8, %v3949_v1  ;;  %v6298_v14 = vrot.slane %v4114_v9, 2  ;;  %v1256_v0 = vsel %vm1245_vm8, %v1233_v22, %v1234_v2 }
 0x218   : > { %v1342_v20 = vmul.f32 %v4528_v61, %v3838_v31  ;;  %v1322_v26 = vadd.f32 %v1321_v43, %v1315_v6  ;;  %v1235_v37 = vrot.slane %v1042_v55, 6  ;;  %v1283_v4 = vmax.f32 %v1206_v46, %v1256_v0  ;;  %v2665_v0 = vld [vmem:[%s3269_s30 + $0x58] sm:$0xff] }
 0x219   : > { %v1205_v12 = vsel %vm1196_vm9, %v1186_v40, %v6298_v14  ;;  %v1298_v62 = vmax.f32 %v1168_v54, %v1282_v29  ;;  %v1317_v1 = vmul.f32 %v1309_v25, %v3745_v19  ;;  %v1170_v7 = vmax.f32 %v1042_v55, %v1154_v49 }
 0x21a   : > { %v1171_v18 = vmax.f32 %v4114_v9, %v1155_v39  ;;  %v1348_v40 = vadd.f32 %v4442_v57, %v4498_v28  ;;  %v1323_v30 = vadd.f32 %v1322_v26, %v1316_v51  ;;  %v6299_v41 = vrot.slane %v4114_v9, 6 }
 0x21b   : > { %v1255_v31 = vsel %vm1245_vm8, %v1234_v2, %v1235_v37  ;;  %v1299_v61 = vmax.f32 %v1169_v34, %v1283_v4  ;;  %v1343_v55 = vmul.f32 %v1298_v62, %v3882_v63  ;;  %v2662_v63 = vld [vmem:[%s3269_s30 + $0x40] sm:$0xff]  ;;  %v4660_v15 = vunpack.c.l.bf16 %v2721_v10 }
 0x21c   : > { %v1254_v22 = vsel %vm1245_vm8, %v1235_v37, %v6299_v41  ;;  %v1284_v29 = vmax.f32 %v1205_v12, %v1255_v31  ;;  %v1349_v57 = vadd.f32 %v1348_v40, %v1342_v20  ;;  %v1324_v28 = vadd.f32 %v1323_v30, %v1317_v1 }
 0x21d   : > { %v1285_v19 = vmax.f32 %v4352_v21, %v1254_v22  ;;  %v1344_v9 = vmul.f32 %v1299_v61, %v3922_v23  ;;  %v4653_v45 = vmax.f32 %v2662_v63, 1e-08  ;;  %v4668_v44 = vsub.f32 1.0, %v4660_v15 }
 0x21e   : > { %v1300_v54 = vmax.f32 %v1170_v7, %v1284_v29  ;;  %v1350_v50 = vadd.f32 %v1349_v57, %v1343_v55  ;;  %1325 = vadd.xlane.f32.xlu1 %v1324_v28  ;;  %v4670_v38 = vmax.f32 %v2669_v60, 1e-08  ;;  %v4691_v13 = vmax.f32 %v2668_v36, 1e-08  ;;  %v2722_v29 = vld [vmem:[%s3277_s10 + $0x28] sm:$0xff]   ;;  %v2723_v36 = vld [vmem:[%s3277_s10 + $0x30] sm:$0xff]  }
 0x21f   : > { %v1301_v27 = vmax.f32 %v1171_v18, %v1285_v19  ;;  %v4658_v23 = vsub.f32 1.0, %v4653_v45  ;;  %v4697_v16 = vmax.f32 %v2663_v24, 1e-08  ;;  %v4704_v59 = vunpack.c.l.bf16 %v2724_v48  ;;  %v2664_v18 = vld [vmem:[%s3269_s30 + $0x50] sm:$0xff] }
 0x220   : > { %v1345_v5 = vmul.f32 %v1300_v54, %v3945_v56  ;;  %v1351_v2 = vadd.f32 %v1350_v50, %v1344_v9  ;;  %v4664_v56 = vunpack.c.h.bf16 %v2724_v48  ;;  %v4678_v3 = vsub.f32 1.0, %v4670_v38 }
 0x221   : > { %v1346_v32 = vmul.f32 %v1301_v27, %v6300_v42  ;;  %v4702_v33 = vsub.f32 1.0, %v4691_v13  ;;  %v4709_v47 = vsub.f32 1.0, %v4697_v16  ;;  %v4711_v25 = vunpack.c.h.bf16 %v2721_v10 }
 0x222   : > { %v1352_v11 = vadd.f32 %v1351_v2, %v1345_v5  ;;  %v4675_v17 = vsub.f32 1.0, %v4664_v56  ;;  %v4716_v49 = vsub.f32 1.0, %v4704_v59  ;;  %v482_v6 = vstv %s481_s17 }
 0x223   : > { %v4721_v46 = vsub.f32 1.0, %v4711_v25  ;;  %2871 = vrcp.f32 %v482_v6  ;;  %v4726_v62 = vmax.f32 %v2665_v0, 1e-08  ;;  %v4734_v19 = vmax.f32 %v2664_v18, 1e-08 }
 0x224   : > { %v1353_v21 = vadd.f32 %v1352_v11, %v1346_v32  ;;  %v4736_v55 = vunpack.c.h.bf16 %v2722_v29  ;;  %v4750_v32 = vunpack.c.l.bf16 %v2722_v29  ;;  %v1460_v10 = vadd.f32 1e-08, %v4658_v23 }
 0x225   : > { %v4743_v54 = vsub.f32 1.0, %v4726_v62  ;;  %v4748_v42 = vsub.f32 1.0, %v4734_v19  ;;  %v1412_v60 = vadd.f32 1e-08, %v4653_v45  ;;  %v1413_v24 = vadd.f32 1e-08, %v4697_v16 }
 0x226   : > { %1354 = vadd.xlane.f32.xlu0 %v1353_v21  ;;  %v4755_v21 = vsub.f32 1.0, %v4736_v55  ;;  %v4761_v48 = vsub.f32 1.0, %v4750_v32  ;;  %2873 = vlog2.f32 %v1460_v10  ;;  %v1414_v6 = vadd.f32 1e-08, %v4734_v19 }
 0x227   : > { %2875 = vlog2.f32 %v1412_v60  ;;  %v1463_v0 = vadd.f32 1e-08, %v4743_v54 }
 0x228   : > { %2877 = vlog2.f32 %v1413_v24 }
 0x22d   : > { %v2872_v2 = vpop.eup %2871 }
 0x22f   : > { %1583 = vrot.lane.b32.xlu1 %v4658_v23, %s3091_s23 }
 0x233   : > { %1599 = vrot.lane.b32.xlu1 %v4668_v44, %s3091_s23 }
 0x237   : > { %1613 = vrot.lane.b32.xlu1 %v4675_v17, %s3091_s23 }
 0x23b   : > { %1645 = vrot.lane.b32.xlu1 %v4678_v3, %s3092_s19 }
 0x23c   : > { %1597 = vrot.lane.b32.xlu0 %v4678_v3, %s3091_s23 }
 0x23f   : > { %1661 = vrot.lane.b32.xlu1 %v4675_v17, %s3092_s19 }
 0x240   : > { %1631 = vrot.lane.b32.xlu0 %v4658_v23, %s3092_s19 }
 0x241   : > { %v448_v52 = vpop.xlane.xlu0 %447 }
 0x242   : > { %v449_v8 = vrot.slane %v448_v52, 4 }
 0x243   : > { %1595 = vrot.lane.b32.xlu1 %v4702_v33, %s3091_s23 }
 0x244   : > { %1647 = vrot.lane.b32.xlu0 %v4668_v44, %s3092_s19  ;;  %v450_v39 = vadd.f32 %v449_v8, %v448_v52  ;;  %v1461_v52 = vadd.f32 1e-08, %v4709_v47  ;;  %v4773_v8 = vunpack.c.l.bf16 %v2723_v36 }
 0x245   : > { %v772_v43 = vpop.xlane.xlu0 %771 }
 0x246   : > { %v472_v34 = vpop.xlane.xlu1 %471  ;;  %v773_v51 = vrot.slane %v772_v43, 4  ;;  %v451_v12 = vrot.slane %v450_v39, 2  ;;  %2879 = vlog2.f32 %v1461_v52 }
 0x247   : > { %v473_v14 = vrot.slane %v472_v34, 4  ;;  %1611 = vrot.lane.b32.xlu1 %v4716_v49, %s3091_s23  ;;  %2881 = vlog2.f32 %v1414_v6  ;;  %v1419_v6 = vadd.f32 1e-08, %v4670_v38 }
 0x248   : > { %1585 = vrot.lane.b32.xlu0 %v4709_v47, %s3091_s23  ;;  %v774_v20 = vadd.f32 %v773_v51, %v772_v43  ;;  %v452_v37 = vadd.f32 %v451_v12, %v450_v39  ;;  %v2666_v39 = vld [vmem:[%s3269_s30 + $0x60] sm:$0xff]  ;;  %v1462_v43 = vadd.f32 1e-08, %v4748_v42  ;;  %v4785_v51 = vsub.f32 1.0, %v4773_v8 }
 0x249   : > { %v474_v26 = vadd.f32 %v473_v14, %v472_v34  ;;  %v788_v4 = vpop.xlane.xlu0 %787  ;;  %v4780_v34 = vmax.f32 %v2666_v39, 1e-08  ;;  %v2667_v14 = vld [vmem:[%s3269_s30 + $0x68] sm:$0xff]  ;;  %v1415_v12 = vadd.f32 1e-08, %v4726_v62 }
 0x24a   : > { %v789_v1 = vrot.slane %v788_v4, 4  ;;  %v453_v7 = vrot.slane %v452_v37, 1  ;;  %v775_v30 = vrot.slane %v774_v20, 2  ;;  %2883 = vlog2.f32 %v1462_v43 }
 0x24b   : > { %v475_v40 = vrot.slane %v474_v26, 2  ;;  %1643 = vrot.lane.b32.xlu1 %v4702_v33, %s3092_s19  ;;  %2885 = vlog2.f32 %v1415_v12  ;;  %v1467_v12 = vadd.f32 1e-08, %v4678_v3 }
 0x24c   : > { %1601 = vrot.lane.b32.xlu0 %v4721_v46, %s3091_s23  ;;  %v790_v41 = vadd.f32 %v789_v1, %v788_v4  ;;  %v454_v22 = vadd.f32 %v453_v7, %v452_v37  ;;  %v776_v61 = vadd.f32 %v775_v30, %v774_v20  ;;  %v4793_v20 = vsub.f32 1.0, %v4780_v34  ;;  %v2874_v4 = vpop.eup %2873 }
 0x24d   : > { %v476_v31 = vadd.f32 %v475_v40, %v474_v26  ;;  %v4795_v26 = vmax.f32 %v2667_v14, 1e-08  ;;  %v4799_v37 = vunpack.c.h.bf16 %v2723_v36  ;;  %v1416_v1 = vadd.f32 1e-08, %v4780_v34  ;;  %v2876_v7 = vpop.eup %2875 }
 0x24e   : > { %2729 = vpush %v454_v22  ;;  %v777_v28 = vrot.slane %v776_v61, 1  ;;  %v791_v9 = vrot.slane %v790_v41, 2  ;;  %v1464_v18 = vadd.f32 1e-08, %v4793_v20  ;;  %2887 = vlog2.f32 %v1463_v0  ;;  %v2878_v40 = vpop.eup %2877 }
 0x24f   : > { %v477_v57 = vrot.slane %v476_v31, 1  ;;  %1659 = vrot.lane.b32.xlu1 %v4716_v49, %s3092_s19  ;;  %v4811_v22 = vsub.f32 1.0, %v4799_v37  ;;  %2889 = vlog2.f32 %v1416_v1 }
 0x250   : > { %1633 = vrot.lane.b32.xlu0 %v4709_v47, %s3092_s19  ;;  %v778_v50 = vadd.f32 %v777_v28, %v776_v61  ;;  %v792_v5 = vadd.f32 %v791_v9, %v790_v41  ;;  %v2880_v30 = vpop.eup %2879  ;;  %v4806_v41 = vsub.f32 1.0, %v4795_v26  ;;  %v1421_v61 = vmul.f32 0.6931472, %v2876_v7 }
 0x251   : > { %v478_v27 = vadd.f32 %v477_v57, %v476_v31  ;;  %v1417_v31 = vadd.f32 1e-08, %v4795_v26  ;;  %2891 = vlog2.f32 %v1464_v18  ;;  %v2882_v57 = vpop.eup %2881  ;;  %v1423_v28 = vmul.f32 0.6931472, %v2878_v40 }
 0x252   : > { %v793_v11 = vrot.slane %v792_v5, 1  ;;  %v1465_v29 = vadd.f32 1e-08, %v4806_v41  ;;  %v1469_v9 = vmul.f32 0.6931472, %v2874_v4 }
 0x253   : > { %2731 = vpush %v478_v27  ;;  %1589 = vrot.lane.b32.xlu1 %v4743_v54, %s3091_s23  ;;  %v1471_v27 = vmul.f32 0.6931472, %v2880_v30  ;;  %2893 = vlog2.f32 %v1417_v31  ;;  %v1437_v60 = vmul.f32 %v4711_v25, %v1423_v28 }
 0x254   : > { %1649 = vrot.lane.b32.xlu0 %v4721_v46, %s3092_s19  ;;  %2733 = vpush %v2872_v2  ;;  %v794_v63 = vadd.f32 %v793_v11, %v792_v5  ;;  %v1418_v5 = vadd.f32 1e-08, %v4691_v13  ;;  %v1425_v2 = vmul.f32 0.6931472, %v2882_v57  ;;  %v1436_v11 = vmul.f32 %v4660_v15, %v1421_v61 }
 0x255   : > { %2735 = vpush %v778_v50  ;;  %v2884_v50 = vpop.eup %2883  ;;  %2895 = vlog2.f32 %v1465_v29  ;;  %v1484_v24 = vmul.f32 %v1469_v9, %v4668_v44  ;;  %v1485_v52 = vmul.f32 %v1471_v27, %v4721_v46 }
 0x256   : > { %2737 = vpush %v794_v63  ;;  %v1466_v63 = vadd.f32 1e-08, %v4702_v33  ;;  %v2886_v10 = vpop.eup %2885  ;;  %v1473_v36 = vmul.f32 0.6931472, %v2884_v50  ;;  %2897 = vlog2.f32 %v1418_v5  ;;  %v1438_v14 = vmul.f32 %v4750_v32, %v1425_v2 }
 0x257   : > { %1605 = vrot.lane.b32.xlu1 %v4755_v21, %s3091_s23  ;;  %v1427_v43 = vmul.f32 0.6931472, %v2886_v10  ;;  %v1492_v7 = vadd.f32 %v1484_v24, %v1436_v11  ;;  %v1493_v18 = vadd.f32 %v1485_v52, %v1437_v60  ;;  %v1517_v50 = vadd.f32 %v4711_v25, %v4660_v15 }
 0x258   : > { %1587 = vrot.lane.b32.xlu0 %v4748_v42, %s3091_s23  ;;  %v2888_v39 = vpop.eup %2887  ;;  %2899 = vlog2.f32 %v1466_v63  ;;  %v1486_v1 = vmul.f32 %v1473_v36, %v4761_v48 }
 0x259   : > { %v2890_v0 = vpop.eup %2889  ;;  %v1475_v4 = vmul.f32 0.6931472, %v2888_v39  ;;  %2901 = vlog2.f32 %v1419_v6  ;;  %v1439_v31 = vmul.f32 %v4736_v55, %v1427_v43  ;;  %v1500_v9 = vadd.f32 %v1493_v18, %v1492_v7 }
 0x25a   : > { %v1429_v30 = vmul.f32 0.6931472, %v2890_v0  ;;  %2903 = vlog2.f32 %v1467_v12  ;;  %v1494_v28 = vadd.f32 %v1486_v1, %v1438_v14  ;;  %v1518_v52 = vadd.f32 %v4750_v32, %v1517_v50 }
 0x25b   : > { %1637 = vrot.lane.b32.xlu1 %v4743_v54, %s3092_s19  ;;  %v2892_v40 = vpop.eup %2891  ;;  %v1487_v57 = vmul.f32 %v1475_v4, %v4755_v21 }
 0x25c   : > { %1603 = vrot.lane.b32.xlu0 %v4761_v48, %s3091_s23  ;;  %v1477_v29 = vmul.f32 0.6931472, %v2892_v40  ;;  %v1440_v2 = vmul.f32 %v4773_v8, %v1429_v30  ;;  %v1501_v36 = vadd.f32 %v1500_v9, %v1494_v28  ;;  %v1519_v7 = vadd.f32 %v4736_v55, %v1518_v52 }
 0x25d   : > { %v2894_v61 = vpop.eup %2893  ;;  %v1495_v60 = vadd.f32 %v1487_v57, %v1439_v31 }
 0x25e   : > { %v1431_v5 = vmul.f32 0.6931472, %v2894_v61  ;;  %v1488_v10 = vmul.f32 %v1477_v29, %v4785_v51  ;;  %v1520_v57 = vadd.f32 %v4773_v8, %v1519_v7 }
 0x25f   : > { %1653 = vrot.lane.b32.xlu1 %v4755_v21, %s3092_s19  ;;  %v2896_v27 = vpop.eup %2895  ;;  %v1502_v4 = vadd.f32 %v1501_v36, %v1495_v60 }
 0x260   : > { %1635 = vrot.lane.b32.xlu0 %v4748_v42, %s3092_s19  ;;  %v2898_v11 = vpop.eup %2897  ;;  %v1479_v63 = vmul.f32 0.6931472, %v2896_v27  ;;  %v1441_v6 = vmul.f32 %v4799_v37, %v1431_v5  ;;  %v1496_v0 = vadd.f32 %v1488_v10, %v1440_v2  ;;  %v1521_v5 = vadd.f32 %v4799_v37, %v1520_v57 }
 0x261   : > { %v1433_v39 = vmul.f32 0.6931472, %v2898_v11 }
 0x262   : > { %v2900_v24 = vpop.eup %2899  ;;  %v1489_v12 = vmul.f32 %v1479_v63, %v4811_v22  ;;  %v1503_v29 = vadd.f32 %v1502_v4, %v1496_v0  ;;  %v1522_v63 = vadd.f32 %v4704_v59, %v1521_v5 }
 0x263   : > { %1607 = vrot.lane.b32.xlu1 %v4785_v51, %s3091_s23  ;;  %v2902_v43 = vpop.eup %2901  ;;  %v1481_v14 = vmul.f32 0.6931472, %v2900_v24  ;;  %v1442_v40 = vmul.f32 %v4704_v59, %v1433_v39 }
 0x264   : > { %1651 = vrot.lane.b32.xlu0 %v4761_v48, %s3092_s19  ;;  %v2904_v1 = vpop.eup %2903  ;;  %v1435_v18 = vmul.f32 0.6931472, %v2902_v43  ;;  %v1497_v61 = vadd.f32 %v1489_v12, %v1441_v6  ;;  %v1523_v60 = vadd.f32 %v4664_v56, %v1522_v63 }
 0x265   : > { %v1483_v30 = vmul.f32 0.6931472, %v2904_v1  ;;  %v1490_v31 = vmul.f32 %v1481_v14, %v4716_v49 }
 0x266   : > { %v1443_v28 = vmul.f32 %v4664_v56, %v1435_v18  ;;  %v1504_v50 = vadd.f32 %v1503_v29, %v1497_v61 }
 0x267   : > { %1655 = vrot.lane.b32.xlu1 %v4785_v51, %s3092_s19  ;;  %v1491_v9 = vmul.f32 %v1483_v30, %v4675_v17  ;;  %v1498_v27 = vadd.f32 %v1490_v31, %v1442_v40 }
 0x268   : > { %1591 = vrot.lane.b32.xlu0 %v4793_v20, %s3091_s23 }
 0x269   : > { %v1499_v2 = vadd.f32 %v1491_v9, %v1443_v28  ;;  %v1505_v11 = vadd.f32 %v1504_v50, %v1498_v27 }
 0x26b   : > { %1609 = vrot.lane.b32.xlu1 %v4811_v22, %s3091_s23  ;;  %v1506_v10 = vadd.f32 %v1505_v11, %v1499_v2 }
 0x26c   : > { %1639 = vrot.lane.b32.xlu0 %v4793_v20, %s3092_s19 }
 0x26f   : > { %1657 = vrot.lane.b32.xlu1 %v4811_v22, %s3092_s19 }
 0x270   : > { %1593 = vrot.lane.b32.xlu0 %v4806_v41, %s3091_s23 }
 0x274   : > { %1641 = vrot.lane.b32.xlu0 %v4806_v41, %s3092_s19 }
 0x27f   : > { %s2730_s20 = spop %2729 }
 0x280   : > { %s487_s6 = sadd.f32 %s2730_s20, %s4685_s9 }
 0x284   : > { %s4848_s22 = spop %2731 }
 0x285   : > { %s4851_s28 = spop %2733 }
 0x286   : > { %s485_s29 = smul.f32 %s4851_s28, %s4848_s22  ;;  %s2736_s26 = spop %2735 }
 0x287   : > { %s4858_s30 = smul.f32 %s4851_s28, %s487_s6  ;;  %s1334_s7 = sadd.f32 1e-07, %s2736_s26 }
 0x288   : > { %s2738_s10 = spop %2737 }
 0x289   : > { %v1335_v36 = vstv %s1334_s7  ;;  %s1363_s9 = sadd.f32 1e-07, %s2738_s10 }
 0x28a   : > { %2905 = vrcp.f32 %v1335_v36 }
 0x28b   : > { %v1364_v14 = vstv %s1363_s9 }
 0x28c   : > { %2907 = vrcp.f32 %v1364_v14 }
 0x293   : > { %1507 = vadd.xlane.f32.xlu0 %v1506_v10  ;;  %1524 = vadd.xlane.f32.xlu1 %v1523_v60 }
 0x294   : > { %v2906_v29 = vpop.eup %2905 }
 0x296   : > { %v2908_v2 = vpop.eup %2907 }
 0x2ab   : > { %v1326_v24 = vpop.xlane.xlu1 %1325 }
 0x2ac   : > { %v1327_v52 = vrot.slane %v1326_v24, 4 }
 0x2ae   : > { %v1328_v39 = vadd.f32 %v1327_v52, %v1326_v24 }
 0x2af   : > { %v1584_v6 = vpop.permute.xlu1 %1583 }
 0x2b0   : > { %v1329_v43 = vrot.slane %v1328_v39, 2 }
 0x2b2   : > { %v1330_v0 = vadd.f32 %v1329_v43, %v1328_v39 }
 0x2b3   : > { %v1355_v12 = vpop.xlane.xlu0 %1354  ;;  %v1600_v1 = vpop.permute.xlu1 %1599 }
 0x2b4   : > { %v1356_v4 = vrot.slane %v1355_v12, 4  ;;  %v1331_v7 = vrot.slane %v1330_v0, 1 }
 0x2b6   : > { %v1357_v18 = vadd.f32 %v1356_v4, %v1355_v12  ;;  %v1332_v30 = vadd.f32 %v1331_v7, %v1330_v0  ;;  %v1615_v0 = vsel %vm277_vm1, %v1584_v6, -1e+30  ;;  %v1623_v4 = vsel %vm277_vm1, %v1600_v1, -1e+30 }
 0x2b7   : > { %v1598_v40 = vpop.permute.xlu0 %1597  ;;  %v1614_v31 = vpop.permute.xlu1 %1613 }
 0x2b8   : > { %v1358_v61 = vrot.slane %v1357_v18, 2  ;;  %2739 = vpush %v1332_v30  ;;  %v1622_v60 = vsel %vm277_vm1, %v1598_v40, -1e+30  ;;  %v1630_v24 = vsel %vm277_vm1, %v1614_v31, -1e+30 }
 0x2b9   : > { %2741 = vpush %v2906_v29 }
 0x2ba   : > { %v1359_v57 = vadd.f32 %v1358_v61, %v1357_v18 }
 0x2bb   : > { %v1632_v28 = vpop.permute.xlu0 %1631  ;;  %v1646_v27 = vpop.permute.xlu1 %1645 }
 0x2bc   : > { %v1360_v9 = vrot.slane %v1359_v57, 1  ;;  %v1670_v63 = vsel %vm268_vm0, %v1646_v27, -1e+30  ;;  %v1663_v36 = vsel %vm268_vm0, %v1632_v28, -1e+30 }
 0x2bd   : > { %v1686_v43 = vmax.f32 %v1622_v60, %v1670_v63  ;;  %v1679_v7 = vmax.f32 %v1615_v0, %v1663_v36 }
 0x2be   : > { %v1361_v50 = vadd.f32 %v1360_v9, %v1359_v57 }
 0x2bf   : > { %v1648_v5 = vpop.permute.xlu0 %1647  ;;  %v1662_v11 = vpop.permute.xlu1 %1661  ;;  %v1702_v30 = vmax.f32 %v4678_v3, %v1686_v43  ;;  %v4884_v29 = vmax.f32 %v4658_v23, %v1679_v7 }
 0x2c0   : > { %2743 = vpush %v1361_v50  ;;  %v1678_v10 = vsel %vm268_vm0, %v1662_v11, -1e+30  ;;  %v1671_v52 = vsel %vm268_vm0, %v1648_v5, -1e+30 }
 0x2c1   : > { %2745 = vpush %v2908_v2  ;;  %v1694_v14 = vmax.f32 %v1630_v24, %v1678_v10  ;;  %v1687_v18 = vmax.f32 %v1623_v4, %v1671_v52  ;;  %v1718_v1 = vrot.slane %v1702_v30, 1  ;;  %v6184_v63 = vrot.slane %v4884_v29, 7 }
 0x2c2   : > { %v1711_v24 = vrot.slane %v4884_v29, 1 }
 0x2c3   : > { %v1586_v39 = vpop.permute.xlu0 %1585  ;;  %v1596_v12 = vpop.permute.xlu1 %1595  ;;  %v4881_v31 = vmax.f32 %v4675_v17, %v1694_v14  ;;  %v4887_v57 = vmax.f32 %v4668_v44, %v1687_v18 }
 0x2c4   : > { %v1616_v6 = vsel %vm277_vm1, %v1586_v39, -1e+30  ;;  %v1621_v5 = vsel %vm277_vm1, %v1596_v12, -1e+30  ;;  %v1766_v39 = vrot.slane %v1702_v30, 7 }
 0x2c5   : > { %v1774_v9 = vrot.slane %v4881_v31, 7  ;;  %v1719_v10 = vrot.slane %v4887_v57, 1  ;;  %v6182_v52 = vrot.slane %v4887_v57, 7 }
 0x2c7   : > { %v1602_v40 = vpop.permute.xlu0 %1601  ;;  %v1612_v61 = vpop.permute.xlu1 %1611  ;;  %v1734_v12 = vsel %vm634_vm2, %v1718_v1, %v1719_v10  ;;  %v1790_v0 = vsel %vm683_vm3, %v1774_v9, %v6184_v63 }
 0x2c8   : > { %v1624_v60 = vsel %vm277_vm1, %v1602_v40, -1e+30 }
 0x2cb   : > { %v1634_v28 = vpop.permute.xlu0 %1633  ;;  %v1644_v50 = vpop.permute.xlu1 %1643 }
 0x2cc   : > { %v1664_v27 = vsel %vm268_vm0, %v1634_v28, -1e+30  ;;  %v1669_v11 = vsel %vm268_vm0, %v1644_v50, -1e+30  ;;  %v1726_v50 = vrot.slane %v4881_v31, 1 }
 0x2cd   : > { %v1680_v2 = vmax.f32 %v1616_v6, %v1664_v27  ;;  %v1685_v36 = vmax.f32 %v1621_v5, %v1669_v11  ;;  %v1629_v6 = vsel %vm277_vm1, %v1612_v61, -1e+30 }
 0x2cf   : > { %v4905_v43 = vmax.f32 %v4709_v47, %v1680_v2  ;;  %v1650_v14 = vpop.permute.xlu0 %1649  ;;  %v4916_v7 = vmax.f32 %v4702_v33, %v1685_v36  ;;  %v1660_v18 = vpop.permute.xlu1 %1659  ;;  %v1782_v36 = vsel %vm683_vm3, %v1766_v39, %v6182_v52 }
 0x2d0   : > { %v1672_v4 = vsel %vm268_vm0, %v1650_v14, -1e+30  ;;  %v1677_v27 = vsel %vm268_vm0, %v1660_v18, -1e+30  ;;  %v1791_v14 = vsel %vm260_vm4, %v1790_v0, -1e+30 }
 0x2d1   : > { %v6183_v40 = vrot.slane %v4905_v43, 1  ;;  %v1688_v28 = vmax.f32 %v1624_v60, %v1672_v4  ;;  %v6185_v5 = vrot.slane %v4916_v7, 1  ;;  %v6186_v2 = vrot.slane %v4916_v7, 7 }
 0x2d2   : > { %v1693_v11 = vmax.f32 %v1629_v6, %v1677_v27  ;;  %v1750_v18 = vsel %vm276_vm5, %v1734_v12, -1e+30  ;;  %v1799_v12 = vsel %vm260_vm4, %v1782_v36, -1e+30 }
 0x2d3   : > { %v1741_v61 = vsel %vm634_vm2, %v1711_v24, %v6183_v40  ;;  %v4937_v60 = vmax.f32 %v4721_v46, %v1688_v28  ;;  %v1588_v4 = vpop.permute.xlu0 %1587  ;;  %v4945_v27 = vsel %vm634_vm2, %v6185_v5, %v1718_v1  ;;  %v1783_v0 = vsel %vm683_vm3, %v6186_v2, %v1766_v39  ;;  %v1590_v52 = vpop.permute.xlu1 %1589 }
 0x2d4   : > { %v1807_v6 = vmax.f32 %v1741_v61, %v1791_v14  ;;  %v1814_v40 = vmax.f32 %v1750_v18, %v1783_v0  ;;  %v4953_v63 = vmax.f32 %v4716_v49, %v1693_v11  ;;  %v1742_v1 = vsel %vm634_vm2, %v1726_v50, %v1711_v24 }
 0x2d5   : > { %v1720_v28 = vrot.slane %v4937_v60, 1 }
 0x2d6   : > { %v1823_v14 = vmax.f32 %v4884_v29, %v1807_v6  ;;  %v1830_v61 = vmax.f32 %v1702_v30, %v1814_v40  ;;  %v6187_v5 = vrot.slane %v4953_v63, 1  ;;  %v1773_v36 = vrot.slane %v4953_v63, 7 }
 0x2d7   : > { %v1733_v39 = vsel %vm634_vm2, %v1719_v10, %v1720_v28  ;;  %v1604_v18 = vpop.permute.xlu0 %1603  ;;  %v1606_v2 = vpop.permute.xlu1 %1605  ;;  %v1758_v30 = vsel %vm276_vm5, %v1742_v1, -1e+30 }
 0x2d8   : > { %v4966_v11 = vsub.f32 %v1823_v14, %v4658_v23  ;;  %v1815_v0 = vmax.f32 %v1733_v39, %v1799_v12  ;;  %v4970_v6 = vsub.f32 %v1830_v61, %v4678_v3  ;;  %v4976_v24 = vsel %vm634_vm2, %v6187_v5, %v1726_v50 }
 0x2d9   : > { %v1617_v23 = vsel %vm277_vm1, %v1588_v4, -1e+30  ;;  %v1775_v3 = vsel %vm683_vm3, %v1773_v36, %v1774_v9  ;;  %v1618_v9 = vsel %vm277_vm1, %v1590_v52, -1e+30 }
 0x2da   : > { %6301 = vst [vmem:[#allocation25_spill] sm:$0xff] %v4970_v6  ;;  %v1831_v10 = vmax.f32 %v4887_v57, %v1815_v0  ;;  %1887 = vrot.lane.b32.xlu0 %v4966_v11, %s3091_s23  ;;  %v1822_v40 = vmax.f32 %v1758_v30, %v1775_v3  ;;  %1901 = vrot.lane.b32.xlu1 %v4970_v6, %s3091_s23  ;;  %v1625_v0 = vsel %vm277_vm1, %v1604_v18, -1e+30  ;;  %v1760_v30 = vrot.slane %v4905_v43, 7 }
 0x2db   : > { %v1636_v12 = vpop.permute.xlu0 %1635  ;;  %v1638_v4 = vpop.permute.xlu1 %1637 }
 0x2dc   : > { %v4992_v50 = vsub.f32 %v1831_v10, %v4668_v44  ;;  %v1665_v14 = vsel %vm268_vm0, %v1636_v12, -1e+30  ;;  %v1838_v1 = vmax.f32 %v4881_v31, %v1822_v40  ;;  %v1666_v61 = vsel %vm268_vm0, %v1638_v4, -1e+30 }
 0x2dd   : > { %v1681_v39 = vmax.f32 %v1617_v23, %v1665_v14  ;;  %v1682_v44 = vmax.f32 %v1618_v9, %v1666_v61  ;;  %v1626_v23 = vsel %vm277_vm1, %v1606_v2, -1e+30  ;;  %v6303_v9 = vrot.slane %v4884_v29, 7 }
 0x2de   : > { %1903 = vrot.lane.b32.xlu0 %v4992_v50, %s3091_s23  ;;  %v5007_v10 = vsub.f32 %v1838_v1, %v4675_v17  ;;  %v1768_v61 = vrot.slane %v4937_v60, 7 }
 0x2df   : > { %v5010_v31 = vmax.f32 %v4748_v42, %v1681_v39  ;;  %v1652_v52 = vpop.permute.xlu0 %1651  ;;  %v5017_v18 = vmax.f32 %v4743_v54, %v1682_v44  ;;  %v1654_v40 = vpop.permute.xlu1 %1653  ;;  %v1789_v39 = vsel %vm683_vm3, %v6303_v9, %v1760_v30 }
 0x2e0   : > { %6302 = vst [vmem:[#allocation27_spill] sm:$0xff] %v5007_v10  ;;  %v1673_v3 = vsel %vm268_vm0, %v1652_v52, -1e+30  ;;  %1917 = vrot.lane.b32.xlu1 %v5007_v10, %s3091_s23  ;;  %v1674_v4 = vsel %vm268_vm0, %v1654_v40, -1e+30 }
 0x2e1   : > { %v1713_v12 = vrot.slane %v5010_v31, 1  ;;  %v6188_v14 = vrot.slane %v5010_v31, 7  ;;  %v1689_v17 = vmax.f32 %v1625_v0, %v1673_v3  ;;  %v1714_v2 = vrot.slane %v5017_v18, 1 }
 0x2e2   : > { %1935 = vrot.lane.b32.xlu0 %v4966_v11, %s3092_s19  ;;  %v1690_v1 = vmax.f32 %v1626_v23, %v1674_v4  ;;  %v6304_v0 = vrot.slane %v4905_v43, 1 }
 0x2e3   : > { %v5038_v52 = vmax.f32 %v4761_v48, %v1689_v17  ;;  %v1592_v3 = vpop.permute.xlu0 %1591  ;;  %v1788_v23 = vsel %vm683_vm3, %v1760_v30, %v6188_v14  ;;  %v1739_v40 = vsel %vm634_vm2, %v1713_v12, %v1714_v2  ;;  %v1608_v4 = vpop.permute.xlu1 %1607 }
 0x2e4   : > { %v1740_v44 = vsel %vm634_vm2, %v6304_v0, %v1713_v12  ;;  %v1809_v5 = vmax.f32 %v1739_v40, %v1788_v23  ;;  %v5051_v17 = vmax.f32 %v4755_v21, %v1690_v1  ;;  %1949 = vrot.lane.b32.xlu1 %v4970_v6, %s3092_s19 }
 0x2e5   : > { %v1808_v29 = vmax.f32 %v1740_v44, %v1789_v39  ;;  %v1721_v9 = vrot.slane %v5038_v52, 1  ;;  %v1769_v0 = vrot.slane %v5038_v52, 7  ;;  %v6305_v39 = vrot.slane %v4887_v57, 7 }
 0x2e6   : > { %1951 = vrot.lane.b32.xlu0 %v4992_v50, %s3092_s19  ;;  %v1825_v1 = vmax.f32 %v5010_v31, %v1809_v5  ;;  %v1722_v23 = vrot.slane %v5051_v17, 1 }
 0x2e7   : > { %v1824_v30 = vmax.f32 %v4905_v43, %v1808_v29  ;;  %v1781_v12 = vsel %vm683_vm3, %v6305_v39, %v1768_v61  ;;  %v1732_v44 = vsel %vm634_vm2, %v1720_v28, %v1721_v9  ;;  %v1640_v40 = vpop.permute.xlu0 %1639  ;;  %v1656_v14 = vpop.permute.xlu1 %1655  ;;  %v1780_v57 = vsel %vm683_vm3, %v1768_v61, %v1769_v0 }
 0x2e8   : > { %v1816_v29 = vmax.f32 %v1732_v44, %v1781_v12  ;;  %v5076_v39 = vsub.f32 %v1825_v1, %v4748_v42  ;;  %v1731_v5 = vsel %vm634_vm2, %v1721_v9, %v1722_v23  ;;  %1965 = vrot.lane.b32.xlu1 %v5007_v10, %s3092_s19  ;;  %v1667_v44 = vsel %vm268_vm0, %v1640_v40, -1e+30 }
 0x2e9   : > { %v5069_v43 = vsub.f32 %v1824_v30, %v4709_v47  ;;  %v1817_v28 = vmax.f32 %v1731_v5, %v1780_v57  ;;  %s2740_s11 = spop %2739  ;;  %v1627_v57 = vsel %vm277_vm1, %v1608_v4, -1e+30  ;;  %v1675_v40 = vsel %vm268_vm0, %v1656_v14, -1e+30 }
 0x2ea   : > { %v1832_v47 = vmax.f32 %v4937_v60, %v1816_v29  ;;  %s2742_s17 = spop %2741  ;;  %v1619_v60 = vsel %vm277_vm1, %v1592_v3, -1e+30 }
 0x2eb   : > { %1889 = vrot.lane.b32.xlu0 %v5069_v43, %s3091_s23  ;;  %v1594_v30 = vpop.permute.xlu0 %1593  ;;  %v1833_v61 = vmax.f32 %v5038_v52, %v1817_v28  ;;  %v1610_v12 = vpop.permute.xlu1 %1609  ;;  %s5091_s20 = smul.f32 %s2742_s17, %s2740_s11  ;;  %v1683_v5 = vmax.f32 %v1619_v60, %v1667_v44 }
 0x2ec   : > { %v5088_v42 = vsub.f32 %v1832_v47, %v4721_v46  ;;  %1891 = vrot.lane.b32.xlu1 %v5076_v39, %s3091_s23  ;;  %v1620_v46 = vsel %vm277_vm1, %v1594_v30, -1e+30  ;;  %v1628_v29 = vsel %vm277_vm1, %v1610_v12, -1e+30 }
 0x2ed   : > { %v5098_v9 = vsub.f32 %v1833_v61, %v4761_v48  ;;  %s1368_s6 = smul.f32 2.0, %s5091_s20  ;;  %v1691_v61 = vmax.f32 %v1627_v57, %v1675_v40  ;;  %v5128_v12 = vmax.f32 %v4793_v20, %v1683_v5 }
 0x2ef   : > { %1905 = vrot.lane.b32.xlu0 %v5088_v42, %s3091_s23  ;;  %v1642_v1 = vpop.permute.xlu0 %1641  ;;  %v1658_v3 = vpop.permute.xlu1 %1657 }
 0x2f0   : > { %v1668_v48 = vsel %vm268_vm0, %v1642_v1, -1e+30  ;;  %1907 = vrot.lane.b32.xlu1 %v5098_v9, %s3091_s23  ;;  %v1676_v28 = vsel %vm268_vm0, %v1658_v3, -1e+30 }
 0x2f1   : > { %v1684_v47 = vmax.f32 %v1620_v46, %v1668_v48  ;;  %s2744_s26 = spop %2743  ;;  %v1692_v4 = vmax.f32 %v1628_v29, %v1676_v28  ;;  %v6306_v46 = vrot.slane %v4916_v7, 7  ;;  %v5146_v29 = vmax.f32 %v4785_v51, %v1691_v61 }
 0x2f2   : > { %s2746_s7 = spop %2745  ;;  %v1715_v48 = vrot.slane %v5128_v12, 1  ;;  %v1770_v61 = vrot.slane %v5051_v17, 7 }
 0x2f3   : > { %1937 = vrot.lane.b32.xlu0 %v5069_v43, %s3092_s19  ;;  %v5122_v30 = vmax.f32 %v4806_v41, %v1684_v47  ;;  %s1367_s10 = smul.f32 %s2746_s7, %s2744_s26  ;;  %v5125_v14 = vmax.f32 %v4811_v22, %v1692_v4  ;;  %v1723_v28 = vrot.slane %v5146_v29, 1 }
 0x2f4   : > { %1939 = vrot.lane.b32.xlu1 %v5076_v39, %s3092_s19 }
 0x2f5   : > { %v1764_v60 = vrot.slane %v5122_v30, 7  ;;  %s1370_s9 = sadd.f32 %s1367_s10, %s5091_s20  ;;  %s5134_s11 = smul.f32 %s1368_s6, %s1367_s10  ;;  %v1772_v44 = vrot.slane %v5125_v14, 7 }
 0x2f7   : > { %1953 = vrot.lane.b32.xlu0 %v5088_v42, %s3092_s19  ;;  %v1784_v1 = vsel %vm683_vm3, %v1764_v60, %v6306_v46  ;;  %s1371_s17 = sadd.f32 1e-07, %s1370_s9  ;;  %v1776_v5 = vsel %vm683_vm3, %v1772_v44, %v1773_v36  ;;  %v1738_v36 = vsel %vm634_vm2, %v1714_v2, %v1715_v48  ;;  %v1730_v2 = vsel %vm634_vm2, %v1722_v23, %v1723_v28 }
 0x2f8   : > { %v1813_v57 = vmax.f32 %v4945_v27, %v1784_v1  ;;  %1955 = vrot.lane.b32.xlu1 %v5098_v9, %s3092_s19  ;;  %v1762_v27 = vrot.slane %v5017_v18, 7  ;;  %v1821_v47 = vmax.f32 %v4976_v24, %v1776_v5  ;;  %v6307_v24 = vrot.slane %v5010_v31, 7 }
 0x2f9   : > { %v1372_v3 = vstv %s1371_s17 }
 0x2fa   : > { %v5159_v40 = vmax.f32 %v4916_v7, %v1813_v57  ;;  %2909 = vrcp.f32 %v1372_v3  ;;  %v5171_v4 = vmax.f32 %v4953_v63, %v1821_v47  ;;  %v1787_v46 = vsel %vm683_vm3, %v6307_v24, %v1762_v27 }
 0x2fb   : > { %2015 = vrot.lane.b32.xlu0 %v4966_v11, %s3093_s27  ;;  %v1810_v1 = vmax.f32 %v1738_v36, %v1787_v46  ;;  %v1779_v57 = vsel %vm683_vm3, %v1769_v0, %v1770_v61  ;;  %v1716_v0 = vrot.slane %v5122_v30, 1  ;;  %v1771_v47 = vrot.slane %v5146_v29, 7 }
 0x2fc   : > { %2029 = vrot.lane.b32.xlu1 %v4970_v6, %s3093_s27  ;;  %v1818_v31 = vmax.f32 %v1730_v2, %v1779_v57 }
 0x2fd   : > { %v1826_v5 = vmax.f32 %v5017_v18, %v1810_v1 }
 0x2fe   : > { %v1834_v23 = vmax.f32 %v5051_v17, %v1818_v31  ;;  %v1724_v17 = vrot.slane %v5125_v14, 1 }
 0x2ff   : > { %2031 = vrot.lane.b32.xlu0 %v4992_v50, %s3093_s27  ;;  %v5201_v52 = vsub.f32 %v1826_v5, %v4743_v54  ;;  %v1763_v54 = vrot.slane %v5128_v12, 7 }
 0x300   : > { %2045 = vrot.lane.b32.xlu1 %v5007_v10, %s3093_s27  ;;  %v5208_v18 = vsub.f32 %v1834_v23, %v4755_v21  ;;  %v1737_v21 = vsel %vm634_vm2, %v1715_v48, %v1716_v0  ;;  %v1729_v46 = vsel %vm634_vm2, %v1723_v28, %v1724_v17  ;;  %v1778_v48 = vsel %vm683_vm3, %v1770_v61, %v1771_v47 }
 0x301   : > { %v1786_v36 = vsel %vm683_vm3, %v1762_v27, %v1763_v54  ;;  %v1819_v1 = vmax.f32 %v1729_v46, %v1778_v48 }
 0x302   : > { %v1811_v24 = vmax.f32 %v1737_v21, %v1786_v36  ;;  %v1785_v21 = vsel %vm683_vm3, %v1763_v54, %v1764_v60  ;;  %v1777_v60 = vsel %vm683_vm3, %v1771_v47, %v1772_v44 }
 0x303   : > { %2063 = vrot.lane.b32.xlu0 %v4966_v11, %s3094_s4  ;;  %v1835_v27 = vmax.f32 %v5146_v29, %v1819_v1  ;;  %v6308_v29 = vrot.slane %v4916_v7, 1  ;;  %v6309_v7 = vrot.slane %v4953_v63, 1 }
 0x304   : > { %v2910_v3 = vpop.eup %2909  ;;  %2077 = vrot.lane.b32.xlu1 %v4970_v6, %s3094_s4  ;;  %v1827_v2 = vmax.f32 %v5128_v12, %v1811_v24 }
 0x305   : > { %2747 = vpush %v2910_v3  ;;  %v5252_v3 = vsub.f32 %v1835_v27, %v4785_v51 }
 0x306   : > { %v5245_v28 = vsub.f32 %v1827_v2, %v4793_v20  ;;  %v1736_v20 = vsel %vm634_vm2, %v1716_v0, %v6308_v29  ;;  %v1728_v0 = vsel %vm634_vm2, %v1724_v17, %v6309_v7 }
 0x307   : > { %2079 = vrot.lane.b32.xlu0 %v4992_v50, %s3094_s4  ;;  %v1812_v46 = vmax.f32 %v1736_v20, %v1785_v21  ;;  %v1820_v2 = vmax.f32 %v1728_v0, %v1777_v60 }
 0x308   : > { %2093 = vrot.lane.b32.xlu1 %v5007_v10, %s3094_s4 }
 0x309   : > { %v1828_v27 = vmax.f32 %v5122_v30, %v1812_v46  ;;  %v1836_v44 = vmax.f32 %v5125_v14, %v1820_v2  ;;  %v1550_v2 = vmul.f32 %v4711_v25, %v4697_v16 }
 0x30b   : > { %1893 = vrot.lane.b32.xlu0 %v5201_v52, %s3091_s23  ;;  %v5285_v47 = vsub.f32 %v1828_v27, %v4806_v41  ;;  %v5292_v30 = vsub.f32 %v1836_v44, %v4811_v22  ;;  %v5312_v41 = vsub.f32 %v5159_v40, %v4702_v33  ;;  %v5320_v22 = vsub.f32 %v5171_v4, %v4716_v49 }
 0x30c   : > { %1909 = vrot.lane.b32.xlu1 %v5208_v18, %s3091_s23  ;;  %v1551_v44 = vmul.f32 %v4750_v32, %v4734_v19 }
 0x30d   : > { %6310 = vst [vmem:[#allocation29_spill] sm:$0xff] %v5312_v41  ;;  %6311 = vst [vmem:[#allocation26_spill] sm:$0xff] %v5320_v22 }
 0x30f   : > { %1941 = vrot.lane.b32.xlu0 %v5201_v52, %s3092_s19 }
 0x310   : > { %1957 = vrot.lane.b32.xlu1 %v5208_v18, %s3092_s19 }
 0x313   : > { %2017 = vrot.lane.b32.xlu0 %v5069_v43, %s3093_s27 }
 0x314   : > { %2019 = vrot.lane.b32.xlu1 %v5076_v39, %s3093_s27 }
 0x317   : > { %2033 = vrot.lane.b32.xlu0 %v5088_v42, %s3093_s27 }
 0x318   : > { %2035 = vrot.lane.b32.xlu1 %v5098_v9, %s3093_s27 }
 0x31b   : > { %2065 = vrot.lane.b32.xlu0 %v5069_v43, %s3094_s4 }
 0x31c   : > { %2067 = vrot.lane.b32.xlu1 %v5076_v39, %s3094_s4 }
 0x31f   : > { %2081 = vrot.lane.b32.xlu0 %v5088_v42, %s3094_s4 }
 0x320   : > { %v1508_v57 = vpop.xlane.xlu0 %1507  ;;  %2083 = vrot.lane.b32.xlu1 %v5098_v9, %s3094_s4  ;;  %v1525_v61 = vpop.xlane.xlu1 %1524 }
 0x321   : > { %v1509_v31 = vrot.slane %v1508_v57, 4  ;;  %v1526_v12 = vrot.slane %v1525_v61, 4 }
 0x323   : > { %1895 = vrot.lane.b32.xlu0 %v5245_v28, %s3091_s23  ;;  %v1510_v5 = vadd.f32 %v1509_v31, %v1508_v57  ;;  %v1527_v23 = vadd.f32 %v1526_v12, %v1525_v61 }
 0x324   : > { %1911 = vrot.lane.b32.xlu1 %v5252_v3, %s3091_s23 }
 0x325   : > { %v1511_v36 = vrot.slane %v1510_v5, 2  ;;  %v1528_v51 = vrot.slane %v1527_v23, 2 }
 0x327   : > { %1943 = vrot.lane.b32.xlu0 %v5245_v28, %s3092_s19  ;;  %v1512_v24 = vadd.f32 %v1511_v36, %v1510_v5  ;;  %v1529_v54 = vadd.f32 %v1528_v51, %v1527_v23  ;;  %v1533_v5 = vadd.f32 %v4697_v16, %v4653_v45  ;;  %v1552_v16 = vmul.f32 %v4736_v55, %v4726_v62 }
 0x328   : > { %1959 = vrot.lane.b32.xlu1 %v5252_v3, %s3092_s19 }
 0x329   : > { %v1513_v48 = vrot.slane %v1512_v24, 1  ;;  %v1530_v1 = vrot.slane %v1529_v54, 1  ;;  %v1534_v7 = vadd.f32 %v1533_v5, %v4734_v19 }
 0x32b   : > { %2021 = vrot.lane.b32.xlu0 %v5201_v52, %s3093_s27  ;;  %v1514_v63 = vadd.f32 %v1513_v48, %v1512_v24  ;;  %v1531_v17 = vadd.f32 %v1530_v1, %v1529_v54  ;;  %v1549_v1 = vmul.f32 %v4660_v15, %v4653_v45  ;;  %v1535_v27 = vadd.f32 %v1534_v7, %v4726_v62 }
 0x32c   : > { %2037 = vrot.lane.b32.xlu1 %v5208_v18, %s3093_s27 }
 0x32d   : > { %2749 = vpush %v1514_v63 }
 0x32e   : > { %2751 = vpush %v1531_v17 }
 0x32f   : > { %2069 = vrot.lane.b32.xlu0 %v5201_v52, %s3094_s4 }
 0x330   : > { %2085 = vrot.lane.b32.xlu1 %v5208_v18, %s3094_s4 }
 0x333   : > { %1897 = vrot.lane.b32.xlu0 %v5285_v47, %s3091_s23 }
 0x334   : > { %1913 = vrot.lane.b32.xlu1 %v5292_v30, %s3091_s23 }
 0x336   : > { %s5296_s20 = spop %2747 }
 0x337   : > { %1945 = vrot.lane.b32.xlu0 %v5285_v47, %s3092_s19 }
 0x338   : > { %1961 = vrot.lane.b32.xlu1 %v5292_v30, %s3092_s19 }
 0x33b   : > { %2023 = vrot.lane.b32.xlu0 %v5245_v28, %s3093_s27 }
 0x33c   : > { %2039 = vrot.lane.b32.xlu1 %v5252_v3, %s3093_s27 }
 0x33f   : > { %2071 = vrot.lane.b32.xlu0 %v5245_v28, %s3094_s4 }
 0x340   : > { %2087 = vrot.lane.b32.xlu1 %v5252_v3, %s3094_s4 }
 0x343   : > { %1899 = vrot.lane.b32.xlu0 %v5312_v41, %s3091_s23 }
 0x344   : > { %1915 = vrot.lane.b32.xlu1 %v5320_v22, %s3091_s23 }
 0x347   : > { %1947 = vrot.lane.b32.xlu0 %v5312_v41, %s3092_s19 }
 0x348   : > { %1963 = vrot.lane.b32.xlu1 %v5320_v22, %s3092_s19 }
 0x34b   : > { %2025 = vrot.lane.b32.xlu0 %v5285_v47, %s3093_s27 }
 0x34c   : > { %v1888_v33 = vpop.permute.xlu0 %1887  ;;  %2041 = vrot.lane.b32.xlu1 %v5292_v30, %s3093_s27  ;;  %v1902_v14 = vpop.permute.xlu1 %1901 }
 0x34d   : > { %v5340_v57 = vsel %vm277_vm1, %v1888_v33, -1e+30  ;;  %v5356_v23 = vsel %vm277_vm1, %v1902_v14, -1e+30  ;;  %v1557_v33 = vadd.f32 %v1550_v2, %v1549_v1 }
 0x34f   : > { %2073 = vrot.lane.b32.xlu0 %v5285_v47, %s3094_s4  ;;  %v1558_v25 = vadd.f32 %v1557_v33, %v1551_v44 }
 0x350   : > { %v1904_v49 = vpop.permute.xlu0 %1903  ;;  %2089 = vrot.lane.b32.xlu1 %v5292_v30, %s3094_s4 }
 0x351   : > { %v5364_v21 = vsel %vm277_vm1, %v1904_v49, -1e+30  ;;  %v1536_v49 = vadd.f32 %v1535_v27, %v4780_v34  ;;  %v1559_v27 = vadd.f32 %v1558_v25, %v1552_v16 }
 0x352   : > { %v1918_v40 = vpop.permute.xlu1 %1917 }
 0x353   : > { %2027 = vrot.lane.b32.xlu0 %v5312_v41, %s3093_s27  ;;  %v5379_v0 = vsel %vm277_vm1, %v1918_v40, -1e+30  ;;  %v1537_v5 = vadd.f32 %v1536_v49, %v4795_v26 }
 0x354   : > { %v1936_v4 = vpop.permute.xlu0 %1935  ;;  %2043 = vrot.lane.b32.xlu1 %v5320_v22, %s3093_s27 }
 0x355   : > { %v5344_v31 = vsel %vm268_vm0, %v1936_v4, -1e+30  ;;  %v1855_v4 = vadd.f32 %v5069_v43, %v4966_v11 }
 0x356   : > { %v1983_v61 = vmax.f32 %v5340_v57, %v5344_v31  ;;  %v1950_v12 = vpop.permute.xlu1 %1949 }
 0x357   : > { %2075 = vrot.lane.b32.xlu0 %v5312_v41, %s3094_s4  ;;  %v5360_v20 = vsel %vm268_vm0, %v1950_v12, -1e+30  ;;  %v1856_v32 = vadd.f32 %v1855_v4, %v5076_v39  ;;  %v1538_v4 = vadd.f32 %v1537_v5, %v4691_v13  ;;  %v1555_v5 = vmul.f32 %v4704_v59, %v4691_v13 }
 0x358   : > { %v1952_v29 = vpop.permute.xlu0 %1951  ;;  %v1990_v51 = vmax.f32 %v5356_v23, %v5360_v20  ;;  %2091 = vrot.lane.b32.xlu1 %v5320_v22, %s3094_s4  ;;  %v1999_v13 = vmax.f32 %v4966_v11, %v1983_v61 }
 0x359   : > { %v5368_v36 = vsel %vm268_vm0, %v1952_v29, -1e+30  ;;  %v1871_v29 = vadd.f32 %v5088_v42, %v4992_v50  ;;  %v1857_v55 = vadd.f32 %v1856_v32, %v5201_v52  ;;  %v1554_v32 = vmul.f32 %v4799_v37, %v4795_v26 }
 0x35a   : > { %v1991_v24 = vmax.f32 %v5364_v21, %v5368_v36  ;;  %v1966_v46 = vpop.permute.xlu1 %1965 }
 0x35b   : > { %v5383_v54 = vsel %vm268_vm0, %v1966_v46, -1e+30  ;;  %v1858_v49 = vadd.f32 %v1857_v55, %v5245_v28 }
 0x35c   : > { %v1998_v48 = vmax.f32 %v5379_v0, %v5383_v54 }
 0x35d   : > { %v1890_v60 = vpop.permute.xlu0 %1889 }
 0x35e   : > { %v1892_v63 = vpop.permute.xlu1 %1891  ;;  %v5399_v45 = vsel %vm277_vm1, %v1890_v60, -1e+30  ;;  %v1553_v60 = vmul.f32 %v4773_v8, %v4780_v34  ;;  %v1872_v8 = vadd.f32 %v1871_v29, %v5098_v9  ;;  %s6027_s23 = spop %2749 }
 0x35f   : > { %v5415_v46 = vsel %vm277_vm1, %v1892_v63, -1e+30  ;;  %s6029_s19 = spop %2751 }
 0x360   : > { %v1873_v25 = vadd.f32 %v1872_v8, %v5208_v18  ;;  %s1573_s27 = sadd.f32 1e-10, %s6029_s19 }
 0x361   : > { %v1906_v17 = vpop.permute.xlu0 %1905 }
 0x362   : > { %v1908_v14 = vpop.permute.xlu1 %1907  ;;  %v5426_v1 = vsel %vm277_vm1, %v1906_v17, -1e+30  ;;  %s1574_s4 = smul.f32 %s1573_s27, %s1573_s27 }
 0x363   : > { %v5440_v34 = vsel %vm277_vm1, %v1908_v14, -1e+30  ;;  %v1859_v14 = vadd.f32 %v1858_v49, %v5285_v47 }
 0x365   : > { %v1938_v40 = vpop.permute.xlu0 %1937  ;;  %v1860_v16 = vadd.f32 %v1859_v14, %v5312_v41 }
 0x366   : > { %v5403_v15 = vsel %vm268_vm0, %v1938_v40, -1e+30  ;;  %v1940_v12 = vpop.permute.xlu1 %1939 }
 0x367   : > { %v5419_v62 = vsel %vm268_vm0, %v1940_v12, -1e+30  ;;  %v1560_v12 = vadd.f32 %v1559_v27, %v1553_v60  ;;  %v1556_v60 = vmul.f32 %v4664_v56, %v4670_v38  ;;  %v1861_v49 = vadd.f32 %v1860_v16, %v4970_v6 }
 0x368   : > { %v2007_v16 = vmax.f32 %v4992_v50, %v1991_v24  ;;  %v2014_v24 = vmax.f32 %v5007_v10, %v1998_v48 }
 0x369   : > { %v1954_v7 = vpop.permute.xlu0 %1953  ;;  %v1561_v44 = vadd.f32 %v1560_v12, %v1554_v32 }
 0x36a   : > { %v5430_v2 = vsel %vm268_vm0, %v1954_v7, -1e+30  ;;  %v1956_v33 = vpop.permute.xlu1 %1955  ;;  %v1874_v7 = vadd.f32 %v1873_v25, %v5252_v3 }
 0x36b   : > { %v5444_v40 = vsel %vm268_vm0, %v1956_v33, -1e+30  ;;  %v1539_v33 = vadd.f32 %v1538_v4, %v4670_v38  ;;  %v1562_v27 = vadd.f32 %v1561_v44, %v1555_v5  ;;  %v2006_v38 = vmax.f32 %v4970_v6, %v1990_v51 }
 0x36c   : > { %v1875_v8 = vadd.f32 %v1874_v7, %v5292_v30 }
 0x36d   : > { %v2016_v17 = vpop.permute.xlu0 %2015  ;;  %v1563_v61 = vadd.f32 %v1562_v27, %v1556_v60 }
 0x36e   : > { %v2030_v29 = vpop.permute.xlu1 %2029  ;;  %v2047_v26 = vsel %vm286_vm7, %v2016_v17, -1e+30  ;;  %v1876_v25 = vadd.f32 %v1875_v8, %v5320_v22 }
 0x36f   : > { %v2054_v17 = vsel %vm286_vm7, %v2030_v29, -1e+30 }
 0x370   : > { %v1877_v23 = vadd.f32 %v1876_v25, %v5007_v10  ;;  %v6322_v10 = vmax.f32 %v5440_v34, %v5444_v40 }
 0x371   : > { %v2032_v55 = vpop.permute.xlu0 %2031 }
 0x372   : > { %v2046_v63 = vpop.permute.xlu1 %2045  ;;  %v2055_v44 = vsel %vm286_vm7, %v2032_v55, -1e+30 }
 0x373   : > { %v2062_v51 = vsel %vm286_vm7, %v2046_v63, -1e+30 }
 0x375   : > { %v2064_v19 = vpop.permute.xlu0 %2063 }
 0x376   : > { %v2095_v37 = vsel %vm259_vm6, %v2064_v19, -1e+30  ;;  %1540 = vadd.xlane.f32.xlu0 %v1539_v33  ;;  %v2078_v4 = vpop.permute.xlu1 %2077 }
 0x377   : > { %v2111_v59 = vmax.f32 %v2047_v26, %v2095_v37  ;;  %v2102_v56 = vsel %vm259_vm6, %v2078_v4, -1e+30 }
 0x378   : > { %v2118_v31 = vmax.f32 %v2054_v17, %v2102_v56 }
 0x379   : > { %v5473_v19 = vmax.f32 %v1999_v13, %v2111_v59  ;;  %v2080_v32 = vpop.permute.xlu0 %2079 }
 0x37a   : > { %v2103_v57 = vsel %vm259_vm6, %v2080_v32, -1e+30  ;;  %1862 = vadd.xlane.f32.xlu0 %v1861_v49  ;;  %v5489_v29 = vmax.f32 %v2006_v38, %v2118_v31  ;;  %v2094_v20 = vpop.permute.xlu1 %2093 }
 0x37b   : > { %v2119_v12 = vmax.f32 %v2055_v44, %v2103_v57  ;;  %v2110_v7 = vsel %vm259_vm6, %v2094_v20, -1e+30  ;;  %v2143_v60 = vrot.slane %v5473_v19, 1  ;;  %v2191_v27 = vrot.slane %v5473_v19, 7 }
 0x37c   : > { %6312 = vst [vmem:[#allocation28_spill] sm:$0xff] %v5489_v29  ;;  %v6195_v55 = vrot.slane %v5489_v29, 1  ;;  %v6194_v21 = vrot.slane %v5489_v29, 7  ;;  %v6193_v36 = vrot.slane %v5489_v29, 2  ;;  %1564 = vadd.xlane.f32.xlu1 %v1563_v61  ;;  %v2126_v63 = vmax.f32 %v2062_v51, %v2110_v7 }
 0x37d   : > { %v1894_v14 = vpop.permute.xlu0 %1893  ;;  %v5496_v33 = vmax.f32 %v2007_v16, %v2119_v12  ;;  %v6191_v49 = vrot.slane %v5489_v29, 6  ;;  %v2319_v38 = vrot.slane %v5473_v19, 6 }
 0x37e   : > { %1878 = vadd.xlane.f32.xlu0 %v1877_v23  ;;  %v1910_v37 = vpop.permute.xlu1 %1909  ;;  %v5510_v13 = vmax.f32 %v2014_v24, %v2126_v63  ;;  %v5542_v17 = vsel %vm277_vm1, %v1894_v14, -1e+30  ;;  %v2271_v14 = vrot.slane %v5473_v19, 2  ;;  %v6316_v63 = vmax.f32 %v5415_v46, %v5419_v62 }
 0x37f   : > { %v6200_v5 = vrot.slane %v5496_v33, 1  ;;  %v6199_v8 = vrot.slane %v5496_v33, 7  ;;  %v6198_v26 = vrot.slane %v5496_v33, 2  ;;  %v6197_v25 = vrot.slane %v5496_v33, 6 }
 0x380   : > { %6313 = vst [vmem:[#allocation31_spill] sm:$0xff] %v5510_v13  ;;  %v6190_v32 = vrot.slane %v5510_v13, 1  ;;  %v6189_v56 = vrot.slane %v5510_v13, 7  ;;  %v6196_v57 = vrot.slane %v5510_v13, 2  ;;  %v6192_v31 = vrot.slane %v5510_v13, 6 }
 0x381   : > { %v1942_v59 = vpop.permute.xlu0 %1941  ;;  %v2214_v0 = vsel %vm683_vm3, %v6194_v21, %v6199_v8  ;;  %v5529_v48 = vsel %vm634_vm2, %v6195_v55, %v6200_v5  ;;  %v5537_v4 = vsel %vm1196_vm9, %v6193_v36, %v6198_v26  ;;  %v5565_v20 = vsel %vm1245_vm8, %v6191_v49, %v6197_v25 }
 0x382   : > { %v5521_v54 = vsel %vm268_vm0, %v1942_v59, -1e+30  ;;  %v1958_v44 = vpop.permute.xlu1 %1957  ;;  %v2222_v16 = vsel %vm683_vm3, %v6189_v56, %v2191_v27  ;;  %v5571_v51 = vsel %vm634_vm2, %v6190_v32, %v2143_v60  ;;  %v2350_v7 = vsel %vm1245_vm8, %v6192_v31, %v2319_v38 }
 0x383   : > { %v5557_v23 = vsel %vm268_vm0, %v1958_v44, -1e+30  ;;  %v5580_v24 = vsel %vm277_vm1, %v1910_v37, -1e+30  ;;  %v5588_v44 = vsel %vm1196_vm9, %v6196_v57, %v2271_v14  ;;  %v6315_v36 = vmax.f32 %v5399_v45, %v5403_v15 }
 0x384   : > { %6314 = vst [vmem:[#allocation30_spill] sm:$0xff] %v5588_v44  ;;  %v2001_v57 = vmax.f32 %v5076_v39, %v6316_v63  ;;  %v6317_v25 = vmax.f32 %v5426_v1, %v5430_v2  ;;  %v2231_v15 = vsel %vm260_vm4, %v2214_v0, -1e+30 }
 0x385   : > { %v2018_v12 = vpop.permute.xlu0 %2017  ;;  %v2000_v21 = vmax.f32 %v5069_v43, %v6315_v36 }
 0x386   : > { %v2020_v59 = vpop.permute.xlu1 %2019  ;;  %v2048_v31 = vsel %vm286_vm7, %v2018_v12, -1e+30  ;;  %v2008_v12 = vmax.f32 %v5088_v42, %v6317_v25 }
 0x389   : > { %v2034_v56 = vpop.permute.xlu0 %2033 }
 0x38a   : > { %v2036_v32 = vpop.permute.xlu1 %2035  ;;  %v2056_v46 = vsel %vm286_vm7, %v2034_v56, -1e+30 }
 0x38d   : > { %v2066_v49 = vpop.permute.xlu0 %2065 }
 0x38e   : > { %v2096_v37 = vsel %vm259_vm6, %v2066_v49, -1e+30  ;;  %v2068_v61 = vpop.permute.xlu1 %2067  ;;  %v2049_v49 = vsel %vm286_vm7, %v2020_v59, -1e+30 }
 0x38f   : > { %v2112_v55 = vmax.f32 %v2048_v31, %v2096_v37  ;;  %v2097_v45 = vsel %vm259_vm6, %v2068_v61, -1e+30 }
 0x390   : > { %v2113_v1 = vmax.f32 %v2049_v49, %v2097_v45 }
 0x391   : > { %v2128_v26 = vmax.f32 %v2000_v21, %v2112_v55  ;;  %v2082_v8 = vpop.permute.xlu0 %2081  ;;  %v2223_v55 = vsel %vm260_vm4, %v2222_v16, -1e+30  ;;  %v2351_v21 = vsel %vm251_vm10, %v2350_v7, -1e+30 }
 0x392   : > { %v2104_v62 = vsel %vm259_vm6, %v2082_v8, -1e+30  ;;  %v5620_v63 = vmax.f32 %v2001_v57, %v2113_v1  ;;  %v2084_v0 = vpop.permute.xlu1 %2083 }
 0x393   : > { %v2144_v2 = vrot.slane %v2128_v26, 1  ;;  %v2192_v36 = vrot.slane %v2128_v26, 7  ;;  %v2272_v25 = vrot.slane %v2128_v26, 2  ;;  %v2320_v31 = vrot.slane %v2128_v26, 6 }
 0x394   : > { %v2120_v61 = vmax.f32 %v2056_v46, %v2104_v62  ;;  %v6205_v57 = vrot.slane %v5620_v63, 1  ;;  %v2057_v46 = vsel %vm286_vm7, %v2036_v32, -1e+30  ;;  %v6204_v62 = vrot.slane %v5620_v63, 6 }
 0x395   : > { %v2173_v56 = vsel %vm634_vm2, %v2143_v60, %v2144_v2  ;;  %v2221_v8 = vsel %vm683_vm3, %v2191_v27, %v2192_v36  ;;  %v2301_v59 = vsel %vm1196_vm9, %v2271_v14, %v2272_v25  ;;  %v2349_v37 = vsel %vm1245_vm8, %v2319_v38, %v2320_v31  ;;  %v5630_v16 = vpop.permute.xlu0 %1895 }
 0x396   : > { %v2239_v49 = vmax.f32 %v2173_v56, %v2223_v55  ;;  %v2367_v7 = vmax.f32 %v2301_v59, %v2351_v21  ;;  %v2136_v45 = vmax.f32 %v2008_v12, %v2120_v61  ;;  %v6202_v60 = vrot.slane %v5620_v63, 7  ;;  %v5638_v6 = vpop.permute.xlu1 %1911 }
 0x397   : > { %v6203_v27 = vrot.slane %v5620_v63, 2  ;;  %v2172_v12 = vsel %vm634_vm2, %v2144_v2, %v6205_v57  ;;  %v5658_v21 = vsel %vm1245_vm8, %v2320_v31, %v6204_v62  ;;  %v6318_v2 = vrot.slane %v5496_v33, 1 }
 0x398   : > { %v2152_v14 = vrot.slane %v2136_v45, 1  ;;  %v2200_v1 = vrot.slane %v2136_v45, 7  ;;  %v2280_v5 = vrot.slane %v2136_v45, 2  ;;  %v2328_v38 = vrot.slane %v2136_v45, 6 }
 0x399   : > { %v5648_v32 = vsel %vm683_vm3, %v2192_v36, %v6202_v60  ;;  %v2300_v55 = vsel %vm1196_vm9, %v2272_v25, %v6203_v27  ;;  %v1944_v61 = vpop.permute.xlu0 %1943  ;;  %v6319_v36 = vrot.slane %v5496_v33, 7  ;;  %v6320_v60 = vrot.slane %v5496_v33, 2 }
 0x39a   : > { %v2165_v56 = vsel %vm634_vm2, %v6318_v2, %v2152_v14  ;;  %v6321_v27 = vrot.slane %v5496_v33, 6  ;;  %v2240_v57 = vmax.f32 %v2172_v12, %v2221_v8  ;;  %v2368_v44 = vmax.f32 %v2300_v55, %v2349_v37  ;;  %v5682_v29 = vpop.permute.xlu1 %1959 }
 0x39b   : > { %v2213_v59 = vsel %vm683_vm3, %v6319_v36, %v2200_v1  ;;  %v2293_v25 = vsel %vm1196_vm9, %v6320_v60, %v2280_v5  ;;  %v2247_v62 = vmax.f32 %v2165_v56, %v2231_v15  ;;  %v2105_v2 = vsel %vm259_vm6, %v2084_v0, -1e+30 }
 0x39c   : > { %v2341_v31 = vsel %vm1245_vm8, %v6321_v27, %v2328_v38  ;;  %v2009_v36 = vmax.f32 %v5098_v9, %v6322_v10  ;;  %v2121_v13 = vmax.f32 %v2057_v46, %v2105_v2  ;;  %v2255_v60 = vmax.f32 %v5473_v19, %v2239_v49 }
 0x39d   : > { %v2022_v22 = vpop.permute.xlu0 %2021  ;;  %v2256_v41 = vmax.f32 %v2128_v26, %v2240_v57  ;;  %v2263_v27 = vmax.f32 %v5496_v33, %v2247_v62  ;;  %v2359_v0 = vsel %vm251_vm10, %v5565_v20, -1e+30 }
 0x39e   : > { %v5686_v15 = vmax.f32 %v2009_v36, %v2121_v13  ;;  %v2383_v8 = vmax.f32 %v2255_v60, %v2367_v7  ;;  %v2375_v34 = vmax.f32 %v2293_v25, %v2359_v0  ;;  %v2038_v26 = vpop.permute.xlu1 %2037  ;;  %v2050_v33 = vsel %vm286_vm7, %v2022_v22, -1e+30 }
 0x39f   : > { %v2384_v37 = vmax.f32 %v2256_v41, %v2368_v44 }
 0x3a0   : > { %v2153_v10 = vrot.slane %v5686_v15, 1  ;;  %v2201_v40 = vrot.slane %v5686_v15, 7  ;;  %v2281_v46 = vrot.slane %v5686_v15, 2  ;;  %v2329_v19 = vrot.slane %v5686_v15, 6 }
 0x3a1   : > { %v2070_v13 = vpop.permute.xlu0 %2069  ;;  %v2428_v49 = vmul.f32 %v2383_v8, %v4992_v50  ;;  %v2429_v20 = vmul.f32 %v2384_v37, %v5088_v42  ;;  %v6323_v42 = vmax.f32 %v5542_v17, %v5521_v54  ;;  %v2391_v56 = vmax.f32 %v2263_v27, %v2375_v34 }
 0x3a2   : > { %v2164_v41 = vsel %vm634_vm2, %v2152_v14, %v2153_v10  ;;  %v2212_v44 = vsel %vm683_vm3, %v2200_v1, %v2201_v40  ;;  %v2292_v7 = vsel %vm1196_vm9, %v2280_v5, %v2281_v46  ;;  %v2340_v57 = vsel %vm1245_vm8, %v2328_v38, %v2329_v19  ;;  %v2086_v1 = vpop.permute.xlu1 %2085 }
 0x3a3   : > { %v2248_v62 = vmax.f32 %v2164_v41, %v2213_v59  ;;  %v2376_v12 = vmax.f32 %v2292_v7, %v2341_v31  ;;  %v2098_v22 = vsel %vm259_vm6, %v2070_v13, -1e+30  ;;  %v5709_v50 = vadd.f32 %v2429_v20, %v2428_v49 }
 0x3a4   : > { %v2002_v14 = vmax.f32 %v5201_v52, %v6323_v42  ;;  %v2114_v55 = vmax.f32 %v2050_v33, %v2098_v22  ;;  %v2058_v5 = vsel %vm286_vm7, %v2038_v26, -1e+30  ;;  %v2106_v38 = vsel %vm259_vm6, %v2086_v1, -1e+30 }
 0x3a5   : > { %v5717_v25 = vpop.permute.xlu0 %1897  ;;  %v2264_v59 = vmax.f32 %v2136_v45, %v2248_v62  ;;  %v2122_v2 = vmax.f32 %v2058_v5, %v2106_v38  ;;  %v6324_v54 = vmax.f32 %v5580_v24, %v5557_v23  ;;  %v1971_v45 = vsel %vm268_vm0, %v1944_v61, -1e+30 }
 0x3a6   : > { %v5721_v31 = vmax.f32 %v2002_v14, %v2114_v55  ;;  %v5731_v37 = vpop.permute.xlu1 %1913  ;;  %v6325_v23 = vrot.slane %v5620_v63, 1  ;;  %v6326_v33 = vrot.slane %v5620_v63, 7  ;;  %v6327_v49 = vrot.slane %v5620_v63, 2 }
 0x3a7   : > { %v2010_v17 = vmax.f32 %v5208_v18, %v6324_v54  ;;  %v2392_v36 = vmax.f32 %v2264_v59, %v2376_v12  ;;  %v1923_v22 = vsel %vm277_vm1, %v5630_v16, -1e+30  ;;  %v6328_v55 = vrot.slane %v5620_v63, 6 }
 0x3a8   : > { %v2146_v60 = vrot.slane %v5721_v31, 1  ;;  %v2194_v27 = vrot.slane %v5721_v31, 7  ;;  %v2274_v0 = vrot.slane %v5721_v31, 2  ;;  %v2322_v8 = vrot.slane %v5721_v31, 6 }
 0x3a9   : > { %v5735_v34 = vmax.f32 %v2010_v17, %v2122_v2  ;;  %v1946_v26 = vpop.permute.xlu0 %1945  ;;  %v2400_v20 = vmul.f32 %v2392_v36, %v5069_v43  ;;  %v2399_v59 = vmul.f32 %v2391_v56, %v4966_v11  ;;  %v1987_v2 = vmax.f32 %v1923_v22, %v1971_v45 }
 0x3aa   : > { %v2171_v24 = vsel %vm634_vm2, %v6325_v23, %v2146_v60  ;;  %v5747_v13 = vsel %vm683_vm3, %v6326_v33, %v2194_v27  ;;  %v2299_v61 = vsel %vm1196_vm9, %v6327_v49, %v2274_v0  ;;  %v1962_v14 = vpop.permute.xlu1 %1961  ;;  %v2347_v43 = vsel %vm1245_vm8, %v6328_v55, %v2322_v8 }
 0x3ab   : > { %v2241_v41 = vmax.f32 %v2171_v24, %v5648_v32  ;;  %v2154_v7 = vrot.slane %v5735_v34, 1  ;;  %v2202_v62 = vrot.slane %v5735_v34, 7  ;;  %v2282_v12 = vrot.slane %v5735_v34, 2 }
 0x3ac   : > { %v2330_v42 = vrot.slane %v5735_v34, 6  ;;  %v2369_v32 = vmax.f32 %v2299_v61, %v5658_v21  ;;  %v1979_v54 = vsel %vm268_vm0, %v5682_v29, -1e+30  ;;  %v2407_v36 = vadd.f32 %v2400_v20, %v2399_v59 }
 0x3ad   : > { %v2163_v1 = vsel %vm634_vm2, %v2153_v10, %v2154_v7  ;;  %v2211_v16 = vsel %vm683_vm3, %v2201_v40, %v2202_v62  ;;  %v2291_v5 = vsel %vm1196_vm9, %v2281_v46, %v2282_v12  ;;  %v2024_v38 = vpop.permute.xlu0 %2023  ;;  %v2257_v17 = vmax.f32 %v5620_v63, %v2241_v41 }
 0x3ae   : > { %v2249_v21 = vmax.f32 %v2163_v1, %v2212_v44  ;;  %v2339_v10 = vsel %vm1245_vm8, %v2329_v19, %v2330_v42  ;;  %v2377_v40 = vmax.f32 %v2291_v5, %v2340_v57  ;;  %v2040_v23 = vpop.permute.xlu1 %2039  ;;  %v1931_v11 = vsel %vm277_vm1, %v5638_v6, -1e+30 }
 0x3af   : > { %v2385_v45 = vmax.f32 %v2257_v17, %v2369_v32  ;;  %v1995_v29 = vmax.f32 %v1931_v11, %v1979_v54  ;;  %v2051_v63 = vsel %vm286_vm7, %v2024_v38, -1e+30  ;;  %v2003_v19 = vmax.f32 %v5245_v28, %v1987_v2 }
 0x3b0   : > { %v2265_v46 = vmax.f32 %v5686_v15, %v2249_v21  ;;  %v2059_v6 = vsel %vm286_vm7, %v2040_v23, -1e+30  ;;  %v1972_v59 = vsel %vm268_vm0, %v1946_v26, -1e+30  ;;  %v1980_v11 = vsel %vm268_vm0, %v1962_v14, -1e+30 }
 0x3b1   : > { %v2072_v56 = vpop.permute.xlu0 %2071  ;;  %v2430_v33 = vmul.f32 %v2385_v45, %v5098_v9  ;;  %v2011_v55 = vmax.f32 %v5252_v3, %v1995_v29  ;;  %v1932_v45 = vsel %vm277_vm1, %v5731_v37, -1e+30 }
 0x3b2   : > { %v2099_v44 = vsel %vm259_vm6, %v2072_v56, -1e+30  ;;  %v2393_v24 = vmax.f32 %v2265_v46, %v2377_v40  ;;  %v2088_v15 = vpop.permute.xlu1 %2087  ;;  %v1924_v40 = vsel %vm277_vm1, %v5717_v25, -1e+30 }
 0x3b3   : > { %v2115_v57 = vmax.f32 %v2051_v63, %v2099_v44  ;;  %v2107_v41 = vsel %vm259_vm6, %v2088_v15, -1e+30  ;;  %v2437_v22 = vadd.f32 %v5709_v50, %v2430_v33  ;;  %v1988_v23 = vmax.f32 %v1924_v40, %v1972_v59 }
 0x3b4   : > { %v2401_v49 = vmul.f32 %v2393_v24, %v5076_v39  ;;  %v2123_v32 = vmax.f32 %v2059_v6, %v2107_v41  ;;  %v1996_v44 = vmax.f32 %v1932_v45, %v1980_v11  ;;  %v5889_v11 = vsel %vm276_vm5, %v5571_v51, -1e+30 }
 0x3b5   : > { %v5797_v61 = vmax.f32 %v2003_v19, %v2115_v57  ;;  %v1900_v20 = vpop.permute.xlu0 %1899  ;;  %v2004_v63 = vmax.f32 %v5285_v47, %v1988_v23  ;;  %v5873_v23 = vsel %vm276_vm5, %v5529_v48, -1e+30 }
 0x3b6   : > { %v2408_v1 = vadd.f32 %v2407_v36, %v2401_v49  ;;  %v5807_v39 = vmax.f32 %v2011_v55, %v2123_v32  ;;  %v1916_v38 = vpop.permute.xlu1 %1915 }
 0x3b7   : > { %v2147_v9 = vrot.slane %v5797_v61, 1  ;;  %v2275_v5 = vrot.slane %v5797_v61, 2  ;;  %v2195_v57 = vrot.slane %v5797_v61, 7  ;;  %v2323_v33 = vrot.slane %v5797_v61, 6 }
 0x3b8   : > { %v2155_v21 = vrot.slane %v5807_v39, 1  ;;  %v2283_v17 = vrot.slane %v5807_v39, 2  ;;  %v1933_v6 = vsel %vm277_vm1, %v1916_v38, -1e+30  ;;  %v2331_v32 = vrot.slane %v5807_v39, 6 }
 0x3b9   : > { %v2170_v2 = vsel %vm634_vm2, %v2146_v60, %v2147_v9  ;;  %v1948_v50 = vpop.permute.xlu0 %1947  ;;  %v2298_v54 = vsel %vm1196_vm9, %v2274_v0, %v2275_v5 }
 0x3ba   : > { %v2242_v26 = vmax.f32 %v2170_v2, %v5747_v13  ;;  %v2370_v36 = vmax.f32 %v2298_v54, %v2347_v43  ;;  %v2162_v60 = vsel %vm634_vm2, %v2154_v7, %v2155_v21  ;;  %v1964_v46 = vpop.permute.xlu1 %1963  ;;  %v2290_v0 = vsel %vm1196_vm9, %v2282_v12, %v2283_v17 }
 0x3bb   : > { %v2250_v13 = vmax.f32 %v2162_v60, %v2211_v16  ;;  %v2378_v43 = vmax.f32 %v2290_v0, %v2339_v10  ;;  %v1925_v12 = vsel %vm277_vm1, %v1900_v20, -1e+30  ;;  %v1973_v14 = vsel %vm268_vm0, %v1948_v50, -1e+30 }
 0x3bc   : > { %v2258_v25 = vmax.f32 %v5721_v31, %v2242_v26  ;;  %v1981_v16 = vsel %vm268_vm0, %v1964_v46, -1e+30  ;;  %v1989_v59 = vmax.f32 %v1925_v12, %v1973_v14  ;;  %v5878_v60 = vsel %vm285_vm11, %v5537_v4, -1e+30 }
 0x3bd   : > { %v2026_v56 = vpop.permute.xlu0 %2025  ;;  %v2266_v7 = vmax.f32 %v5735_v34, %v2250_v13  ;;  %v1997_v2 = vmax.f32 %v1933_v6, %v1981_v16  ;;  %v2346_v4 = vsel %vm1245_vm8, %v2322_v8, %v2323_v33  ;;  %v2338_v51 = vsel %vm1245_vm8, %v2330_v42, %v2331_v32 }
 0x3be   : > { %v2386_v29 = vmax.f32 %v2258_v25, %v2370_v36  ;;  %v2042_v24 = vpop.permute.xlu1 %2041  ;;  %v2052_v15 = vsel %vm286_vm7, %v2026_v56, -1e+30 }
 0x3bf   : > { %v2394_v37 = vmax.f32 %v2266_v7, %v2378_v43  ;;  %v2060_v40 = vsel %vm286_vm7, %v2042_v24, -1e+30  ;;  %v6330_v43 = vld [vmem:[#allocation26_spill] sm:$0xff] }
 0x3c0   : > { %v2431_v19 = vmul.f32 %v2386_v29, %v5208_v18  ;;  %v2203_v18 = vrot.slane %v5807_v39, 7  ;;  %v2013_v45 = vmax.f32 %v6330_v43, %v1997_v2 }
 0x3c1   : > { %v2074_v10 = vpop.permute.xlu0 %2073  ;;  %v2402_v55 = vmul.f32 %v2394_v37, %v5201_v52  ;;  %v2012_v52 = vmax.f32 %v5292_v30, %v1996_v44 }
 0x3c2   : > { %v2100_v49 = vsel %vm259_vm6, %v2074_v10, -1e+30  ;;  %v5856_v41 = vadd.f32 %v2437_v22, %v2431_v19  ;;  %v2090_v50 = vpop.permute.xlu1 %2089  ;;  %v2210_v25 = vsel %vm683_vm3, %v2202_v62, %v2203_v18 }
 0x3c3   : > { %v2116_v20 = vmax.f32 %v2052_v15, %v2100_v49  ;;  %v2108_v38 = vsel %vm259_vm6, %v2090_v50, -1e+30  ;;  %v5867_v22 = vadd.f32 %v2408_v1, %v2402_v55  ;;  %v2218_v1 = vsel %vm683_vm3, %v2194_v27, %v2195_v57  ;;  %v6329_v27 = vld [vmem:[#allocation29_spill] sm:$0xff] }
 0x3c4   : > { %v2124_v36 = vmax.f32 %v2060_v40, %v2108_v38  ;;  %v2005_v13 = vmax.f32 %v6329_v27, %v1989_v59 }
 0x3c5   : > { %v5861_v54 = vmax.f32 %v2004_v63, %v2116_v20  ;;  %v2028_v26 = vpop.permute.xlu0 %2027 }
 0x3c6   : > { %v5891_v48 = vmax.f32 %v2012_v52, %v2124_v36  ;;  %v2044_v56 = vpop.permute.xlu1 %2043  ;;  %v2053_v31 = vsel %vm286_vm7, %v2028_v26, -1e+30 }
 0x3c7   : > { %v2148_v46 = vrot.slane %v5861_v54, 1  ;;  %v2276_v0 = vrot.slane %v5861_v54, 2  ;;  %v2196_v29 = vrot.slane %v5861_v54, 7  ;;  %v2324_v63 = vrot.slane %v5861_v54, 6 }
 0x3c8   : > { %v2156_v34 = vrot.slane %v5891_v48, 1  ;;  %v2284_v7 = vrot.slane %v5891_v48, 2  ;;  %v2061_v12 = vsel %vm286_vm7, %v2044_v56, -1e+30  ;;  %v2204_v24 = vrot.slane %v5891_v48, 7 }
 0x3c9   : > { %v2076_v8 = vpop.permute.xlu0 %2075  ;;  %v2169_v62 = vsel %vm634_vm2, %v2147_v9, %v2148_v46  ;;  %v2297_v42 = vsel %vm1196_vm9, %v2275_v5, %v2276_v0  ;;  %v2332_v6 = vrot.slane %v5891_v48, 6  ;;  %v2345_v59 = vsel %vm1245_vm8, %v2323_v33, %v2324_v63 }
 0x3ca   : > { %v2101_v44 = vsel %vm259_vm6, %v2076_v8, -1e+30  ;;  %v2243_v9 = vmax.f32 %v2169_v62, %v2218_v1  ;;  %v2092_v16 = vpop.permute.xlu1 %2091  ;;  %v2161_v10 = vsel %vm634_vm2, %v2155_v21, %v2156_v34  ;;  %v2289_v5 = vsel %vm1196_vm9, %v2283_v17, %v2284_v7 }
 0x3cb   : > { %v2117_v14 = vmax.f32 %v2053_v31, %v2101_v44  ;;  %v2109_v19 = vsel %vm259_vm6, %v2092_v16, -1e+30  ;;  %v2371_v15 = vmax.f32 %v2297_v42, %v2346_v4  ;;  %v2251_v49 = vmax.f32 %v2161_v10, %v2210_v25  ;;  %v6331_v25 = vld [vmem:[#allocation28_spill] sm:$0xff] }
 0x3cc   : > { %v2259_v37 = vmax.f32 %v5797_v61, %v2243_v9  ;;  %v2125_v55 = vmax.f32 %v2061_v12, %v2109_v19  ;;  %v2217_v21 = vsel %vm683_vm3, %v2195_v57, %v2196_v29  ;;  %v2379_v50 = vmax.f32 %v2289_v5, %v2338_v51 }
 0x3cd   : > { %v2133_v20 = vmax.f32 %v2005_v13, %v2117_v14  ;;  %v2267_v17 = vmax.f32 %v5807_v39, %v2251_v49  ;;  %v2209_v36 = vsel %vm683_vm3, %v2203_v18, %v2204_v24  ;;  %v6332_v33 = vrot.slane %v6331_v25, 1 }
 0x3ce   : > { %v2387_v2 = vmax.f32 %v2259_v37, %v2371_v15  ;;  %v2141_v61 = vmax.f32 %v2013_v45, %v2125_v55  ;;  %v6333_v45 = vrot.slane %v6331_v25, 7  ;;  %v6334_v31 = vrot.slane %v6331_v25, 2 }
 0x3cf   : > { %v2149_v35 = vrot.slane %v2133_v20, 1  ;;  %v2197_v40 = vrot.slane %v2133_v20, 7  ;;  %v2277_v26 = vrot.slane %v2133_v20, 2  ;;  %v2325_v38 = vrot.slane %v2133_v20, 6 }
 0x3d0   : > { %v2432_v52 = vmul.f32 %v2387_v2, %v5252_v3  ;;  %v2395_v1 = vmax.f32 %v2267_v17, %v2379_v50  ;;  %v2157_v56 = vrot.slane %v2141_v61, 1  ;;  %v2205_v57 = vrot.slane %v2141_v61, 7 }
 0x3d1   : > { %v2285_v4 = vrot.slane %v2141_v61, 2  ;;  %v2167_v13 = vsel %vm634_vm2, %v2149_v35, %v6332_v33  ;;  %v2168_v51 = vsel %vm634_vm2, %v2148_v46, %v2149_v35  ;;  %v2215_v3 = vsel %vm683_vm3, %v2197_v40, %v6333_v45 }
 0x3d2   : > { %v2216_v18 = vsel %vm683_vm3, %v2196_v29, %v2197_v40  ;;  %v2295_v8 = vsel %vm1196_vm9, %v2277_v26, %v6334_v31  ;;  %v2244_v62 = vmax.f32 %v2168_v51, %v2217_v21  ;;  %v2246_v44 = vmax.f32 %v5873_v23, %v2215_v3 }
 0x3d3   : > { %v2245_v42 = vmax.f32 %v2167_v13, %v2216_v18  ;;  %v2296_v46 = vsel %vm1196_vm9, %v2276_v0, %v2277_v26  ;;  %v6335_v12 = vrot.slane %v6331_v25, 6  ;;  %v2344_v29 = vsel %vm1245_vm8, %v2324_v63, %v2325_v38  ;;  %v6336_v0 = vld [vmem:[#allocation31_spill] sm:$0xff] }
 0x3d4   : > { %v2372_v14 = vmax.f32 %v2296_v46, %v2345_v59  ;;  %v2439_v16 = vadd.f32 %v5856_v41, %v2432_v52  ;;  %v2260_v10 = vmax.f32 %v5861_v54, %v2244_v62  ;;  %v2262_v19 = vmax.f32 %v6331_v25, %v2246_v44  ;;  %v6341_v25 = vld [vmem:[#allocation30_spill] sm:$0xff]  ;;  %v6343_v62 = vld [vmem:[#allocation25_spill] sm:$0xff] }
 0x3d5   : > { %v2343_v9 = vsel %vm1245_vm8, %v2325_v38, %v6335_v12  ;;  %v2261_v5 = vmax.f32 %v2133_v20, %v2245_v42  ;;  %v2373_v23 = vmax.f32 %v2295_v8, %v2344_v29  ;;  %v6337_v15 = vrot.slane %v6336_v0, 1 }
 0x3d6   : > { %v2374_v37 = vmax.f32 %v5878_v60, %v2343_v9  ;;  %v2160_v55 = vsel %vm634_vm2, %v2156_v34, %v2157_v56  ;;  %v6338_v63 = vrot.slane %v6336_v0, 7  ;;  %v2388_v54 = vmax.f32 %v2260_v10, %v2372_v14 }
 0x3d7   : > { %v2159_v49 = vsel %vm634_vm2, %v2157_v56, %v6337_v15  ;;  %v2389_v20 = vmax.f32 %v2261_v5, %v2373_v23  ;;  %v2208_v21 = vsel %vm683_vm3, %v2204_v24, %v2205_v57  ;;  %v2252_v59 = vmax.f32 %v2160_v55, %v2209_v36 }
 0x3d8   : > { %v2207_v41 = vsel %vm683_vm3, %v2205_v57, %v6338_v63  ;;  %v2390_v60 = vmax.f32 %v2262_v19, %v2374_v37  ;;  %v2253_v2 = vmax.f32 %v2159_v49, %v2208_v21  ;;  %v2433_v50 = vmul.f32 %v2388_v54, %v5292_v30  ;;  %v6340_v57 = vld [vmem:[#allocation27_spill] sm:$0xff] }
 0x3d9   : > { %v2254_v17 = vmax.f32 %v5889_v11, %v2207_v41  ;;  %v2268_v35 = vmax.f32 %v5891_v48, %v2252_v59  ;;  %v2288_v34 = vsel %vm1196_vm9, %v2284_v7, %v2285_v4  ;;  %v2337_v24 = vsel %vm1245_vm8, %v2331_v32, %v2332_v6 }
 0x3da   : > { %v2434_v40 = vmul.f32 %v2389_v20, %v6330_v43  ;;  %v6339_v30 = vrot.slane %v6336_v0, 2  ;;  %v2333_v38 = vrot.slane %v2141_v61, 6  ;;  %v2440_v52 = vadd.f32 %v2439_v16, %v2433_v50 }
 0x3db   : > { %v2270_v11 = vmax.f32 %v6336_v0, %v2254_v17  ;;  %v2269_v36 = vmax.f32 %v2141_v61, %v2253_v2  ;;  %v2380_v7 = vmax.f32 %v2288_v34, %v2337_v24  ;;  %v2403_v56 = vmul.f32 %v2395_v1, %v5245_v28 }
 0x3dc   : > { %v2287_v26 = vsel %vm1196_vm9, %v2285_v4, %v6339_v30  ;;  %v2435_v39 = vmul.f32 %v2390_v60, %v6340_v57  ;;  %v2318_v32 = vsel %vm285_vm11, %v6341_v25, -1e+30  ;;  %v6342_v43 = vrot.slane %v6336_v0, 6 }
 0x3dd   : > { %v2336_v4 = vsel %vm1245_vm8, %v2332_v6, %v2333_v38  ;;  %v2441_v61 = vadd.f32 %v2440_v52, %v2434_v40  ;;  %v2396_v28 = vmax.f32 %v2268_v35, %v2380_v7  ;;  %v2410_v1 = vadd.f32 %v5867_v22, %v2403_v56 }
 0x3de   : > { %v2335_v33 = vsel %vm1245_vm8, %v2333_v38, %v6342_v43  ;;  %v2381_v13 = vmax.f32 %v2287_v26, %v2336_v4  ;;  %v1575_v29 = vstv %s1574_s4 }
 0x3df   : > { %v2382_v51 = vmax.f32 %v2318_v32, %v2335_v33  ;;  %v2442_v45 = vadd.f32 %v2441_v61, %v2435_v39  ;;  %v2404_v18 = vmul.f32 %v2396_v28, %v5285_v47  ;;  %2911 = vrcp.f32 %v1575_v29 }
 0x3e0   : > { %v2397_v3 = vmax.f32 %v2269_v36, %v2381_v13 }
 0x3e1   : > { %v2398_v53 = vmax.f32 %v2270_v11, %v2382_v51  ;;  %2443 = vadd.xlane.f32.xlu0 %v2442_v45  ;;  %v2411_v8 = vadd.f32 %v2410_v1, %v2404_v18 }
 0x3e2   : > { %v2405_v31 = vmul.f32 %v2397_v3, %v6329_v27 }
 0x3e3   : > { %v2406_v48 = vmul.f32 %v2398_v53, %v6343_v62 }
 0x3e4   : > { %v2412_v42 = vadd.f32 %v2411_v8, %v2405_v31 }
 0x3e6   : > { %v2413_v58 = vadd.f32 %v2412_v42, %v2406_v48 }
 0x3e8   : > { %2414 = vadd.xlane.f32.xlu1 %v2413_v58 }
 0x3e9   : > { %v2912_v2 = vpop.eup %2911 }
 0x403   : > { %v1541_v22 = vpop.xlane.xlu0 %1540 }
 0x404   : > { %v1542_v6 = vrot.slane %v1541_v22, 4 }
 0x406   : > { %v1543_v44 = vadd.f32 %v1542_v6, %v1541_v22 }
 0x407   : > { %v1863_v47 = vpop.xlane.xlu0 %1862 }
 0x408   : > { %v1544_v46 = vrot.slane %v1543_v44, 2  ;;  %v1864_v12 = vrot.slane %v1863_v47, 4 }
 0x409   : > { %v1565_v16 = vpop.xlane.xlu1 %1564 }
 0x40a   : > { %v1865_v27 = vadd.f32 %v1864_v12, %v1863_v47  ;;  %v1545_v9 = vadd.f32 %v1544_v46, %v1543_v44  ;;  %v1566_v19 = vrot.slane %v1565_v16, 4 }
 0x40b   : > { %v1879_v14 = vpop.xlane.xlu0 %1878 }
 0x40c   : > { %v1866_v10 = vrot.slane %v1865_v27, 2  ;;  %v1880_v5 = vrot.slane %v1879_v14, 4  ;;  %v1546_v23 = vrot.slane %v1545_v9, 1  ;;  %v1567_v0 = vadd.f32 %v1566_v19, %v1565_v16 }
 0x40e   : > { %v1881_v37 = vadd.f32 %v1880_v5, %v1879_v14  ;;  %v1547_v15 = vadd.f32 %v1546_v23, %v1545_v9  ;;  %v1568_v55 = vrot.slane %v1567_v0, 2  ;;  %v1867_v63 = vadd.f32 %v1866_v10, %v1865_v27 }
 0x410   : > { %v1882_v49 = vrot.slane %v1881_v37, 2  ;;  %2753 = vpush %v1547_v15  ;;  %v1569_v41 = vadd.f32 %v1568_v55, %v1567_v0  ;;  %v1868_v21 = vrot.slane %v1867_v63, 1 }
 0x412   : > { %v1883_v54 = vadd.f32 %v1882_v49, %v1881_v37  ;;  %v1570_v20 = vrot.slane %v1569_v41, 1  ;;  %v1869_v17 = vadd.f32 %v1868_v21, %v1867_v63 }
 0x414   : > { %v1884_v59 = vrot.slane %v1883_v54, 1  ;;  %v1571_v60 = vadd.f32 %v1570_v20, %v1569_v41 }
 0x416   : > { %2755 = vpush %v1571_v60  ;;  %v1885_v50 = vadd.f32 %v1884_v59, %v1883_v54 }
 0x417   : > { %2757 = vpush %v2912_v2 }
 0x418   : > { %2759 = vpush %v1869_v17 }
 0x419   : > { %2761 = vpush %v1885_v50 }
 0x441   : > { %s2754_s26 = spop %2753 }
 0x442   : > { %s1580_s10 = sadd.f32 %s2754_s26, %s6029_s19 }
 0x447   : > { %s2756_s7 = spop %2755 }
 0x448   : > { %s2758_s9 = spop %2757 }
 0x449   : > { %s1578_s17 = smul.f32 %s2758_s9, %s2756_s7  ;;  %s2760_s0 = spop %2759 }
 0x44a   : > { %s6033_s27 = smul.f32 %s2758_s9, %s1580_s10  ;;  %s2762_s1 = spop %2761 }
 0x44b   : > { %s6038_s4 = sadd.f32 %s1578_s17, %s485_s29 }
 0x44c   : > { %s1582_s6 = sadd.f32 %s6033_s27, %s4858_s30 }
 0x44d   : > { %s2423_s21 = sadd.f32 1e-07, %s2760_s0 }
 0x44e   : > { %s2452_s14 = sadd.f32 1e-07, %s2762_s1 }
 0x44f   : > { %v2424_v40 = vstv %s2423_s21  ;;  %s2474_s29 = sadd.f32 1e-05, %s1582_s6  ;;  %s2660_s6 = sshll.u32 %s3265_s8, 3 }
 0x450   : > { %v2453_v38 = vstv %s2452_s14  ;;  %2913 = vrcp.f32 %v2424_v40  ;;  %s1516_s7 = sadd.f32 %s6027_s23, %s4683_s5  ;;  %s232_s12 = scalar_lea.vmem [#allocation7], %s2660_s6 }
 0x451   : > { %2915 = vrcp.f32 %v2453_v38  ;;  %v2475_v4 = vstv %s2474_s29  ;;  %s2472_s17 = sadd.f32 1e-05, %s6038_s4  ;;  %s2510_s5 = sshll.u32 %s232_s12, 4  ;;  %s6065_s5 = int_to_ptr.vmem [resolvable:$true] %s2510_s5 }
 0x452   : > { %s2467_s10 = ssub.f32 0.0, %s1516_s7  ;;  %s239_s7 = scalar_lea.vmem [#allocation8], %s2660_s6 }
 0x453   : > { %s2523_s4 = sshll.u32 %s239_s7, 4  ;;  %s6058_s4 = int_to_ptr.vmem [resolvable:$true] %s2523_s4 }
 0x454   : > { %s2470_s9 = smul.f32 0.5, %s2467_s10 }
 0x456   : > { %s2471_s27 = smul.f32 6.1035156e-05, %s2470_s9 }
 0x45a   : > { %v2914_v32 = vpop.eup %2913 }
 0x45b   : > { %v2916_v33 = vpop.eup %2915 }
 0x46e   : > { %v2444_v35 = vpop.xlane.xlu0 %2443 }
 0x46f   : > { %v2445_v34 = vrot.slane %v2444_v35, 4 }
 0x471   : > { %v2446_v24 = vadd.f32 %v2445_v34, %v2444_v35 }
 0x473   : > { %v2447_v30 = vrot.slane %v2446_v24, 2 }
 0x475   : > { %v2415_v11 = vpop.xlane.xlu1 %2414  ;;  %v2448_v36 = vadd.f32 %v2447_v30, %v2446_v24 }
 0x476   : > { %v2416_v26 = vrot.slane %v2415_v11, 4 }
 0x477   : > { %v2449_v39 = vrot.slane %v2448_v36, 1 }
 0x478   : > { %v2417_v52 = vadd.f32 %v2416_v26, %v2415_v11 }
 0x479   : > { %v2450_v43 = vadd.f32 %v2449_v39, %v2448_v36 }
 0x47a   : > { %v2418_v7 = vrot.slane %v2417_v52, 2 }
 0x47c   : > { %v2419_v56 = vadd.f32 %v2418_v7, %v2417_v52 }
 0x47e   : > { %v2420_v57 = vrot.slane %v2419_v56, 1 }
 0x480   : > { %v2421_v25 = vadd.f32 %v2420_v57, %v2419_v56 }
 0x482   : > { %2763 = vpush %v2421_v25 }
 0x483   : > { %2765 = vpush %v2914_v32 }
 0x484   : > { %2767 = vpush %v2450_v43 }
 0x485   : > { %2769 = vpush %v2916_v33 }
 0x4b3   : > { %s2764_s0 = spop %2763 }
 0x4b4   : > { %s2766_s1 = spop %2765 }
 0x4b5   : > { %s2768_s14 = spop %2767  ;;  %s2427_s21 = smul.f32 %s2766_s1, %s2764_s0 }
 0x4b6   : > { %s2770_s22 = spop %2769  ;;  %s6344_s0 = smul.f32 %s5296_s20, %s5134_s11 }
 0x4b7   : > { %s2456_s28 = smul.f32 %s2770_s22, %s2768_s14 }
 0x4b8   : > { %s2457_s30 = smul.f32 2.0, %s2427_s21  ;;  %s1376_s1 = ssub.f32 1.0, %s6344_s0 }
 0x4b9   : > { %s2459_s19 = sadd.f32 %s2456_s28, %s2427_s21  ;;  %s2473_s14 = smul.f32 2.0, %s2472_s17 }
 0x4ba   : > { %s2458_s22 = smul.f32 %s2457_s30, %s2456_s28  ;;  %s6056_s28 = scalar_lea.hbm %s6132_s3, %s2680_s15 }
 0x4bb   : > { %s2460_s26 = sadd.f32 1e-07, %s2459_s19  ;;  %s2981_s17 = scalar_lea.vmem %s6058_s4, 128 }
 0x4bc   : > { %p2982_p13 = scmp.ne.s32.totalorder %s6058_s4, %s2981_s17  ;;  %s3095_s30 = smov [#allocation8]  }
 0x4bd   : > { %v2461_v61 = vstv %s2460_s26  ;;  %s2985_s6 = sshll.u32 %s3095_s30, 4  ;;  %s2986_s6 = int_to_ptr.vmem [resolvable:$false] %s2985_s6 }
 0x4be   : > { %2917 = vrcp.f32 %v2461_v61  ;;  %p2983_p11 = pnand %p2982_p13, %p6345_p1  ;;  %p2988_p5 = scmp.lt.s32.totalorder %s6058_s4, %s2986_s6 }
 0x4bf   : > { %2919 = vrcp.f32 %v2475_v4 }
 0x4c0   : > { %p2984_p10 = pneg %p2983_p11 }
 0x4c8   : > { %v2918_v13 = vpop.eup %2917 }
 0x4c9   : > { %v2920_v51 = vpop.eup %2919  ;;  %2771 = vpush %v2918_v13 }
 0x4ca   : > { %2773 = vpush %v2920_v51 }
 0x4fa   : > { %s2772_s29 = spop %2771 }
 0x4fb   : > { %s2464_s19 = smul.f32 %s2772_s29, %s2458_s22  ;;  %s2774_s26 = spop %2773 }
 0x4fc   : > { %s2478_s13 = smul.f32 %s2774_s26, %s2473_s14 }
 0x4fd   : > { %s2465_s18 = ssub.f32 1.0, %s2464_s19 }
 0x4fe   : > { %s2479_s25 = ssub.f32 1.0, %s2478_s13 }
 0x4ff   : > { %s2466_s23 = sadd.f32 %s2465_s18, %s1376_s1  ;;  %s6063_s18 = scalar_lea.hbm %s6131_s2, %s2680_s15 }
 0x500   : > { %s2480_s21 = sadd.f32 %s2479_s25, %s2471_s27  ;;  %s2497_s25 = scalar_lea.sflag [#allocation9], %s3265_s8 }
 0x501   : > { %s2488_s10 = smul.f32 0.5, %s2466_s23  ;;  %s2987_s27 = scalar_lea.vmem %s2986_s6, 256 }
 0x502   : > { %s2483_s9 = smul.f32 0.5, %s2480_s21  ;;  %p2989_p7 = scmp.lt.s32.totalorder %s2987_s27, %s2981_s17 }
 0x503   : > { %v2489_v28 = vstv %s2488_s10 }
 0x504   : > { %v2484_v1 = vstv %s2483_s9  ;;  %2490 = vst [vmem:[%s239_s7] sm:$0xff] %v2489_v28  ;;  %p2990_p9 = por %p2989_p7, %p2988_p5 }
 0x505   : > { %2485 = vst [vmem:[%s232_s12] sm:$0xff] %v2484_v1 }
 0x506   : > { %p2991_p3 = pnand %p2990_p9, %p2984_p10 }
 0x508   : > { %2994 = shalt.err (!%p2991_p3)
}
 0x509   : > { %s2995_s12 = scalar_lea.hbm %s6056_s28, 128  ;;  %s2999_s1 = scalar_lea.hbm %s6132_s3, 256 }
 0x50a   : > { %p2996_p12 = scmp.ne.s32.totalorder %s6056_s28, %s2995_s12  ;;  %p3000_p2 = scmp.lt.u32.totalorder %s6056_s28, %s6132_s3 }
 0x50b   : > { %p3001_p4 = scmp.lt.u32.totalorder %s2999_s1, %s2995_s12  ;;  %p3003_p13 = scmp.lt.u32.totalorder %s2995_s12, %s6056_s28 }
 0x50c   : > { %p2997_p8 = pnand %p2996_p12, %p6345_p1 }
 0x50d   : > { %p3002_p6 = por %p3001_p4, %p3000_p2 }
 0x50e   : > { %p2998_p0 = pneg %p2997_p8 }
 0x50f   : > { %p3004_p11 = por %p3003_p13, %p3002_p6 }
 0x511   : > { %p3005_p10 = pnand %p3004_p11, %p2998_p0 }
 0x513   : > { %3008 = shalt.err (!%p3005_p10)
}
 0x514   : > { %2780 = dma.vmem_to_hbm [thread:$0]  (%p6345_p1), %s6058_s4, 128, %s6056_s28, %s2497_s25  }
 0x515   : > { %s2492_s29 = scalar_lea.sflag [#allocation4], %s3265_s8  ;;  %s3009_s19 = scalar_lea.vmem %s6065_s5, 128 }
 0x516   : > { %p3010_p5 = scmp.ne.s32.totalorder %s6065_s5, %s3009_s19  ;;  %s3096_s26 = smov [#allocation7]  }
 0x517   : > { %s3013_s23 = sshll.u32 %s3096_s26, 4  ;;  %s3014_s23 = int_to_ptr.vmem [resolvable:$false] %s3013_s23 }
 0x518   : > { %p3011_p7 = pnand %p3010_p5, %p6345_p1  ;;  %s3015_s7 = scalar_lea.vmem %s3014_s23, 256 }
 0x519   : > { %p3016_p3 = scmp.lt.s32.totalorder %s6065_s5, %s3014_s23  ;;  %p3017_p12 = scmp.lt.s32.totalorder %s3015_s7, %s3009_s19 }
 0x51a   : > { %p3012_p9 = pneg %p3011_p7 }
 0x51b   : > { %p3018_p8 = por %p3017_p12, %p3016_p3 }
 0x51d   : > { %p3019_p0 = pnand %p3018_p8, %p3012_p9 }
 0x51f   : > { %3022 = shalt.err (!%p3019_p0)
}
 0x520   : > { %s3023_s8 = scalar_lea.hbm %s6063_s18, 128  ;;  %s3027_s10 = scalar_lea.hbm %s6131_s2, 256 }
 0x521   : > { %p3024_p2 = scmp.ne.s32.totalorder %s6063_s18, %s3023_s8  ;;  %p3028_p13 = scmp.lt.u32.totalorder %s6063_s18, %s6131_s2 }
 0x522   : > { %p3029_p11 = scmp.lt.u32.totalorder %s3027_s10, %s3023_s8  ;;  %p3031_p5 = scmp.lt.u32.totalorder %s3023_s8, %s6063_s18 }
 0x523   : > { %p3025_p4 = pnand %p3024_p2, %p6345_p1 }
 0x524   : > { %p3030_p10 = por %p3029_p11, %p3028_p13 }
 0x525   : > { %p3026_p6 = pneg %p3025_p4 }
 0x526   : > { %p3032_p7 = por %p3031_p5, %p3030_p10 }
 0x528   : > { %p3033_p9 = pnand %p3032_p7, %p3026_p6 }
 0x52a   : > { %3036 = shalt.err (!%p3033_p9)
}
 0x52b   : > { %2779 = dma.vmem_to_hbm [thread:$0]  (%p6345_p1), %s6065_s5, 128, %s6063_s18, %s2492_s29  }
 0x52c PF: > { %s6346_s28 = sld [smem:[#allocation14_spill]]  ;;  %s6347_s9 = sld [smem:[#allocation20_spill]] }
 0x52d   : > { %s6348_s13 = sld [smem:[#allocation17_spill]] }
 0x532   : > { %s2535_s16 = sand.u32 1, %s6346_s28   ;;  %p6349_p3 = scmp.ne.s32.totalorder %s6347_s9, 0 }
 0x533   : > { %p6350_p12 = scmp.ge.s32.totalorder %s6348_s13, 2  ;;  %s2536_s25 = scalar_lea.sflag [#allocation4], %s2535_s16 }
 0x535   : > { %p2791_p8 = pnand %p6350_p12, %p6349_p3 }
 0x537   : > { %3062 = dma.done.wait (!%p2791_p8), %s2536_s25, 128  }
 0x538   : > { %3064 = vsyncadd (!%p2791_p8), %s2536_s25, 4294967168  ;;  %s2545_s17 = scalar_lea.sflag [#allocation9], %s2535_s16 }
 0x539   : > { %3066 = dma.done.wait (!%p2791_p8), %s2545_s17, 128  }
 0x53a   : > { %3068 = vsyncadd (!%p2791_p8), %s2545_s17, 4294967168  ;;  %s6351_s15 = sld [smem:[#allocation18_spill]]  ;;  %s6352_s12 = sld [smem:[#allocation15_spill]] }
 0x53b   : > { %s6353_s13 = sld [smem:[#allocation16_spill]]  ;;  %s6354_s14 = sld [smem:[#allocation19_spill]] }
 0x540   : > { %p23_p1 = scmp.ge.s32.totalorder %s6351_s15, 4  }
 0x542   :  { %25 = sbr.rel (!%p23_p1) target bundleno = 12 (0xc), region = 105 }
 0x549   :  { %2550 = vsyncpa [#allocation3], 1 }
 0x54a   :  { %2552 = vsyncpa [#allocation3 + $0x1], 1 }
 0x54b   :  { %2553 = vsyncpa [#allocation6], 1 }
 0x54c   :  { %2555 = vsyncpa [#allocation6 + $0x1], 1 }
 0x54d   :  { %2556 = vsyncpa [#allocation4], 1 }
 0x54e   :  { %2558 = vsyncpa [#allocation4 + $0x1], 1 }
 0x54f   :  { %2559 = vsyncpa [#allocation9], 1 }
 0x550   :  { %2561 = vsyncpa [#allocation9 + $0x1], 1 }

</bundles_post_ra>
